<compile_context>
chip_gen: v7x
topology: tpu7x:2x2x1
jax: 0.10.0
libtpu: 0.0.40
codegen_flags: <defaults>
</compile_context>

<pallas_src>
import functools

import numpy as np
import jax
import jax.numpy as jnp
from jax.experimental import pallas as pl
from jax.experimental.pallas import tpu as pltpu


# ---------------------------------------------------------------------------
# In-kernel helpers
# ---------------------------------------------------------------------------

def _conv3x3_acc(pad_ref, w_ref, Ho, Wo, CT, stride):
    """Sum of 9 shifted (Ho*Wo, Cin)x(Cin, CT) MXU matmuls over a zero-padded VMEM
    tile.  stride > 1 uses strided VMEM loads so the strided conv is computed
    directly (no stride^2 overcompute)."""
    acc = jnp.zeros((Ho * Wo, CT), jnp.float32)
    for kh in range(3):
        for kw in range(3):
            if stride == 1:
                patch = pad_ref[kh:kh + Ho, kw:kw + Wo, :]
            else:
                patch = pad_ref[pl.ds(kh, Ho, stride=stride),
                                pl.ds(kw, Wo, stride=stride), :]
            acc = acc + jnp.dot(patch.reshape(Ho * Wo, -1), w_ref[kh, kw],
                                preferred_element_type=jnp.float32)
    return acc


def _fill_padded(pad_ref, h):
    """Write h into the interior of the zeroed (H+2, W+2, C) VMEM scratch."""
    H, W, _ = h.shape
    pad_ref[...] = jnp.zeros_like(pad_ref)
    pad_ref[1:H + 1, 1:W + 1, :] = h.astype(pad_ref.dtype)


# ---------------------------------------------------------------------------
# Kernel A: h2 = relu(bn2(conv1(relu(bn1(x)), stride)))    (BN folded to affine)
# ---------------------------------------------------------------------------

def _bn_conv_bn_relu_kernel(x_ref, w_ref, s1_ref, b1_ref, s2_ref, b2_ref,
                            o_ref, pad_ref, *, stride):
    _, H, W, _ = x_ref.shape
    _, Ho, Wo, CT = o_ref.shape
    # BN1 + ReLU prologue in f32 (VPU); cast to bf16 only for the MXU operands.
    h = jnp.maximum(x_ref[0] * s1_ref[...] + b1_ref[...], 0.0)
    _fill_padded(pad_ref, h)                 # zero halo built in VMEM, no HBM pad
    acc = _conv3x3_acc(pad_ref, w_ref, Ho, Wo, CT, stride)
    # BN2 + ReLU epilogue.  (Must live here: conv2's zero padding applies to the
    # post-BN2 activation, so a BN prologue on a zero-padded conv2 input is wrong.)
    out = jnp.maximum(acc * s2_ref[...] + b2_ref[...], 0.0)
    o_ref[...] = out.reshape(1, Ho, Wo, CT).astype(o_ref.dtype)


# ---------------------------------------------------------------------------
# Kernel B: y = conv2(h2) + shortcut      (two variants)
# ---------------------------------------------------------------------------

def _conv_add_kernel(h_ref, w_ref, res_ref, o_ref, pad_ref):
    """Identity shortcut: y = conv2(h2) + x."""
    _, Ho, Wo, CT = o_ref.shape
    _fill_padded(pad_ref, h_ref[0])
    acc = _conv3x3_acc(pad_ref, w_ref, Ho, Wo, CT, 1)
    acc = acc + res_ref[0].astype(jnp.float32).reshape(Ho * Wo, CT)
    o_ref[...] = acc.reshape(1, Ho, Wo, CT).astype(o_ref.dtype)


def _conv_add_shortcut_kernel(h_ref, w_ref, xs_ref, s1_ref, b1_ref, wsc_ref,
                              o_ref, pad_ref):
    """1x1-conv shortcut fused: y = conv2(h2) + relu(bn1(x_strided)) @ w_sc."""
    _, Ho, Wo, CT = o_ref.shape
    _fill_padded(pad_ref, h_ref[0])
    acc = _conv3x3_acc(pad_ref, w_ref, Ho, Wo, CT, 1)
    h1s = jnp.maximum(xs_ref[0] * s1_ref[...] + b1_ref[...], 0.0)
    acc = acc + jnp.dot(h1s.astype(jnp.bfloat16).reshape(Ho * Wo, -1), wsc_ref[...],
                        preferred_element_type=jnp.float32)
    o_ref[...] = acc.reshape(1, Ho, Wo, CT).astype(o_ref.dtype)


# ---------------------------------------------------------------------------
# Wrappers around pallas_call
# ---------------------------------------------------------------------------

def _cout_tile(cout, target=256):
    if cout <= target:
        return cout
    for t in (target, 128):
        if cout % t == 0:
            return t
    return cout


def _conv1_stage(x, w1, s1, b1, s2, b2, stride):
    N, H, W, Cin = x.shape
    Cout = w1.shape[3]
    ct = _cout_tile(Cout)

    def call(kernel_stride):
        Ho, Wo = H // kernel_stride, W // kernel_stride
        return pl.pallas_call(
            functools.partial(_bn_conv_bn_relu_kernel, stride=kernel_stride),
            out_shape=jax.ShapeDtypeStruct((N, Ho, Wo, Cout), jnp.bfloat16),
            grid=(N, Cout // ct),
            in_specs=[
                pl.BlockSpec((1, H, W, Cin), lambda n, c: (n, 0, 0, 0)),
                pl.BlockSpec((3, 3, Cin, ct), lambda n, c: (0, 0, 0, c)),
                pl.BlockSpec((1, Cin), lambda n, c: (0, 0)),
                pl.BlockSpec((1, Cin), lambda n, c: (0, 0)),
                pl.BlockSpec((1, ct), lambda n, c: (0, c)),
                pl.BlockSpec((1, ct), lambda n, c: (0, c)),
            ],
            out_specs=pl.BlockSpec((1, Ho, Wo, ct), lambda n, c: (n, 0, 0, c)),
            scratch_shapes=[pltpu.VMEM((H + 2, W + 2, Cin), jnp.bfloat16)],
            compiler_params=pltpu.CompilerParams(
                dimension_semantics=("parallel", "parallel")),
        )(x, w1, s1.reshape(1, Cin), b1.reshape(1, Cin),
          s2.reshape(1, Cout), b2.reshape(1, Cout))

    if stride == 1:
        return call(1)
    try:
        return call(stride)          # in-kernel strided taps (preferred path)
    except Exception:
        # Fallback if this toolchain rejects strided VMEM loads: compute at
        # stride 1 and subsample (costs ~stride^2 extra conv1 work).
        return call(1)[:, ::stride, ::stride, :]


def _conv2_stage_identity(h2, w2, x_res):
    N, Ho, Wo, Cmid = h2.shape
    Cout = w2.shape[3]
    ct = _cout_tile(Cout)
    return pl.pallas_call(
        _conv_add_kernel,
        out_shape=jax.ShapeDtypeStruct((N, Ho, Wo, Cout), jnp.float32),
        grid=(N, Cout // ct),
        in_specs=[
            pl.BlockSpec((1, Ho, Wo, Cmid), lambda n, c: (n, 0, 0, 0)),
            pl.BlockSpec((3, 3, Cmid, ct), lambda n, c: (0, 0, 0, c)),
            pl.BlockSpec((1, Ho, Wo, ct), lambda n, c: (n, 0, 0, c)),
        ],
        out_specs=pl.BlockSpec((1, Ho, Wo, ct), lambda n, c: (n, 0, 0, c)),
        scratch_shapes=[pltpu.VMEM((Ho + 2, Wo + 2, Cmid), jnp.bfloat16)],
        compiler_params=pltpu.CompilerParams(
            dimension_semantics=("parallel", "parallel")),
    )(h2, w2, x_res)


def _conv2_stage_shortcut(h2, w2, xs, s1, b1, wsc):
    N, Ho, Wo, Cmid = h2.shape
    Cin = xs.shape[3]
    Cout = w2.shape[3]
    ct = _cout_tile(Cout)
    return pl.pallas_call(
        _conv_add_shortcut_kernel,
        out_shape=jax.ShapeDtypeStruct((N, Ho, Wo, Cout), jnp.float32),
        grid=(N, Cout // ct),
        in_specs=[
            pl.BlockSpec((1, Ho, Wo, Cmid), lambda n, c: (n, 0, 0, 0)),
            pl.BlockSpec((3, 3, Cmid, ct), lambda n, c: (0, 0, 0, c)),
            pl.BlockSpec((1, Ho, Wo, Cin), lambda n, c: (n, 0, 0, 0)),
            pl.BlockSpec((1, Cin), lambda n, c: (0, 0)),
            pl.BlockSpec((1, Cin), lambda n, c: (0, 0)),
            pl.BlockSpec((Cin, ct), lambda n, c: (0, c)),
        ],
        out_specs=pl.BlockSpec((1, Ho, Wo, ct), lambda n, c: (n, 0, 0, c)),
        scratch_shapes=[pltpu.VMEM((Ho + 2, Wo + 2, Cmid), jnp.bfloat16)],
        compiler_params=pltpu.CompilerParams(
            dimension_semantics=("parallel", "parallel")),
    )(h2, w2, xs, s1.reshape(1, Cin), b1.reshape(1, Cin), wsc)


def basic_wide_block_forward(x_nchw, params, stride, drop_rate=0.0, eps=1e-5):
    """Forward pass of BasicWideBlock.  Input/output are NCHW like PyTorch."""
    x = jnp.transpose(x_nchw, (0, 2, 3, 1)).astype(jnp.float32)   # NCHW -> NHWC
    N, H, W, Cin = x.shape
    Cout = params["conv1_w"].shape[3]
    equal_in_out = (Cin == Cout)
    assert stride in (1, 2) and H % stride == 0 and W % stride == 0

    # Fold BatchNorm running stats to a per-channel affine (inference mode).
    s1 = (params["bn1_gamma"] / jnp.sqrt(params["bn1_var"] + eps)).astype(jnp.float32)
    b1 = (params["bn1_beta"] - params["bn1_mean"] * s1).astype(jnp.float32)
    s2 = (params["bn2_gamma"] / jnp.sqrt(params["bn2_var"] + eps)).astype(jnp.float32)
    b2 = (params["bn2_beta"] - params["bn2_mean"] * s2).astype(jnp.float32)

    w1 = params["conv1_w"].astype(jnp.bfloat16)          # bf16 MXU operands
    w2 = params["conv2_w"].astype(jnp.bfloat16)

    # Stage 1 (fused): h2 = relu(bn2(conv1(relu(bn1(x)), stride))), stored as bf16.
    h2 = _conv1_stage(x, w1, s1, b1, s2, b2, stride)

    if drop_rate > 0:
        # TODO(synk): training-mode dropout not implemented; eval-mode dropout is
        # identity and the module default drop_rate is 0.0.
        pass

    # Stage 2 (fused): y = conv2(h2) + shortcut.
    if equal_in_out:
        assert stride == 1, "identity shortcut requires stride 1 (as in the PyTorch module)"
        y = _conv2_stage_identity(h2, w2, x)
    else:
        wsc = params["shortcut_w"].astype(jnp.bfloat16)
        xs = x[:, ::stride, ::stride, :]   # small strided gather feeding the fused 1x1 shortcut
        y = _conv2_stage_shortcut(h2, w2, xs, s1, b1, wsc)

    return jnp.transpose(y, (0, 3, 1, 2))                # NHWC -> NCHW


# ---------------------------------------------------------------------------
# Deterministic parameter init + pure-JAX reference
# ---------------------------------------------------------------------------

def init_params(key, in_planes, out_planes):
    ks = jax.random.split(key, 11)
    p = {}
    p["bn1_gamma"] = jax.random.uniform(ks[0], (in_planes,), jnp.float32, 0.5, 1.5)
    p["bn1_beta"] = 0.1 * jax.random.normal(ks[1], (in_planes,), jnp.float32)
    p["bn1_mean"] = 0.1 * jax.random.normal(ks[2], (in_planes,), jnp.float32)
    p["bn1_var"] = jax.random.uniform(ks[3], (in_planes,), jnp.float32, 0.5, 1.5)
    p["conv1_w"] = (jax.random.normal(ks[4], (3, 3, in_planes, out_planes), jnp.float32)
                    / np.sqrt(9 * in_planes))
    p["bn2_gamma"] = jax.random.uniform(ks[5], (out_planes,), jnp.float32, 0.5, 1.5)
    p["bn2_beta"] = 0.1 * jax.random.normal(ks[6], (out_planes,), jnp.float32)
    p["bn2_mean"] = 0.1 * jax.random.normal(ks[7], (out_planes,), jnp.float32)
    p["bn2_var"] = jax.random.uniform(ks[8], (out_planes,), jnp.float32, 0.5, 1.5)
    p["conv2_w"] = (jax.random.normal(ks[9], (3, 3, out_planes, out_planes), jnp.float32)
                    / np.sqrt(9 * out_planes))
    if in_planes != out_planes:
        p["shortcut_w"] = (jax.random.normal(ks[10], (in_planes, out_planes), jnp.float32)
                           / np.sqrt(in_planes))
    return p


def reference_forward(x_nchw, params, stride, eps=1e-5):
    x = jnp.transpose(x_nchw, (0, 2, 3, 1)).astype(jnp.float32)

    def bnr(x, g, b, m, v):
        return jnp.maximum((x - m) / jnp.sqrt(v + eps) * g + b, 0.0)

    def conv(x, w, s, pad):
        return jax.lax.conv_general_dilated(
            x, w, (s, s), pad,
            dimension_numbers=("NHWC", "HWIO", "NHWC"),
            precision=jax.lax.Precision.HIGHEST)

    in_planes = x.shape[-1]
    out_planes = params["conv1_w"].shape[3]
    h1 = bnr(x, params["bn1_gamma"], params["bn1_beta"],
             params["bn1_mean"], params["bn1_var"])
    out = conv(h1, params["conv1_w"], stride, ((1, 1), (1, 1)))
    out = bnr(out, params["bn2_gamma"], params["bn2_beta"],
              params["bn2_mean"], params["bn2_var"])
    out = conv(out, params["conv2_w"], 1, ((1, 1), (1, 1)))
    if in_planes == out_planes:
        sc = x
    else:
        sc = conv(h1, params["shortcut_w"][None, None], stride, ((0, 0), (0, 0)))
    return jnp.transpose(sc + out, (0, 3, 1, 2))


# ---------------------------------------------------------------------------

if __name__ == "__main__":
    key = jax.random.PRNGKey(0)
    kx, kp1, kp2 = jax.random.split(key, 3)
    N, H, W = 2, 16, 16

    # Case 1: in_planes != out_planes, stride 2  (fused 1x1-conv shortcut path).
    in_planes, out_planes, stride = 4, 8, 2
    x = jax.random.normal(kx, (N, in_planes, H, W), jnp.float32)
    params = init_params(kp1, in_planes, out_planes)
    y = jax.block_until_ready(basic_wide_block_forward(x, params, stride))
    assert y.shape == (N, out_planes, H // stride, W // stride)
    y_ref = reference_forward(x, params, stride)
    np.testing.assert_allclose(np.asarray(y), np.asarray(y_ref), rtol=5e-2, atol=5e-2)

    # Case 2: in_planes == out_planes, stride 1  (identity shortcut path).
    params_eq = init_params(kp2, in_planes, in_planes)
    y2 = jax.block_until_ready(basic_wide_block_forward(x, params_eq, 1))
    assert y2.shape == (N, in_planes, H, W)
    y2_ref = reference_forward(x, params_eq, 1)
    np.testing.assert_allclose(np.asarray(y2), np.asarray(y2_ref), rtol=5e-2, atol=5e-2)

    print("KERNEL_OK")
</pallas_src>

<mosaic_0001>
module attributes {stable_mosaic.version = 11 : i64} {
  func.func @_bn_conv_bn_relu_kernel(%arg0: i32, %arg1: i32, %arg2: memref<1x16x16x4xf32, #tpu.memory_space<vmem>>, %arg3: memref<3x3x4x8xbf16, #tpu.memory_space<vmem>>, %arg4: memref<1x4xf32, #tpu.memory_space<vmem>>, %arg5: memref<1x4xf32, #tpu.memory_space<vmem>>, %arg6: memref<1x8xf32, #tpu.memory_space<vmem>>, %arg7: memref<1x8xf32, #tpu.memory_space<vmem>>, %arg8: memref<1x8x8x8xbf16, #tpu.memory_space<vmem>>, %arg9: memref<18x18x4xbf16, #tpu.memory_space<vmem>>) attributes {dimension_semantics = [#tpu.dimension_semantics<parallel>, #tpu.dimension_semantics<parallel>], iteration_bounds = array<i64: 2, 1>, scalar_prefetch = 0 : i64, scratch_operands = 1 : i64, tpu.core_type = #tpu.core_type<tc>, window_params = [{transform_indices = @transform_0, window_bounds = array<i64: 1, 16, 16, 4>}, {transform_indices = @transform_1, window_bounds = array<i64: 3, 3, 4, 8>}, {pipeline_mode = #tpu.pipeline_mode<synchronous>, transform_indices = @transform_2, window_bounds = array<i64: 1, 4>}, {pipeline_mode = #tpu.pipeline_mode<synchronous>, transform_indices = @transform_3, window_bounds = array<i64: 1, 4>}, {transform_indices = @transform_4, window_bounds = array<i64: 1, 8>}, {transform_indices = @transform_5, window_bounds = array<i64: 1, 8>}, {transform_indices = @transform_6, window_bounds = array<i64: 1, 8, 8, 8>}]} {
    %c0 = arith.constant 0 : index
    %c0_0 = arith.constant 0 : index
    %c0_1 = arith.constant 0 : index
    %c0_2 = arith.constant 0 : index
    %0 = vector.load %arg2[%c0, %c0_0, %c0_1, %c0_2] : memref<1x16x16x4xf32, #tpu.memory_space<vmem>>, vector<1x16x16x4xf32>
    %1 = vector.shape_cast %0 : vector<1x16x16x4xf32> to vector<16x16x4xf32>
    %c0_3 = arith.constant 0 : index
    %c0_4 = arith.constant 0 : index
    %2 = vector.load %arg4[%c0_3, %c0_4] : memref<1x4xf32, #tpu.memory_space<vmem>>, vector<1x4xf32>
    %3 = vector.shape_cast %2 : vector<1x4xf32> to vector<1x1x4xf32>
    %4 = vector.broadcast %3 : vector<1x1x4xf32> to vector<16x16x4xf32>
    %5 = arith.mulf %1, %4 : vector<16x16x4xf32>
    %c0_5 = arith.constant 0 : index
    %c0_6 = arith.constant 0 : index
    %6 = vector.load %arg5[%c0_5, %c0_6] : memref<1x4xf32, #tpu.memory_space<vmem>>, vector<1x4xf32>
    %7 = vector.shape_cast %6 : vector<1x4xf32> to vector<1x1x4xf32>
    %8 = vector.broadcast %7 : vector<1x1x4xf32> to vector<16x16x4xf32>
    %9 = arith.addf %5, %8 : vector<16x16x4xf32>
    %cst = arith.constant 0.000000e+00 : f32
    %10 = vector.broadcast %cst : f32 to vector<16x16x4xf32>
    %11 = arith.maximumf %9, %10 : vector<16x16x4xf32>
    %cst_7 = arith.constant 0.000000e+00 : bf16
    %12 = vector.broadcast %cst_7 : bf16 to vector<18x18x4xbf16>
    %c0_8 = arith.constant 0 : index
    %c0_9 = arith.constant 0 : index
    %c0_10 = arith.constant 0 : index
    %13 = vector.load %arg9[%c0_8, %c0_9, %c0_10] : memref<18x18x4xbf16, #tpu.memory_space<vmem>>, vector<18x18x4xbf16>
    tpu.vector_store %arg9[%c0_8, %c0_9, %c0_10], %12 {strides = array<i32>} : memref<18x18x4xbf16, #tpu.memory_space<vmem>>, vector<18x18x4xbf16>,
    %14 = arith.truncf %11 : vector<16x16x4xf32> to vector<16x16x4xbf16>
    %c1 = arith.constant 1 : index
    %c1_11 = arith.constant 1 : index
    %c0_12 = arith.constant 0 : index
    %15 = vector.load %arg9[%c1, %c1_11, %c0_12] : memref<18x18x4xbf16, #tpu.memory_space<vmem>>, vector<16x16x4xbf16>
    tpu.vector_store %arg9[%c1, %c1_11, %c0_12], %14 {strides = array<i32>} : memref<18x18x4xbf16, #tpu.memory_space<vmem>>, vector<16x16x4xbf16>,
    %cst_13 = arith.constant 0.000000e+00 : f32
    %16 = vector.broadcast %cst_13 : f32 to vector<64x8xf32>
    %c0_14 = arith.constant 0 : index
    %c0_15 = arith.constant 0 : index
    %c0_16 = arith.constant 0 : index
    %17 = tpu.strided_load %arg9[%c0_14, %c0_15, %c0_16] {strides = array<i32: 2, 2, 1>} : memref<18x18x4xbf16, #tpu.memory_space<vmem>>, vector<8x8x4xbf16>
    %18 = vector.shape_cast %17 : vector<8x8x4xbf16> to vector<64x4xbf16>
    %c0_17 = arith.constant 0 : index
    %c0_18 = arith.constant 0 : index
    %c0_19 = arith.constant 0 : index
    %c0_20 = arith.constant 0 : index
    %19 = vector.load %arg3[%c0_17, %c0_18, %c0_19, %c0_20] : memref<3x3x4x8xbf16, #tpu.memory_space<vmem>>, vector<1x1x4x8xbf16>
    %20 = vector.shape_cast %19 : vector<1x1x4x8xbf16> to vector<4x8xbf16>
    %cst_21 = arith.constant dense<0.000000e+00> : vector<64x8xf32>
    %21 = tpu.matmul %18, %20, %cst_21 {dimension_numbers = #tpu.dot_dimension_numbers<[1], [0], [0], [1], [0, 0, 1, 1], [], []>} : vector<64x4xbf16>, vector<4x8xbf16>, vector<64x8xf32> -> vector<64x8xf32>
    %22 = arith.addf %16, %21 : vector<64x8xf32>
    %c0_22 = arith.constant 0 : index
    %c1_23 = arith.constant 1 : index
    %c0_24 = arith.constant 0 : index
    %23 = tpu.strided_load %arg9[%c0_22, %c1_23, %c0_24] {strides = array<i32: 2, 2, 1>} : memref<18x18x4xbf16, #tpu.memory_space<vmem>>, vector<8x8x4xbf16>
    %24 = vector.shape_cast %23 : vector<8x8x4xbf16> to vector<64x4xbf16>
    %c0_25 = arith.constant 0 : index
    %c1_26 = arith.constant 1 : index
    %c0_27 = arith.constant 0 : index
    %c0_28 = arith.constant 0 : index
    %25 = vector.load %arg3[%c0_25, %c1_26, %c0_27, %c0_28] : memref<3x3x4x8xbf16, #tpu.memory_space<vmem>>, vector<1x1x4x8xbf16>
    %26 = vector.shape_cast %25 : vector<1x1x4x8xbf16> to vector<4x8xbf16>
    %cst_29 = arith.constant dense<0.000000e+00> : vector<64x8xf32>
    %27 = tpu.matmul %24, %26, %cst_29 {dimension_numbers = #tpu.dot_dimension_numbers<[1], [0], [0], [1], [0, 0, 1, 1], [], []>} : vector<64x4xbf16>, vector<4x8xbf16>, vector<64x8xf32> -> vector<64x8xf32>
    %28 = arith.addf %22, %27 : vector<64x8xf32>
    %c0_30 = arith.constant 0 : index
    %c2 = arith.constant 2 : index
    %c0_31 = arith.constant 0 : index
    %29 = tpu.strided_load %arg9[%c0_30, %c2, %c0_31] {strides = array<i32: 2, 2, 1>} : memref<18x18x4xbf16, #tpu.memory_space<vmem>>, vector<8x8x4xbf16>
    %30 = vector.shape_cast %29 : vector<8x8x4xbf16> to vector<64x4xbf16>
    %c0_32 = arith.constant 0 : index
    %c2_33 = arith.constant 2 : index
    %c0_34 = arith.constant 0 : index
    %c0_35 = arith.constant 0 : index
    %31 = vector.load %arg3[%c0_32, %c2_33, %c0_34, %c0_35] : memref<3x3x4x8xbf16, #tpu.memory_space<vmem>>, vector<1x1x4x8xbf16>
    %32 = vector.shape_cast %31 : vector<1x1x4x8xbf16> to vector<4x8xbf16>
    %cst_36 = arith.constant dense<0.000000e+00> : vector<64x8xf32>
    %33 = tpu.matmul %30, %32, %cst_36 {dimension_numbers = #tpu.dot_dimension_numbers<[1], [0], [0], [1], [0, 0, 1, 1], [], []>} : vector<64x4xbf16>, vector<4x8xbf16>, vector<64x8xf32> -> vector<64x8xf32>
    %34 = arith.addf %28, %33 : vector<64x8xf32>
    %c1_37 = arith.constant 1 : index
    %c0_38 = arith.constant 0 : index
    %c0_39 = arith.constant 0 : index
    %35 = tpu.strided_load %arg9[%c1_37, %c0_38, %c0_39] {strides = array<i32: 2, 2, 1>} : memref<18x18x4xbf16, #tpu.memory_space<vmem>>, vector<8x8x4xbf16>
    %36 = vector.shape_cast %35 : vector<8x8x4xbf16> to vector<64x4xbf16>
    %c1_40 = arith.constant 1 : index
    %c0_41 = arith.constant 0 : index
    %c0_42 = arith.constant 0 : index
    %c0_43 = arith.constant 0 : index
    %37 = vector.load %arg3[%c1_40, %c0_41, %c0_42, %c0_43] : memref<3x3x4x8xbf16, #tpu.memory_space<vmem>>, vector<1x1x4x8xbf16>
    %38 = vector.shape_cast %37 : vector<1x1x4x8xbf16> to vector<4x8xbf16>
    %cst_44 = arith.constant dense<0.000000e+00> : vector<64x8xf32>
    %39 = tpu.matmul %36, %38, %cst_44 {dimension_numbers = #tpu.dot_dimension_numbers<[1], [0], [0], [1], [0, 0, 1, 1], [], []>} : vector<64x4xbf16>, vector<4x8xbf16>, vector<64x8xf32> -> vector<64x8xf32>
    %40 = arith.addf %34, %39 : vector<64x8xf32>
    %c1_45 = arith.constant 1 : index
    %c1_46 = arith.constant 1 : index
    %c0_47 = arith.constant 0 : index
    %41 = tpu.strided_load %arg9[%c1_45, %c1_46, %c0_47] {strides = array<i32: 2, 2, 1>} : memref<18x18x4xbf16, #tpu.memory_space<vmem>>, vector<8x8x4xbf16>
    %42 = vector.shape_cast %41 : vector<8x8x4xbf16> to vector<64x4xbf16>
    %c1_48 = arith.constant 1 : index
    %c1_49 = arith.constant 1 : index
    %c0_50 = arith.constant 0 : index
    %c0_51 = arith.constant 0 : index
    %43 = vector.load %arg3[%c1_48, %c1_49, %c0_50, %c0_51] : memref<3x3x4x8xbf16, #tpu.memory_space<vmem>>, vector<1x1x4x8xbf16>
    %44 = vector.shape_cast %43 : vector<1x1x4x8xbf16> to vector<4x8xbf16>
    %cst_52 = arith.constant dense<0.000000e+00> : vector<64x8xf32>
    %45 = tpu.matmul %42, %44, %cst_52 {dimension_numbers = #tpu.dot_dimension_numbers<[1], [0], [0], [1], [0, 0, 1, 1], [], []>} : vector<64x4xbf16>, vector<4x8xbf16>, vector<64x8xf32> -> vector<64x8xf32>
    %46 = arith.addf %40, %45 : vector<64x8xf32>
    %c1_53 = arith.constant 1 : index
    %c2_54 = arith.constant 2 : index
    %c0_55 = arith.constant 0 : index
    %47 = tpu.strided_load %arg9[%c1_53, %c2_54, %c0_55] {strides = array<i32: 2, 2, 1>} : memref<18x18x4xbf16, #tpu.memory_space<vmem>>, vector<8x8x4xbf16>
    %48 = vector.shape_cast %47 : vector<8x8x4xbf16> to vector<64x4xbf16>
    %c1_56 = arith.constant 1 : index
    %c2_57 = arith.constant 2 : index
    %c0_58 = arith.constant 0 : index
    %c0_59 = arith.constant 0 : index
    %49 = vector.load %arg3[%c1_56, %c2_57, %c0_58, %c0_59] : memref<3x3x4x8xbf16, #tpu.memory_space<vmem>>, vector<1x1x4x8xbf16>
    %50 = vector.shape_cast %49 : vector<1x1x4x8xbf16> to vector<4x8xbf16>
    %cst_60 = arith.constant dense<0.000000e+00> : vector<64x8xf32>
    %51 = tpu.matmul %48, %50, %cst_60 {dimension_numbers = #tpu.dot_dimension_numbers<[1], [0], [0], [1], [0, 0, 1, 1], [], []>} : vector<64x4xbf16>, vector<4x8xbf16>, vector<64x8xf32> -> vector<64x8xf32>
    %52 = arith.addf %46, %51 : vector<64x8xf32>
    %c2_61 = arith.constant 2 : index
    %c0_62 = arith.constant 0 : index
    %c0_63 = arith.constant 0 : index
    %53 = tpu.strided_load %arg9[%c2_61, %c0_62, %c0_63] {strides = array<i32: 2, 2, 1>} : memref<18x18x4xbf16, #tpu.memory_space<vmem>>, vector<8x8x4xbf16>
    %54 = vector.shape_cast %53 : vector<8x8x4xbf16> to vector<64x4xbf16>
    %c2_64 = arith.constant 2 : index
    %c0_65 = arith.constant 0 : index
    %c0_66 = arith.constant 0 : index
    %c0_67 = arith.constant 0 : index
    %55 = vector.load %arg3[%c2_64, %c0_65, %c0_66, %c0_67] : memref<3x3x4x8xbf16, #tpu.memory_space<vmem>>, vector<1x1x4x8xbf16>
    %56 = vector.shape_cast %55 : vector<1x1x4x8xbf16> to vector<4x8xbf16>
    %cst_68 = arith.constant dense<0.000000e+00> : vector<64x8xf32>
    %57 = tpu.matmul %54, %56, %cst_68 {dimension_numbers = #tpu.dot_dimension_numbers<[1], [0], [0], [1], [0, 0, 1, 1], [], []>} : vector<64x4xbf16>, vector<4x8xbf16>, vector<64x8xf32> -> vector<64x8xf32>
    %58 = arith.addf %52, %57 : vector<64x8xf32>
    %c2_69 = arith.constant 2 : index
    %c1_70 = arith.constant 1 : index
    %c0_71 = arith.constant 0 : index
    %59 = tpu.strided_load %arg9[%c2_69, %c1_70, %c0_71] {strides = array<i32: 2, 2, 1>} : memref<18x18x4xbf16, #tpu.memory_space<vmem>>, vector<8x8x4xbf16>
    %60 = vector.shape_cast %59 : vector<8x8x4xbf16> to vector<64x4xbf16>
    %c2_72 = arith.constant 2 : index
    %c1_73 = arith.constant 1 : index
    %c0_74 = arith.constant 0 : index
    %c0_75 = arith.constant 0 : index
    %61 = vector.load %arg3[%c2_72, %c1_73, %c0_74, %c0_75] : memref<3x3x4x8xbf16, #tpu.memory_space<vmem>>, vector<1x1x4x8xbf16>
    %62 = vector.shape_cast %61 : vector<1x1x4x8xbf16> to vector<4x8xbf16>
    %cst_76 = arith.constant dense<0.000000e+00> : vector<64x8xf32>
    %63 = tpu.matmul %60, %62, %cst_76 {dimension_numbers = #tpu.dot_dimension_numbers<[1], [0], [0], [1], [0, 0, 1, 1], [], []>} : vector<64x4xbf16>, vector<4x8xbf16>, vector<64x8xf32> -> vector<64x8xf32>
    %64 = arith.addf %58, %63 : vector<64x8xf32>
    %c2_77 = arith.constant 2 : index
    %c2_78 = arith.constant 2 : index
    %c0_79 = arith.constant 0 : index
    %65 = tpu.strided_load %arg9[%c2_77, %c2_78, %c0_79] {strides = array<i32: 2, 2, 1>} : memref<18x18x4xbf16, #tpu.memory_space<vmem>>, vector<8x8x4xbf16>
    %66 = vector.shape_cast %65 : vector<8x8x4xbf16> to vector<64x4xbf16>
    %c2_80 = arith.constant 2 : index
    %c2_81 = arith.constant 2 : index
    %c0_82 = arith.constant 0 : index
    %c0_83 = arith.constant 0 : index
    %67 = vector.load %arg3[%c2_80, %c2_81, %c0_82, %c0_83] : memref<3x3x4x8xbf16, #tpu.memory_space<vmem>>, vector<1x1x4x8xbf16>
    %68 = vector.shape_cast %67 : vector<1x1x4x8xbf16> to vector<4x8xbf16>
    %cst_84 = arith.constant dense<0.000000e+00> : vector<64x8xf32>
    %69 = tpu.matmul %66, %68, %cst_84 {dimension_numbers = #tpu.dot_dimension_numbers<[1], [0], [0], [1], [0, 0, 1, 1], [], []>} : vector<64x4xbf16>, vector<4x8xbf16>, vector<64x8xf32> -> vector<64x8xf32>
    %70 = arith.addf %64, %69 : vector<64x8xf32>
    %c0_85 = arith.constant 0 : index
    %c0_86 = arith.constant 0 : index
    %71 = vector.load %arg6[%c0_85, %c0_86] : memref<1x8xf32, #tpu.memory_space<vmem>>, vector<1x8xf32>
    %72 = vector.broadcast %71 : vector<1x8xf32> to vector<64x8xf32>
    %73 = arith.mulf %70, %72 : vector<64x8xf32>
    %c0_87 = arith.constant 0 : index
    %c0_88 = arith.constant 0 : index
    %74 = vector.load %arg7[%c0_87, %c0_88] : memref<1x8xf32, #tpu.memory_space<vmem>>, vector<1x8xf32>
    %75 = vector.broadcast %74 : vector<1x8xf32> to vector<64x8xf32>
    %76 = arith.addf %73, %75 : vector<64x8xf32>
    %cst_89 = arith.constant 0.000000e+00 : f32
    %77 = vector.broadcast %cst_89 : f32 to vector<64x8xf32>
    %78 = arith.maximumf %76, %77 : vector<64x8xf32>
    %79 = vector.shape_cast %78 : vector<64x8xf32> to vector<1x8x8x8xf32>
    %80 = arith.truncf %79 : vector<1x8x8x8xf32> to vector<1x8x8x8xbf16>
    %c0_90 = arith.constant 0 : index
    %c0_91 = arith.constant 0 : index
    %c0_92 = arith.constant 0 : index
    %c0_93 = arith.constant 0 : index
    %81 = vector.load %arg8[%c0_90, %c0_91, %c0_92, %c0_93] : memref<1x8x8x8xbf16, #tpu.memory_space<vmem>>, vector<1x8x8x8xbf16>
    tpu.vector_store %arg8[%c0_90, %c0_91, %c0_92, %c0_93], %80 {strides = array<i32>} : memref<1x8x8x8xbf16, #tpu.memory_space<vmem>>, vector<1x8x8x8xbf16>,
    return
  }
  func.func @transform_0(%arg0: i32, %arg1: i32) -> (i32, i32, i32, i32) {
    %c0_i32 = arith.constant 0 : i32
    %c0_i32_0 = arith.constant 0 : i32
    %c0_i32_1 = arith.constant 0 : i32
    %c0_i32_2 = arith.constant 0 : i32
    return %arg0, %c0_i32, %c0_i32_0, %c0_i32_1 : i32, i32, i32, i32
  }
  func.func @transform_1(%arg0: i32, %arg1: i32) -> (i32, i32, i32, i32) {
    %c0_i32 = arith.constant 0 : i32
    %c0_i32_0 = arith.constant 0 : i32
    %c0_i32_1 = arith.constant 0 : i32
    %c0_i32_2 = arith.constant 0 : i32
    return %c0_i32, %c0_i32_0, %c0_i32_1, %arg1 : i32, i32, i32, i32
  }
  func.func @transform_2(%arg0: i32, %arg1: i32) -> (i32, i32) {
    %c0_i32 = arith.constant 0 : i32
    %c0_i32_0 = arith.constant 0 : i32
    %c0_i32_1 = arith.constant 0 : i32
    return %c0_i32, %c0_i32_0 : i32, i32
  }
  func.func @transform_3(%arg0: i32, %arg1: i32) -> (i32, i32) {
    %c0_i32 = arith.constant 0 : i32
    %c0_i32_0 = arith.constant 0 : i32
    %c0_i32_1 = arith.constant 0 : i32
    return %c0_i32, %c0_i32_0 : i32, i32
  }
  func.func @transform_4(%arg0: i32, %arg1: i32) -> (i32, i32) {
    %c0_i32 = arith.constant 0 : i32
    %c0_i32_0 = arith.constant 0 : i32
    return %c0_i32, %arg1 : i32, i32
  }
  func.func @transform_5(%arg0: i32, %arg1: i32) -> (i32, i32) {
    %c0_i32 = arith.constant 0 : i32
    %c0_i32_0 = arith.constant 0 : i32
    return %c0_i32, %arg1 : i32, i32
  }
  func.func @transform_6(%arg0: i32, %arg1: i32) -> (i32, i32, i32, i32) {
    %c0_i32 = arith.constant 0 : i32
    %c0_i32_0 = arith.constant 0 : i32
    %c0_i32_1 = arith.constant 0 : i32
    return %arg0, %c0_i32, %c0_i32_0, %arg1 : i32, i32, i32, i32
  }
}

module attributes {stable_mosaic.version = 11 : i64} {
  func.func @_bn_conv_bn_relu_kernel(%arg0: i32, %arg1: i32, %arg2: memref<1x16x16x4xf32, #tpu.memory_space<vmem>>, %arg3: memref<3x3x4x8xbf16, #tpu.memory_space<vmem>>, %arg4: memref<1x4xf32, #tpu.memory_space<vmem>>, %arg5: memref<1x4xf32, #tpu.memory_space<vmem>>, %arg6: memref<1x8xf32, #tpu.memory_space<vmem>>, %arg7: memref<1x8xf32, #tpu.memory_space<vmem>>, %arg8: memref<1x16x16x8xbf16, #tpu.memory_space<vmem>>, %arg9: memref<18x18x4xbf16, #tpu.memory_space<vmem>>) attributes {dimension_semantics = [#tpu.dimension_semantics<parallel>, #tpu.dimension_semantics<parallel>], iteration_bounds = array<i64: 2, 1>, scalar_prefetch = 0 : i64, scratch_operands = 1 : i64, tpu.core_type = #tpu.core_type<tc>, window_params = [{transform_indices = @transform_0, window_bounds = array<i64: 1, 16, 16, 4>}, {transform_indices = @transform_1, window_bounds = array<i64: 3, 3, 4, 8>}, {pipeline_mode = #tpu.pipeline_mode<synchronous>, transform_indices = @transform_2, window_bounds = array<i64: 1, 4>}, {pipeline_mode = #tpu.pipeline_mode<synchronous>, transform_indices = @transform_3, window_bounds = array<i64: 1, 4>}, {transform_indices = @transform_4, window_bounds = array<i64: 1, 8>}, {transform_indices = @transform_5, window_bounds = array<i64: 1, 8>}, {transform_indices = @transform_6, window_bounds = array<i64: 1, 16, 16, 8>}]} {
    %c0 = arith.constant 0 : index
    %c0_0 = arith.constant 0 : index
    %c0_1 = arith.constant 0 : index
    %c0_2 = arith.constant 0 : index
    %0 = vector.load %arg2[%c0, %c0_0, %c0_1, %c0_2] : memref<1x16x16x4xf32, #tpu.memory_space<vmem>>, vector<1x16x16x4xf32>
    %1 = vector.shape_cast %0 : vector<1x16x16x4xf32> to vector<16x16x4xf32>
    %c0_3 = arith.constant 0 : index
    %c0_4 = arith.constant 0 : index
    %2 = vector.load %arg4[%c0_3, %c0_4] : memref<1x4xf32, #tpu.memory_space<vmem>>, vector<1x4xf32>
    %3 = vector.shape_cast %2 : vector<1x4xf32> to vector<1x1x4xf32>
    %4 = vector.broadcast %3 : vector<1x1x4xf32> to vector<16x16x4xf32>
    %5 = arith.mulf %1, %4 : vector<16x16x4xf32>
    %c0_5 = arith.constant 0 : index
    %c0_6 = arith.constant 0 : index
    %6 = vector.load %arg5[%c0_5, %c0_6] : memref<1x4xf32, #tpu.memory_space<vmem>>, vector<1x4xf32>
    %7 = vector.shape_cast %6 : vector<1x4xf32> to vector<1x1x4xf32>
    %8 = vector.broadcast %7 : vector<1x1x4xf32> to vector<16x16x4xf32>
    %9 = arith.addf %5, %8 : vector<16x16x4xf32>
    %cst = arith.constant 0.000000e+00 : f32
    %10 = vector.broadcast %cst : f32 to vector<16x16x4xf32>
    %11 = arith.maximumf %9, %10 : vector<16x16x4xf32>
    %cst_7 = arith.constant 0.000000e+00 : bf16
    %12 = vector.broadcast %cst_7 : bf16 to vector<18x18x4xbf16>
    %c0_8 = arith.constant 0 : index
    %c0_9 = arith.constant 0 : index
    %c0_10 = arith.constant 0 : index
    %13 = vector.load %arg9[%c0_8, %c0_9, %c0_10] : memref<18x18x4xbf16, #tpu.memory_space<vmem>>, vector<18x18x4xbf16>
    tpu.vector_store %arg9[%c0_8, %c0_9, %c0_10], %12 {strides = array<i32>} : memref<18x18x4xbf16, #tpu.memory_space<vmem>>, vector<18x18x4xbf16>,
    %14 = arith.truncf %11 : vector<16x16x4xf32> to vector<16x16x4xbf16>
    %c1 = arith.constant 1 : index
    %c1_11 = arith.constant 1 : index
    %c0_12 = arith.constant 0 : index
    %15 = vector.load %arg9[%c1, %c1_11, %c0_12] : memref<18x18x4xbf16, #tpu.memory_space<vmem>>, vector<16x16x4xbf16>
    tpu.vector_store %arg9[%c1, %c1_11, %c0_12], %14 {strides = array<i32>} : memref<18x18x4xbf16, #tpu.memory_space<vmem>>, vector<16x16x4xbf16>,
    %cst_13 = arith.constant 0.000000e+00 : f32
    %16 = vector.broadcast %cst_13 : f32 to vector<256x8xf32>
    %c0_14 = arith.constant 0 : index
    %c0_15 = arith.constant 0 : index
    %c0_16 = arith.constant 0 : index
    %17 = vector.load %arg9[%c0_14, %c0_15, %c0_16] : memref<18x18x4xbf16, #tpu.memory_space<vmem>>, vector<16x16x4xbf16>
    %18 = vector.shape_cast %17 : vector<16x16x4xbf16> to vector<256x4xbf16>
    %c0_17 = arith.constant 0 : index
    %c0_18 = arith.constant 0 : index
    %c0_19 = arith.constant 0 : index
    %c0_20 = arith.constant 0 : index
    %19 = vector.load %arg3[%c0_17, %c0_18, %c0_19, %c0_20] : memref<3x3x4x8xbf16, #tpu.memory_space<vmem>>, vector<1x1x4x8xbf16>
    %20 = vector.shape_cast %19 : vector<1x1x4x8xbf16> to vector<4x8xbf16>
    %cst_21 = arith.constant dense<0.000000e+00> : vector<256x8xf32>
    %21 = tpu.matmul %18, %20, %cst_21 {dimension_numbers = #tpu.dot_dimension_numbers<[1], [0], [0], [1], [0, 0, 1, 1], [], []>} : vector<256x4xbf16>, vector<4x8xbf16>, vector<256x8xf32> -> vector<256x8xf32>
    %22 = arith.addf %16, %21 : vector<256x8xf32>
    %c0_22 = arith.constant 0 : index
    %c1_23 = arith.constant 1 : index
    %c0_24 = arith.constant 0 : index
    %23 = vector.load %arg9[%c0_22, %c1_23, %c0_24] : memref<18x18x4xbf16, #tpu.memory_space<vmem>>, vector<16x16x4xbf16>
    %24 = vector.shape_cast %23 : vector<16x16x4xbf16> to vector<256x4xbf16>
    %c0_25 = arith.constant 0 : index
    %c1_26 = arith.constant 1 : index
    %c0_27 = arith.constant 0 : index
    %c0_28 = arith.constant 0 : index
    %25 = vector.load %arg3[%c0_25, %c1_26, %c0_27, %c0_28] : memref<3x3x4x8xbf16, #tpu.memory_space<vmem>>, vector<1x1x4x8xbf16>
    %26 = vector.shape_cast %25 : vector<1x1x4x8xbf16> to vector<4x8xbf16>
    %cst_29 = arith.constant dense<0.000000e+00> : vector<256x8xf32>
    %27 = tpu.matmul %24, %26, %cst_29 {dimension_numbers = #tpu.dot_dimension_numbers<[1], [0], [0], [1], [0, 0, 1, 1], [], []>} : vector<256x4xbf16>, vector<4x8xbf16>, vector<256x8xf32> -> vector<256x8xf32>
    %28 = arith.addf %22, %27 : vector<256x8xf32>
    %c0_30 = arith.constant 0 : index
    %c2 = arith.constant 2 : index
    %c0_31 = arith.constant 0 : index
    %29 = vector.load %arg9[%c0_30, %c2, %c0_31] : memref<18x18x4xbf16, #tpu.memory_space<vmem>>, vector<16x16x4xbf16>
    %30 = vector.shape_cast %29 : vector<16x16x4xbf16> to vector<256x4xbf16>
    %c0_32 = arith.constant 0 : index
    %c2_33 = arith.constant 2 : index
    %c0_34 = arith.constant 0 : index
    %c0_35 = arith.constant 0 : index
    %31 = vector.load %arg3[%c0_32, %c2_33, %c0_34, %c0_35] : memref<3x3x4x8xbf16, #tpu.memory_space<vmem>>, vector<1x1x4x8xbf16>
    %32 = vector.shape_cast %31 : vector<1x1x4x8xbf16> to vector<4x8xbf16>
    %cst_36 = arith.constant dense<0.000000e+00> : vector<256x8xf32>
    %33 = tpu.matmul %30, %32, %cst_36 {dimension_numbers = #tpu.dot_dimension_numbers<[1], [0], [0], [1], [0, 0, 1, 1], [], []>} : vector<256x4xbf16>, vector<4x8xbf16>, vector<256x8xf32> -> vector<256x8xf32>
    %34 = arith.addf %28, %33 : vector<256x8xf32>
    %c1_37 = arith.constant 1 : index
    %c0_38 = arith.constant 0 : index
    %c0_39 = arith.constant 0 : index
    %35 = vector.load %arg9[%c1_37, %c0_38, %c0_39] : memref<18x18x4xbf16, #tpu.memory_space<vmem>>, vector<16x16x4xbf16>
    %36 = vector.shape_cast %35 : vector<16x16x4xbf16> to vector<256x4xbf16>
    %c1_40 = arith.constant 1 : index
    %c0_41 = arith.constant 0 : index
    %c0_42 = arith.constant 0 : index
    %c0_43 = arith.constant 0 : index
    %37 = vector.load %arg3[%c1_40, %c0_41, %c0_42, %c0_43] : memref<3x3x4x8xbf16, #tpu.memory_space<vmem>>, vector<1x1x4x8xbf16>
    %38 = vector.shape_cast %37 : vector<1x1x4x8xbf16> to vector<4x8xbf16>
    %cst_44 = arith.constant dense<0.000000e+00> : vector<256x8xf32>
    %39 = tpu.matmul %36, %38, %cst_44 {dimension_numbers = #tpu.dot_dimension_numbers<[1], [0], [0], [1], [0, 0, 1, 1], [], []>} : vector<256x4xbf16>, vector<4x8xbf16>, vector<256x8xf32> -> vector<256x8xf32>
    %40 = arith.addf %34, %39 : vector<256x8xf32>
    %c1_45 = arith.constant 1 : index
    %c1_46 = arith.constant 1 : index
    %c0_47 = arith.constant 0 : index
    %41 = vector.load %arg9[%c1_45, %c1_46, %c0_47] : memref<18x18x4xbf16, #tpu.memory_space<vmem>>, vector<16x16x4xbf16>
    %42 = vector.shape_cast %41 : vector<16x16x4xbf16> to vector<256x4xbf16>
    %c1_48 = arith.constant 1 : index
    %c1_49 = arith.constant 1 : index
    %c0_50 = arith.constant 0 : index
    %c0_51 = arith.constant 0 : index
    %43 = vector.load %arg3[%c1_48, %c1_49, %c0_50, %c0_51] : memref<3x3x4x8xbf16, #tpu.memory_space<vmem>>, vector<1x1x4x8xbf16>
    %44 = vector.shape_cast %43 : vector<1x1x4x8xbf16> to vector<4x8xbf16>
    %cst_52 = arith.constant dense<0.000000e+00> : vector<256x8xf32>
    %45 = tpu.matmul %42, %44, %cst_52 {dimension_numbers = #tpu.dot_dimension_numbers<[1], [0], [0], [1], [0, 0, 1, 1], [], []>} : vector<256x4xbf16>, vector<4x8xbf16>, vector<256x8xf32> -> vector<256x8xf32>
    %46 = arith.addf %40, %45 : vector<256x8xf32>
    %c1_53 = arith.constant 1 : index
    %c2_54 = arith.constant 2 : index
    %c0_55 = arith.constant 0 : index
    %47 = vector.load %arg9[%c1_53, %c2_54, %c0_55] : memref<18x18x4xbf16, #tpu.memory_space<vmem>>, vector<16x16x4xbf16>
    %48 = vector.shape_cast %47 : vector<16x16x4xbf16> to vector<256x4xbf16>
    %c1_56 = arith.constant 1 : index
    %c2_57 = arith.constant 2 : index
    %c0_58 = arith.constant 0 : index
    %c0_59 = arith.constant 0 : index
    %49 = vector.load %arg3[%c1_56, %c2_57, %c0_58, %c0_59] : memref<3x3x4x8xbf16, #tpu.memory_space<vmem>>, vector<1x1x4x8xbf16>
    %50 = vector.shape_cast %49 : vector<1x1x4x8xbf16> to vector<4x8xbf16>
    %cst_60 = arith.constant dense<0.000000e+00> : vector<256x8xf32>
    %51 = tpu.matmul %48, %50, %cst_60 {dimension_numbers = #tpu.dot_dimension_numbers<[1], [0], [0], [1], [0, 0, 1, 1], [], []>} : vector<256x4xbf16>, vector<4x8xbf16>, vector<256x8xf32> -> vector<256x8xf32>
    %52 = arith.addf %46, %51 : vector<256x8xf32>
    %c2_61 = arith.constant 2 : index
    %c0_62 = arith.constant 0 : index
    %c0_63 = arith.constant 0 : index
    %53 = vector.load %arg9[%c2_61, %c0_62, %c0_63] : memref<18x18x4xbf16, #tpu.memory_space<vmem>>, vector<16x16x4xbf16>
    %54 = vector.shape_cast %53 : vector<16x16x4xbf16> to vector<256x4xbf16>
    %c2_64 = arith.constant 2 : index
    %c0_65 = arith.constant 0 : index
    %c0_66 = arith.constant 0 : index
    %c0_67 = arith.constant 0 : index
    %55 = vector.load %arg3[%c2_64, %c0_65, %c0_66, %c0_67] : memref<3x3x4x8xbf16, #tpu.memory_space<vmem>>, vector<1x1x4x8xbf16>
    %56 = vector.shape_cast %55 : vector<1x1x4x8xbf16> to vector<4x8xbf16>
    %cst_68 = arith.constant dense<0.000000e+00> : vector<256x8xf32>
    %57 = tpu.matmul %54, %56, %cst_68 {dimension_numbers = #tpu.dot_dimension_numbers<[1], [0], [0], [1], [0, 0, 1, 1], [], []>} : vector<256x4xbf16>, vector<4x8xbf16>, vector<256x8xf32> -> vector<256x8xf32>
    %58 = arith.addf %52, %57 : vector<256x8xf32>
    %c2_69 = arith.constant 2 : index
    %c1_70 = arith.constant 1 : index
    %c0_71 = arith.constant 0 : index
    %59 = vector.load %arg9[%c2_69, %c1_70, %c0_71] : memref<18x18x4xbf16, #tpu.memory_space<vmem>>, vector<16x16x4xbf16>
    %60 = vector.shape_cast %59 : vector<16x16x4xbf16> to vector<256x4xbf16>
    %c2_72 = arith.constant 2 : index
    %c1_73 = arith.constant 1 : index
    %c0_74 = arith.constant 0 : index
    %c0_75 = arith.constant 0 : index
    %61 = vector.load %arg3[%c2_72, %c1_73, %c0_74, %c0_75] : memref<3x3x4x8xbf16, #tpu.memory_space<vmem>>, vector<1x1x4x8xbf16>
    %62 = vector.shape_cast %61 : vector<1x1x4x8xbf16> to vector<4x8xbf16>
    %cst_76 = arith.constant dense<0.000000e+00> : vector<256x8xf32>
    %63 = tpu.matmul %60, %62, %cst_76 {dimension_numbers = #tpu.dot_dimension_numbers<[1], [0], [0], [1], [0, 0, 1, 1], [], []>} : vector<256x4xbf16>, vector<4x8xbf16>, vector<256x8xf32> -> vector<256x8xf32>
    %64 = arith.addf %58, %63 : vector<256x8xf32>
    %c2_77 = arith.constant 2 : index
    %c2_78 = arith.constant 2 : index
    %c0_79 = arith.constant 0 : index
    %65 = vector.load %arg9[%c2_77, %c2_78, %c0_79] : memref<18x18x4xbf16, #tpu.memory_space<vmem>>, vector<16x16x4xbf16>
    %66 = vector.shape_cast %65 : vector<16x16x4xbf16> to vector<256x4xbf16>
    %c2_80 = arith.constant 2 : index
    %c2_81 = arith.constant 2 : index
    %c0_82 = arith.constant 0 : index
    %c0_83 = arith.constant 0 : index
    %67 = vector.load %arg3[%c2_80, %c2_81, %c0_82, %c0_83] : memref<3x3x4x8xbf16, #tpu.memory_space<vmem>>, vector<1x1x4x8xbf16>
    %68 = vector.shape_cast %67 : vector<1x1x4x8xbf16> to vector<4x8xbf16>
    %cst_84 = arith.constant dense<0.000000e+00> : vector<256x8xf32>
    %69 = tpu.matmul %66, %68, %cst_84 {dimension_numbers = #tpu.dot_dimension_numbers<[1], [0], [0], [1], [0, 0, 1, 1], [], []>} : vector<256x4xbf16>, vector<4x8xbf16>, vector<256x8xf32> -> vector<256x8xf32>
    %70 = arith.addf %64, %69 : vector<256x8xf32>
    %c0_85 = arith.constant 0 : index
    %c0_86 = arith.constant 0 : index
    %71 = vector.load %arg6[%c0_85, %c0_86] : memref<1x8xf32, #tpu.memory_space<vmem>>, vector<1x8xf32>
    %72 = vector.broadcast %71 : vector<1x8xf32> to vector<256x8xf32>
    %73 = arith.mulf %70, %72 : vector<256x8xf32>
    %c0_87 = arith.constant 0 : index
    %c0_88 = arith.constant 0 : index
    %74 = vector.load %arg7[%c0_87, %c0_88] : memref<1x8xf32, #tpu.memory_space<vmem>>, vector<1x8xf32>
    %75 = vector.broadcast %74 : vector<1x8xf32> to vector<256x8xf32>
    %76 = arith.addf %73, %75 : vector<256x8xf32>
    %cst_89 = arith.constant 0.000000e+00 : f32
    %77 = vector.broadcast %cst_89 : f32 to vector<256x8xf32>
    %78 = arith.maximumf %76, %77 : vector<256x8xf32>
    %79 = vector.shape_cast %78 : vector<256x8xf32> to vector<1x16x16x8xf32>
    %80 = arith.truncf %79 : vector<1x16x16x8xf32> to vector<1x16x16x8xbf16>
    %c0_90 = arith.constant 0 : index
    %c0_91 = arith.constant 0 : index
    %c0_92 = arith.constant 0 : index
    %c0_93 = arith.constant 0 : index
    %81 = vector.load %arg8[%c0_90, %c0_91, %c0_92, %c0_93] : memref<1x16x16x8xbf16, #tpu.memory_space<vmem>>, vector<1x16x16x8xbf16>
    tpu.vector_store %arg8[%c0_90, %c0_91, %c0_92, %c0_93], %80 {strides = array<i32>} : memref<1x16x16x8xbf16, #tpu.memory_space<vmem>>, vector<1x16x16x8xbf16>,
    return
  }
  func.func @transform_0(%arg0: i32, %arg1: i32) -> (i32, i32, i32, i32) {
    %c0_i32 = arith.constant 0 : i32
    %c0_i32_0 = arith.constant 0 : i32
    %c0_i32_1 = arith.constant 0 : i32
    %c0_i32_2 = arith.constant 0 : i32
    return %arg0, %c0_i32, %c0_i32_0, %c0_i32_1 : i32, i32, i32, i32
  }
  func.func @transform_1(%arg0: i32, %arg1: i32) -> (i32, i32, i32, i32) {
    %c0_i32 = arith.constant 0 : i32
    %c0_i32_0 = arith.constant 0 : i32
    %c0_i32_1 = arith.constant 0 : i32
    %c0_i32_2 = arith.constant 0 : i32
    return %c0_i32, %c0_i32_0, %c0_i32_1, %arg1 : i32, i32, i32, i32
  }
  func.func @transform_2(%arg0: i32, %arg1: i32) -> (i32, i32) {
    %c0_i32 = arith.constant 0 : i32
    %c0_i32_0 = arith.constant 0 : i32
    %c0_i32_1 = arith.constant 0 : i32
    return %c0_i32, %c0_i32_0 : i32, i32
  }
  func.func @transform_3(%arg0: i32, %arg1: i32) -> (i32, i32) {
    %c0_i32 = arith.constant 0 : i32
    %c0_i32_0 = arith.constant 0 : i32
    %c0_i32_1 = arith.constant 0 : i32
    return %c0_i32, %c0_i32_0 : i32, i32
  }
  func.func @transform_4(%arg0: i32, %arg1: i32) -> (i32, i32) {
    %c0_i32 = arith.constant 0 : i32
    %c0_i32_0 = arith.constant 0 : i32
    return %c0_i32, %arg1 : i32, i32
  }
  func.func @transform_5(%arg0: i32, %arg1: i32) -> (i32, i32) {
    %c0_i32 = arith.constant 0 : i32
    %c0_i32_0 = arith.constant 0 : i32
    return %c0_i32, %arg1 : i32, i32
  }
  func.func @transform_6(%arg0: i32, %arg1: i32) -> (i32, i32, i32, i32) {
    %c0_i32 = arith.constant 0 : i32
    %c0_i32_0 = arith.constant 0 : i32
    %c0_i32_1 = arith.constant 0 : i32
    return %arg0, %c0_i32, %c0_i32_0, %arg1 : i32, i32, i32, i32
  }
}

</mosaic_0001>

<bundles_post_ra>
// kernel: tpu_custom_call.1
= control target key start
LH: loop header
LB: loop body
LE: loop exit
PB: predicated region body
PF: predicated region fallthrough
CT: control target
= control target key end

     0   :  { %s7396_s21 = smov 0   ;;  %s7398_s22 = smov 0   ;;  %s9434_s0 = inlined_call_operand.vmem [shape: f32[2,16,16,4], index: 0, kind: input, shape index: {}]   ;;  %s9435_s1 = inlined_call_operand.vmem [shape: bf16[3,3,4,8], index: 1, kind: input, shape index: {}]   ;;  %s9436_s2 = inlined_call_operand.vmem [shape: f32[1,4], index: 2, kind: input, shape index: {}]   ;;  %s9437_s3 = inlined_call_operand.vmem [shape: f32[1,4], index: 3, kind: input, shape index: {}]   ;;  %s9438_s4 = inlined_call_operand.vmem [shape: f32[1,8], index: 4, kind: input, shape index: {}]   ;;  %s9439_s5 = inlined_call_operand.vmem [shape: f32[1,8], index: 5, kind: input, shape index: {}]   ;;  %s9440_s6 = inlined_call_operand.vmem [shape: bf16[2,16,16,8], index: 6, kind: output, shape index: {}]  }
   0x1   :  { %s7400_s23 = smov 0  }
   0x2 LB: > { %s28_s24 = sadd.s32 1, %s7354_s22  ;;  %p6006_p0 = scmp.ge.s32.totalorder %s7358_s23, 1  ;;  %s7358_s23 = sphi %s7400_s23, %s16_s23   ;;  %s7354_s22 = sphi %s7398_s22, %s9523_s22   ;;  %s7350_s21 = sphi %s7396_s21, %s9522_s21  }
   0x3   : > { %p30_p1 = scmp.ge.s32.totalorder %s28_s24, 2  ;;  %p251_p2 = scmp.lt.s32.totalorder %s7358_s23, 3 }
   0x5   : > { %s9525_s24 = smov (%p30_p1, %s28_s24), 0  ;;  %p252_p3 = pnand %p6006_p0, %p251_p2 }
   0x7   : > { %255 = sbr.rel (%p252_p3) target bundleno = 693 (0x2b5), region = 44 }
   0xe   : > { %v6045_v0 = vld [vmem:[%s9435_s1 + $0x2] sm:$0x3]  ;;  %vm1588_vm0 = vcmask 1041408   ;;  %v6192_v1 = vld [vmem:[%s9435_s1 + $0x8] sm:$0x3]  ;;  %vm460_vm1 = vcmask 27648  }
   0xf   : > { %7208 = vmatprep.subr.msk.bf16.mxu1 %vm1588_vm0, %v6045_v0  ;;  %7212 = vmatprep.subr.msk.bf16.mxu0 %vm1588_vm0, %v6192_v1  ;;  %v1590_v2 = vsel %vm1588_vm0, %v6045_v0, 0  ;;  %v7426_v3 = vsel %vm1588_vm0, %v6192_v1, 0  ;;  %vm463_vm2 = vcmask 24576   ;;  %p294_p4 = scmp.lt.s32.totalorder %s7350_s21, 1  ;;  %v7360_v4 = vmov 0  }
  0x10   : > { %9455 = vst [vmem:[#allocation3_spill] sm:$0xff] %v7426_v3  ;;  %6645 = vmatpush3.bf16.msra.mxu1 %v1590_v2  ;;  %6781 = vmatpush3.bf16.msra.mxu0 %v7426_v3  ;;  %461 = vst.msk [vmem:[#allocation2] sm:$0xf] %vm460_vm1, %v7360_v4  ;;  %v7492_v5 = vld [vmem:[%s9436_s2] ss:$0 sm:$0xff]  ;;  %vm1539_vm8 = vcmask 31744  }
  0x11   : > { %462 = vst.msk [vmem:[#allocation2 + $0x4] sm:$0xf] %vm460_vm1, %v7360_v4  ;;  %465 = vst.msk [vmem:[#allocation2 + $0xc] sm:$0xf] %vm460_vm1, %v7360_v4  ;;  %s9527_s21 = smov (!%p294_p4, %s7350_s21), 1  ;;  %vm2093_vm13 = vcmask 1042432  }
  0x12   : > { %464 = vst.msk [vmem:[#allocation2 + $0x8] sm:$0x1] %vm463_vm2, %v7360_v4  ;;  %467 = vst.msk [vmem:[#allocation2 + $0x14] sm:$0x1] %vm463_vm2, %v7360_v4  ;;  %s6425_s7 = sshll.u32 %s9527_s21, 8  ;;  %vm2094_vm14 = vcmask 1046532  }
  0x13   : > { %466 = vst.msk [vmem:[#allocation2 + $0x10] sm:$0xf] %vm460_vm1, %v7360_v4  ;;  %468 = vst.msk [vmem:[#allocation2 + $0x18] sm:$0xf] %vm460_vm1, %v7360_v4  ;;  %v7498_v6 = vld [vmem:[%s9435_s1] sm:$0x3]  ;;  %s7508_s14 = scalar_lea.vmem %s9434_s0, %s6425_s7 }
  0x14   : > { %469 = vst.msk [vmem:[#allocation2 + $0x1c] sm:$0xf] %vm460_vm1, %v7360_v4  ;;  %471 = vst.msk [vmem:[#allocation2 + $0x24] sm:$0xf] %vm460_vm1, %v7360_v4  ;;  %v7503_v7 = vld [vmem:[%s9435_s1 + $0xa] sm:$0x3]  ;;  %7209 = vmatprep.subr.msk.bf16.mxu1 %vm1588_vm0, %v7498_v6 }
  0x15   : > { %470 = vst.msk [vmem:[#allocation2 + $0x20] sm:$0x1] %vm463_vm2, %v7360_v4  ;;  %473 = vst.msk [vmem:[#allocation2 + $0x2c] sm:$0x1] %vm463_vm2, %v7360_v4  ;;  %vm1102_vm3 = vsmask.f32 3328  ;;  %7214 = vmatprep.subr.msk.bf16.mxu0 %vm1588_vm0, %v7503_v7 }
  0x16   : > { %472 = vst.msk [vmem:[#allocation2 + $0x28] sm:$0xf] %vm460_vm1, %v7360_v4  ;;  %474 = vst.msk [vmem:[#allocation2 + $0x30] sm:$0xf] %vm460_vm1, %v7360_v4  ;;  %vm1103_vm4 = vsmask.f32 7440 }
  0x17   : > { %475 = vst.msk [vmem:[#allocation2 + $0x34] sm:$0xf] %vm460_vm1, %v7360_v4  ;;  %477 = vst.msk [vmem:[#allocation2 + $0x3c] sm:$0xf] %vm460_vm1, %v7360_v4  ;;  %v7513_v8 = vld [vmem:[%s9437_s3] ss:$0 sm:$0xff] }
  0x18   : > { %476 = vst.msk [vmem:[#allocation2 + $0x38] sm:$0x1] %vm463_vm2, %v7360_v4  ;;  %479 = vst.msk [vmem:[#allocation2 + $0x44] sm:$0x1] %vm463_vm2, %v7360_v4  ;;  %v318_v9 = vld [vmem:[%s7508_s14] sm:$0xff]  ;;  %v319_v10 = vld [vmem:[%s7508_s14 + $0x8] sm:$0xff] }
  0x19   : > { %478 = vst.msk [vmem:[#allocation2 + $0x40] sm:$0xf] %vm460_vm1, %v7360_v4  ;;  %480 = vst.msk [vmem:[#allocation2 + $0x48] sm:$0xf] %vm460_vm1, %v7360_v4  ;;  %vm612_vm5 = vsmask.f32 256  ;;  %v357_v11 = vmul.f32 %v7492_v5, %v318_v9  ;;  %v358_v12 = vmul.f32 %v7492_v5, %v319_v10 }
  0x1a   : > { %481 = vst.msk [vmem:[#allocation2 + $0x4c] sm:$0xf] %vm460_vm1, %v7360_v4  ;;  %483 = vst.msk [vmem:[#allocation2 + $0x54] sm:$0xf] %vm460_vm1, %v7360_v4  ;;  %vm613_vm6 = vsmask.f32 4368 }
  0x1b   : > { %482 = vst.msk [vmem:[#allocation2 + $0x50] sm:$0x1] %vm463_vm2, %v7360_v4  ;;  %485 = vst.msk [vmem:[#allocation2 + $0x5c] sm:$0x1] %vm463_vm2, %v7360_v4  ;;  %vm937_vm7 = vsmask.f32 7938  ;;  %v396_v26 = vadd.f32 %v7513_v8, %v357_v11  ;;  %v397_v27 = vadd.f32 %v7513_v8, %v358_v12 }
  0x1c   : > { %484 = vst.msk [vmem:[#allocation2 + $0x58] sm:$0xf] %vm460_vm1, %v7360_v4  ;;  %486 = vst.msk [vmem:[#allocation2 + $0x60] sm:$0xf] %vm460_vm1, %v7360_v4  ;;  %v320_v13 = vld [vmem:[%s7508_s14 + $0x10] sm:$0xff]  ;;  %v321_v14 = vld [vmem:[%s7508_s14 + $0x18] sm:$0xff] }
  0x1d   : > { %487 = vst.msk [vmem:[#allocation2 + $0x64] sm:$0xf] %vm460_vm1, %v7360_v4  ;;  %489 = vst.msk [vmem:[#allocation2 + $0x6c] sm:$0xf] %vm460_vm1, %v7360_v4  ;;  %v322_v15 = vld [vmem:[%s7508_s14 + $0x20] sm:$0xff]  ;;  %v359_v19 = vmul.f32 %v7492_v5, %v320_v13  ;;  %v360_v20 = vmul.f32 %v7492_v5, %v321_v14  ;;  %v428_v34 = vmax.f32 %v396_v26, 0.0 }
  0x1e   : > { %488 = vst.msk [vmem:[#allocation2 + $0x68] sm:$0x1] %vm463_vm2, %v7360_v4  ;;  %491 = vst.msk [vmem:[#allocation2 + $0x74] sm:$0x1] %vm463_vm2, %v7360_v4  ;;  %v1053_v16 = vld [vmem:[#allocation2] sm:$0xf]  ;;  %v361_v28 = vmul.f32 %v7492_v5, %v322_v15 }
  0x1f   : > { %490 = vst.msk [vmem:[#allocation2 + $0x70] sm:$0xf] %vm460_vm1, %v7360_v4  ;;  %492 = vst.msk [vmem:[#allocation2 + $0x78] sm:$0xf] %vm460_vm1, %v7360_v4  ;;  %v1054_v17 = vld [vmem:[#allocation2 + $0x4] sm:$0xf]  ;;  %v398_v36 = vadd.f32 %v7513_v8, %v359_v19  ;;  %v399_v40 = vadd.f32 %v7513_v8, %v360_v20  ;;  %v6427_v43 = vpack.c.bf16 %v428_v34, %v428_v34 }
  0x20   : > { %493 = vst.msk [vmem:[#allocation2 + $0x7c] sm:$0xf] %vm460_vm1, %v7360_v4  ;;  %495 = vst.msk [vmem:[#allocation2 + $0x84] sm:$0xf] %vm460_vm1, %v7360_v4  ;;  %v1086_v18 = vld [vmem:[#allocation2 + $0x8] sm:$0x1]  ;;  %v400_v46 = vadd.f32 %v7513_v8, %v361_v28 }
  0x21   : > { %494 = vst.msk [vmem:[#allocation2 + $0x80] sm:$0x1] %vm463_vm2, %v7360_v4  ;;  %497 = vst.msk [vmem:[#allocation2 + $0x8c] sm:$0x1] %vm463_vm2, %v7360_v4  ;;  %v1106_v21 = vshrl.u32 %v1053_v16, 16  ;;  %v1109_v22 = vshll.u32 %v1053_v16, 16 }
  0x22   : > { %496 = vst.msk [vmem:[#allocation2 + $0x88] sm:$0xf] %vm460_vm1, %v7360_v4  ;;  %498 = vst.msk [vmem:[#allocation2 + $0x90] sm:$0xf] %vm460_vm1, %v7360_v4  ;;  %v1115_v23 = vshll.u32 %v1054_v17, 16  ;;  %v1119_v24 = vshrl.u32 %v1054_v17, 16 }
  0x23   : > { %499 = vst.msk [vmem:[#allocation2 + $0x94] sm:$0xf] %vm460_vm1, %v7360_v4  ;;  %501 = vst.msk [vmem:[#allocation2 + $0x9c] sm:$0xf] %vm460_vm1, %v7360_v4  ;;  %v1125_v25 = vshll.u32 %v1086_v18, 16  ;;  %v1108_v29 = vrot.slane %v1106_v21, 4 }
  0x24   : > { %500 = vst.msk [vmem:[#allocation2 + $0x98] sm:$0x1] %vm463_vm2, %v7360_v4  ;;  %503 = vst.msk [vmem:[#allocation2 + $0xa4] sm:$0x1] %vm463_vm2, %v7360_v4  ;;  %v1111_v30 = vrot.slane %v1109_v22, 5  ;;  %v1117_v31 = vrot.slane %v1115_v23, 5 }
  0x25   : > { %502 = vst.msk [vmem:[#allocation2 + $0xa0] sm:$0xf] %vm460_vm1, %v7360_v4  ;;  %504 = vst.msk [vmem:[#allocation2 + $0xa8] sm:$0xf] %vm460_vm1, %v7360_v4  ;;  %v1121_v32 = vrot.slane %v1119_v24, 4  ;;  %v1127_v33 = vrot.slane %v1125_v25, 5 }
  0x26   : > { %505 = vst.msk [vmem:[#allocation2 + $0xac] sm:$0xf] %vm460_vm1, %v7360_v4  ;;  %507 = vst.msk [vmem:[#allocation2 + $0xb4] sm:$0xf] %vm460_vm1, %v7360_v4  ;;  %v429_v35 = vmax.f32 %v397_v27, 0.0  ;;  %v323_v37 = vld [vmem:[%s7508_s14 + $0x28] sm:$0xff]  ;;  %v1112_v38 = vor.u32 %v1111_v30, %v1108_v29 }
  0x27   : > { %506 = vst.msk [vmem:[#allocation2 + $0xb0] sm:$0x1] %vm463_vm2, %v7360_v4  ;;  %509 = vst.msk [vmem:[#allocation2 + $0xbc] sm:$0x1] %vm463_vm2, %v7360_v4  ;;  %v1122_v39 = vor.u32 %v1121_v32, %v1117_v31  ;;  %v362_v41 = vmul.f32 %v7492_v5, %v323_v37  ;;  %v430_v45 = vmax.f32 %v398_v36, 0.0  ;;  %v431_v49 = vmax.f32 %v399_v40, 0.0 }
  0x28   : > { %508 = vst.msk [vmem:[#allocation2 + $0xb8] sm:$0xf] %vm460_vm1, %v7360_v4  ;;  %510 = vst.msk [vmem:[#allocation2 + $0xc0] sm:$0xf] %vm460_vm1, %v7360_v4  ;;  %v6428_v44 = vpack.c.bf16 %v429_v35, %v429_v35  ;;  %v1113_v47 = vrot.slane %v1112_v38, 4  ;;  %v616_v51 = vshrl.u32 %v6427_v43, 16 }
  0x29   : > { %511 = vst.msk [vmem:[#allocation2 + $0xc4] sm:$0xf] %vm460_vm1, %v7360_v4  ;;  %513 = vst.msk [vmem:[#allocation2 + $0xcc] sm:$0xf] %vm460_vm1, %v7360_v4  ;;  %v1123_v48 = vrot.slane %v1122_v39, 4  ;;  %v401_v50 = vadd.f32 %v7513_v8, %v362_v41  ;;  %v619_v52 = vshll.u32 %v6427_v43, 16  ;;  %v6429_v59 = vpack.c.bf16 %v430_v45, %v430_v45 }
  0x2a   : > { %512 = vst.msk [vmem:[#allocation2 + $0xc8] sm:$0x1] %vm463_vm2, %v7360_v4  ;;  %515 = vst.msk [vmem:[#allocation2 + $0xd4] sm:$0x1] %vm463_vm2, %v7360_v4  ;;  %v624_v53 = vshrl.u32 %v6428_v44, 16  ;;  %v627_v54 = vshll.u32 %v6428_v44, 16  ;;  %v6430_v60 = vpack.c.bf16 %v431_v49, %v431_v49 }
  0x2b   : > { %514 = vst.msk [vmem:[#allocation2 + $0xd0] sm:$0xf] %vm460_vm1, %v7360_v4  ;;  %vm7537_vm9 = vmor %vm1102_vm3, %vm1103_vm4  ;;  %v939_v58 = vld [vmem:[#allocation2 + $0xc] sm:$0xf]  ;;  %v618_v62 = vrot.slane %v616_v51, 7  ;;  %v432_v2 = vmax.f32 %v400_v46, 0.0 }
  0x2c   : > { %v1118_v55 = vsel %vm7537_vm9, %v1113_v47, %v1117_v31  ;;  %v1128_v56 = vsel %vm7537_vm9, %v1123_v48, %v1127_v33  ;;  %vm7549_vm10 = vmor %vm612_vm5, %vm613_vm6  ;;  %v626_v63 = vrot.slane %v624_v53, 7  ;;  %v945_v1 = vld [vmem:[#allocation2 + $0x14] sm:$0x1]  ;;  %v633_v9 = vshrl.u32 %v6429_v59, 16  ;;  %v325_v22 = vld [vmem:[%s7508_s14 + $0x38] sm:$0xff]  ;;  %s6426_s27 = sshll.u32 %s9527_s21, 7 }
  0x2d   : > { %v6046_v61 = vcombine.low %v1118_v55, %v1128_v56  ;;  %vm7555_vm11 = vmand %vm460_vm1, %vm937_vm7  ;;  %v636_v10 = vshll.u32 %v6429_v59, 16  ;;  %v641_v11 = vshrl.u32 %v6430_v60, 16  ;;  %v644_v12 = vshll.u32 %v6430_v60, 16  ;;  %v324_v13 = vld [vmem:[%s7508_s14 + $0x30] sm:$0xff]  ;;  %v948_v26 = vld [vmem:[#allocation2 + $0x18] sm:$0xf]  ;;  %s9295_s30 = scalar_lea.vmem %s9440_s6, %s6426_s27 }
  0x2e   : > { %vm7561_vm12 = vmand %vm463_vm2, %vm612_vm5  ;;  %v621_v14 = vor.u32 %v619_v52, %v618_v62  ;;  %v622_v15 = vrot.slane %v618_v62, 4  ;;  %v629_v16 = vor.u32 %v627_v54, %v626_v63  ;;  %v631_v17 = vrot.slane %v626_v63, 4  ;;  %v952_v27 = vld [vmem:[#allocation2 + $0x20] sm:$0x1]  ;;  %v327_v38 = vld [vmem:[%s7508_s14 + $0x48] sm:$0xff] }
  0x2f   : > { %6646 = vmatprep.mubr.msk.bf16.mxu1 %vm1539_vm8, %v6046_v61  ;;  %v635_v18 = vrot.slane %v633_v9, 7  ;;  %v643_v19 = vrot.slane %v641_v11, 7  ;;  %v433_v20 = vmax.f32 %v401_v50, 0.0  ;;  %v6431_v21 = vpack.c.bf16 %v432_v2, %v432_v2  ;;  %v326_v37 = vld [vmem:[%s7508_s14 + $0x40] sm:$0xff]  ;;  %v328_v44 = vld [vmem:[%s7508_s14 + $0x50] sm:$0xff]  ;;  %v329_v54 = vld [vmem:[%s7508_s14 + $0x58] sm:$0xff] }
  0x30   : > { %v630_v23 = vsel %vm7549_vm10, %v622_v15, %v629_v16  ;;  %v940_v24 = vsel %vm7555_vm11, %v621_v14, %v939_v58  ;;  %v946_v25 = vsel %vm7561_vm12, %v631_v17, %v945_v1  ;;  %v363_v28 = vmul.f32 %v7492_v5, %v324_v13  ;;  %v955_v50 = vld [vmem:[#allocation2 + $0x24] sm:$0xf]  ;;  %vm7854_vm15 = vmor %vm2093_vm13, %vm2094_vm14 }
  0x31   : > { %941 = vst [vmem:[#allocation2 + $0xc] sm:$0xf] %v940_v24  ;;  %942 = vst.msk [vmem:[#allocation2 + $0x10] sm:$0xf] %vm460_vm1, %v630_v23  ;;  %v638_v29 = vor.u32 %v636_v10, %v635_v18  ;;  %v639_v30 = vrot.slane %v635_v18, 4  ;;  %v646_v31 = vor.u32 %v644_v12, %v643_v19  ;;  %v648_v32 = vrot.slane %v643_v19, 4 }
  0x32   : > { %947 = vst [vmem:[#allocation2 + $0x14] sm:$0x1] %v946_v25  ;;  %v6432_v33 = vpack.c.bf16 %v433_v20, %v433_v20  ;;  %v650_v34 = vshrl.u32 %v6431_v21, 16  ;;  %v653_v35 = vshll.u32 %v6431_v21, 16  ;;  %v364_v36 = vmul.f32 %v7492_v5, %v325_v22 }
  0x33   : > { %v647_v39 = vsel %vm7549_vm10, %v639_v30, %v646_v31  ;;  %v949_v40 = vsel %vm7555_vm11, %v638_v29, %v948_v26  ;;  %v953_v41 = vsel %vm7561_vm12, %v648_v32, %v952_v27  ;;  %v402_v43 = vadd.f32 %v7513_v8, %v363_v28 }
  0x34   : > { %950 = vst [vmem:[#allocation2 + $0x18] sm:$0xf] %v949_v40  ;;  %951 = vst.msk [vmem:[#allocation2 + $0x1c] sm:$0xf] %vm460_vm1, %v647_v39  ;;  %v7588_v45 = vrot.slane %v650_v34, 7  ;;  %v658_v46 = vshrl.u32 %v6432_v33, 16  ;;  %v403_v48 = vadd.f32 %v7513_v8, %v364_v36  ;;  %v365_v52 = vmul.f32 %v7492_v5, %v326_v37 }
  0x35   : > { %954 = vst [vmem:[#allocation2 + $0x20] sm:$0x1] %v953_v41  ;;  %v661_v47 = vshll.u32 %v6432_v33, 16  ;;  %v7593_v49 = vsel %vm1588_vm0, %v7498_v6, 0  ;;  %v434_v51 = vmax.f32 %v402_v43, 0.0  ;;  %v366_v53 = vmul.f32 %v7492_v5, %v327_v38 }
  0x36   : > { %v655_v55 = vor.u32 %v653_v35, %v7588_v45  ;;  %v7599_v56 = vrot.slane %v658_v46, 7  ;;  %v435_v58 = vmax.f32 %v403_v48, 0.0  ;;  %v367_v59 = vmul.f32 %v7492_v5, %v328_v44 }
  0x37   : > { %v7604_v60 = vsel %vm1588_vm0, %v7503_v7, 0  ;;  %v656_v6 = vrot.slane %v7588_v45, 4  ;;  %v7607_v61 = vpack.c.bf16 %v434_v51, %v434_v51  ;;  %v7610_v62 = vadd.f32 %v7513_v8, %v365_v52 }
  0x38   : > { %v1055_v63 = vld [vmem:[#allocation2 + $0xc] sm:$0xf]  ;;  %v1056_v1 = vld [vmem:[#allocation2 + $0x10] sm:$0xf]  ;;  %v7613_v9 = vor.u32 %v661_v47, %v7599_v56  ;;  %v956_v10 = vsel %vm7555_vm11, %v655_v55, %v955_v50  ;;  %v7618_v11 = vadd.f32 %v7513_v8, %v366_v53  ;;  %v7621_v7 = vmul.f32 %v7492_v5, %v329_v54 }
  0x39   : > { %v1087_v2 = vld [vmem:[#allocation2 + $0x14] sm:$0x1]  ;;  %v1130_v12 = vshrl.u32 %v1055_v63, 16  ;;  %v1133_v13 = vshll.u32 %v1055_v63, 16  ;;  %v1139_v14 = vshll.u32 %v1056_v1, 16  ;;  %v1143_v15 = vshrl.u32 %v1056_v1, 16 }
  0x3a   : > { %v2860_v16 = vld [vmem:[#allocation2 + $0xc] sm:$0xf]  ;;  %957 = vst [vmem:[#allocation2 + $0x24] sm:$0xf] %v956_v10  ;;  %v1149_v17 = vshll.u32 %v1087_v2, 16  ;;  %v7625_v20 = vpack.c.bf16 %v435_v58, %v435_v58  ;;  %v7628_v21 = vadd.f32 %v7513_v8, %v367_v59 }
  0x3b   : > { %v7623_v18 = vld [vmem:[#allocation2 + $0x10] sm:$0xf]  ;;  %v2909_v19 = vshrl.u32 %v2860_v16, 16  ;;  %v1132_v22 = vrot.slane %v1130_v12, 4  ;;  %v1135_v23 = vrot.slane %v1133_v13, 5  ;;  %v1141_v24 = vrot.slane %v1139_v14, 5 }
  0x3c   : > { %v1145_v25 = vrot.slane %v1143_v15, 4  ;;  %v7630_v26 = vld [vmem:[#allocation2 + $0x14] sm:$0x1]  ;;  %v1151_v27 = vrot.slane %v1149_v17, 5  ;;  %v2912_v29 = vshll.u32 %v2860_v16, 16  ;;  %v2918_v30 = vshll.u32 %v7623_v18, 16 }
  0x3d   : > { %v2911_v28 = vrot.slane %v2909_v19, 4  ;;  %v1136_v31 = vor.u32 %v1135_v23, %v1132_v22  ;;  %v2922_v33 = vshrl.u32 %v7623_v18, 16  ;;  %v2928_v34 = vshll.u32 %v7630_v26, 16  ;;  %v2863_v35 = vld [vmem:[#allocation2 + $0x18] sm:$0xf] }
  0x3e   : > { %v1146_v32 = vor.u32 %v1145_v25, %v1141_v24  ;;  %v7635_v36 = vld [vmem:[#allocation2 + $0x1c] sm:$0xf]  ;;  %v2914_v37 = vrot.slane %v2912_v29, 5  ;;  %v2920_v38 = vrot.slane %v2918_v30, 5  ;;  %v3652_v39 = vrot.slane %v7623_v18, 5 }
  0x3f   : > { %v3655_v40 = vrot.slane %v7630_v26, 5  ;;  %v1137_v41 = vrot.slane %v1136_v31, 4  ;;  %v2924_v44 = vrot.slane %v2922_v33, 4  ;;  %v2930_v46 = vrot.slane %v2928_v34, 5  ;;  %v7639_v48 = vld [vmem:[#allocation2 + $0x20] sm:$0x1] }
  0x40   : > { %v1147_v43 = vrot.slane %v1146_v32, 4  ;;  %v2915_v47 = vor.u32 %v2914_v37, %v2911_v28  ;;  %v2933_v50 = vshrl.u32 %v2863_v35, 16  ;;  %v2936_v51 = vshll.u32 %v2863_v35, 16  ;;  %v1057_v10 = vld [vmem:[#allocation2 + $0x18] sm:$0xf] }
  0x41   : > { %v2942_v52 = vshll.u32 %v7635_v36, 16  ;;  %v1142_v53 = vsel %vm7537_vm9, %v1137_v41, %v1141_v24  ;;  %v2925_v55 = vor.u32 %v2924_v44, %v2920_v38  ;;  %v2946_v58 = vshrl.u32 %v7635_v36, 16  ;;  %v1058_v23 = vld [vmem:[#allocation2 + $0x1c] sm:$0xf]  ;;  %v1088_v24 = vld [vmem:[#allocation2 + $0x20] sm:$0x1] }
  0x42   : > { %v1152_v54 = vsel %vm7537_vm9, %v1147_v43, %v1151_v27  ;;  %v2916_v63 = vrot.slane %v2915_v47, 4  ;;  %v2935_v1 = vrot.slane %v2933_v50, 4  ;;  %v2938_v2 = vrot.slane %v2936_v51, 5  ;;  %v1059_v30 = vld [vmem:[#allocation2 + $0x24] sm:$0xf] }
  0x43   : > { %v6047_v59 = vcombine.low %v1142_v53, %v1152_v54  ;;  %v2926_v12 = vrot.slane %v2925_v55, 4  ;;  %v2944_v13 = vrot.slane %v2942_v52, 5  ;;  %v2948_v14 = vrot.slane %v2946_v58, 4  ;;  %v959_v35 = vld [vmem:[#allocation2 + $0x2c] sm:$0x1] }
  0x44   : > { %v2952_v15 = vshll.u32 %v7639_v48, 16  ;;  %v2921_v16 = vsel %vm7537_vm9, %v2916_v63, %v2920_v38  ;;  %v2939_v17 = vor.u32 %v2938_v2, %v2935_v1  ;;  %v3659_v19 = vrot.slane %v7635_v36, 5  ;;  %v2866_v44 = vld [vmem:[#allocation2 + $0x24] sm:$0xf] }
  0x45   : > { %6647 = vmatmul.mubr.msk.bf16.vlgmr.msra.gmra.mrb[0].mxu1 %vm1539_vm8, %v6047_v59  ;;  %v3662_v22 = vrot.slane %v7639_v48, 5  ;;  %v2931_v25 = vsel %vm7537_vm9, %v2926_v12, %v2930_v46  ;;  %v2949_v27 = vor.u32 %v2948_v14, %v2944_v13  ;;  %v1154_v29 = vshrl.u32 %v1057_v10, 16 }
  0x46   : > { %6679 = vmatpush3.bf16.msra.mxu1 %v7593_v49  ;;  %v2954_v28 = vrot.slane %v2952_v15, 5  ;;  %v6193_v31 = vcombine.low %v2921_v16, %v2931_v25  ;;  %v2940_v32 = vrot.slane %v2939_v17, 4  ;;  %v7658_v33 = vrot.slane %v3659_v19, 4 }
  0x47   : > { %v1157_v34 = vshll.u32 %v1057_v10, 16  ;;  %v2950_v37 = vrot.slane %v2949_v27, 4  ;;  %v1156_v38 = vrot.slane %v1154_v29, 4  ;;  %v1163_v41 = vshll.u32 %v1058_v23, 16 }
  0x48   : > { %v1167_v43 = vshrl.u32 %v1058_v23, 16  ;;  %6782 = vmatprep.mubr.msk.bf16.mxu0 %vm1539_vm8, %v6193_v31  ;;  %v2945_v49 = vsel %vm7537_vm9, %v2940_v32, %v2944_v13  ;;  %v1173_v47 = vshll.u32 %v1088_v24, 16  ;;  %v664_v50 = vsel %vm7549_vm10, %v656_v6, %v7613_v9  ;;  %v7677_v6 = vld [vmem:[%s9435_s1 + $0xc] sm:$0x3] }
  0x49   : > { %v1159_v46 = vrot.slane %v1157_v34, 5  ;;  %v2955_v51 = vsel %vm7537_vm9, %v2950_v37, %v2954_v28  ;;  %v1165_v52 = vrot.slane %v1163_v41, 5  ;;  %v665_v54 = vrot.slane %v7599_v56, 4  ;;  %958 = vst.msk [vmem:[#allocation2 + $0x28] sm:$0xf] %vm460_vm1, %v664_v50 }
  0x4a   : > { %v1169_v53 = vrot.slane %v1167_v43, 4  ;;  %v6194_v55 = vcombine.low %v2945_v49, %v2955_v51  ;;  %v1175_v59 = vrot.slane %v1173_v47, 5  ;;  %v1178_v63 = vshrl.u32 %v1059_v30, 16 }
  0x4b   : > { %v1160_v58 = vor.u32 %v1159_v46, %v1156_v38  ;;  %v960_v45 = vsel %vm7561_vm12, %v665_v54, %v959_v35  ;;  %v1181_v2 = vshll.u32 %v1059_v30, 16  ;;  %v2957_v10 = vshrl.u32 %v2866_v44, 16  ;;  %v962_v30 = vld [vmem:[#allocation2 + $0x30] sm:$0xf] }
  0x4c   : > { %v1170_v1 = vor.u32 %v1169_v53, %v1165_v52  ;;  %6783 = vmatmul.mubr.msk.bf16.vlgmr.msra.gmra.mrb[0].mxu0 %vm1539_vm8, %v6194_v55  ;;  %961 = vst [vmem:[#allocation2 + $0x2c] sm:$0x1] %v960_v45  ;;  %v1180_v9 = vrot.slane %v1178_v63, 4  ;;  %v2960_v12 = vshll.u32 %v2866_v44, 16  ;;  %v667_v13 = vshrl.u32 %v7607_v61, 16 }
  0x4d   : > { %v1161_v56 = vrot.slane %v1160_v58, 4  ;;  %6815 = vmatpush3.bf16.msra.mxu0 %v7604_v60  ;;  %v1183_v15 = vrot.slane %v1181_v2, 5  ;;  %v2959_v16 = vrot.slane %v2957_v10, 4  ;;  %v670_v17 = vshll.u32 %v7607_v61, 16  ;;  %v966_v45 = vld [vmem:[#allocation2 + $0x38] sm:$0x1] }
  0x4e   : > { %v1171_v14 = vrot.slane %v1170_v1, 4  ;;  %v2962_v24 = vrot.slane %v2960_v12, 5  ;;  %v669_v25 = vrot.slane %v667_v13, 7  ;;  %v675_v27 = vshrl.u32 %v7625_v20, 16  ;;  %7215 = vmatprep.subr.msk.bf16.mxu0 %vm1588_vm0, %v7677_v6 }
  0x4f   : > { %v1166_v23 = vsel %vm7537_vm9, %v1161_v56, %v1165_v52  ;;  %v1184_v29 = vor.u32 %v1183_v15, %v1180_v9  ;;  %v678_v60 = vshll.u32 %v7625_v20, 16  ;;  %v436_v31 = vmax.f32 %v7610_v62, 0.0 }
  0x50   : > { %v1176_v28 = vsel %vm7537_vm9, %v1171_v14, %v1175_v59  ;;  %v1060_v32 = vld [vmem:[#allocation2 + $0x28] sm:$0xf]  ;;  %v2963_v35 = vor.u32 %v2962_v24, %v2959_v16  ;;  %v672_v37 = vor.u32 %v670_v17, %v669_v25  ;;  %v673_v38 = vrot.slane %v669_v25, 4  ;;  %v330_v16 = vld [vmem:[%s7508_s14 + $0x60] sm:$0xff] }
  0x51   : > { %v6048_v61 = vcombine.low %v1166_v23, %v1176_v28  ;;  %v7692_v34 = vld [vmem:[#allocation2 + $0x28] sm:$0xf]  ;;  %v1185_v41 = vrot.slane %v1184_v29, 4  ;;  %v1187_v43 = vshll.u32 %v1060_v32, 16  ;;  %v1191_v44 = vshrl.u32 %v1060_v32, 16 }
  0x52   : > { %v2966_v49 = vshll.u32 %v7692_v34, 16  ;;  %v2964_v46 = vrot.slane %v2963_v35, 4  ;;  %v2970_v20 = vshrl.u32 %v7692_v34, 16  ;;  %v677_v47 = vrot.slane %v675_v27, 7 }
  0x53   : > { %6650 = vmatprep.mubr.msk.bf16.mxu1 %vm1539_vm8, %v6048_v61  ;;  %v963_v62 = vsel %vm7555_vm11, %v672_v37, %v962_v30  ;;  %v1089_v50 = vld [vmem:[#allocation2 + $0x2c] sm:$0x1]  ;;  %v1189_v51 = vrot.slane %v1187_v43, 5  ;;  %v1193_v52 = vrot.slane %v1191_v44, 4  ;;  %v6435_v54 = vpack.c.bf16 %v436_v31, %v436_v31 }
  0x54   : > { %v7699_v53 = vld [vmem:[#allocation2 + $0x2c] sm:$0x1]  ;;  %964 = vst [vmem:[#allocation2 + $0x30] sm:$0xf] %v963_v62  ;;  %v407_v55 = vadd.f32 %v7513_v8, %v7621_v7  ;;  %v1197_v58 = vshll.u32 %v1089_v50, 16  ;;  %v2968_v59 = vrot.slane %v2966_v49, 5  ;;  %v680_v56 = vor.u32 %v678_v60, %v677_v47 }
  0x55   : > { %v2972_v63 = vrot.slane %v2970_v20, 4  ;;  %v2976_v1 = vshll.u32 %v7699_v53, 16  ;;  %v1190_v2 = vsel %vm7537_vm9, %v1185_v41, %v1189_v51  ;;  %v1194_v10 = vor.u32 %v1193_v52, %v1189_v51  ;;  %v331_v51 = vld [vmem:[%s7508_s14 + $0x68] sm:$0xff]  ;;  %v332_v52 = vld [vmem:[%s7508_s14 + $0x70] sm:$0xff] }
  0x56   : > { %v682_v9 = vrot.slane %v677_v47, 4  ;;  %v1199_v12 = vrot.slane %v1197_v58, 5  ;;  %v2969_v13 = vsel %vm7537_vm9, %v2964_v46, %v2968_v59  ;;  %v681_v17 = vsel %vm7549_vm10, %v673_v38, %v680_v56  ;;  %v969_v46 = vld [vmem:[#allocation2 + $0x3c] sm:$0xf] }
  0x57   : > { %v2973_v14 = vor.u32 %v2972_v63, %v2968_v59  ;;  %v2978_v15 = vrot.slane %v2976_v1, 5  ;;  %v1195_v7 = vrot.slane %v1194_v10, 4  ;;  %v437_v24 = vmax.f32 %v7618_v11, 0.0  ;;  %965 = vst.msk [vmem:[#allocation2 + $0x34] sm:$0xf] %vm460_vm1, %v681_v17 }
  0x58   : > { %v967_v23 = vsel %vm7561_vm12, %v682_v9, %v966_v45  ;;  %v684_v27 = vshrl.u32 %v6435_v54, 16  ;;  %v687_v28 = vshll.u32 %v6435_v54, 16  ;;  %v438_v29 = vmax.f32 %v7628_v21, 0.0 }
  0x59   : > { %v2974_v25 = vrot.slane %v2973_v14, 4  ;;  %968 = vst [vmem:[#allocation2 + $0x38] sm:$0x1] %v967_v23  ;;  %v1200_v60 = vsel %vm7537_vm9, %v1195_v7, %v1199_v12  ;;  %v6436_v30 = vpack.c.bf16 %v437_v24, %v437_v24  ;;  %v439_v31 = vmax.f32 %v407_v55, 0.0 }
  0x5a   : > { %v369_v61 = vmul.f32 %v7492_v5, %v330_v16  ;;  %v6049_v32 = vcombine.low %v1190_v2, %v1200_v60  ;;  %v686_v38 = vrot.slane %v684_v27, 7  ;;  %v7721_v41 = vpack.c.bf16 %v438_v29, %v438_v29  ;;  %v973_v60 = vld [vmem:[#allocation2 + $0x44] sm:$0x1] }
  0x5b   : > { %v2979_v11 = vsel %vm7537_vm9, %v2974_v25, %v2978_v15  ;;  %v2869_v35 = vld [vmem:[#allocation2 + $0x30] sm:$0xf]  ;;  %v692_v50 = vshrl.u32 %v6436_v30, 16  ;;  %v695_v59 = vshll.u32 %v6436_v30, 16  ;;  %v7729_v2 = vpack.c.bf16 %v439_v31, %v439_v31 }
  0x5c   : > { %v1061_v37 = vld [vmem:[#allocation2 + $0x30] sm:$0xf]  ;;  %v6195_v43 = vcombine.low %v2969_v13, %v2979_v11  ;;  %v2981_v21 = vshrl.u32 %v2869_v35, 16  ;;  %v2984_v44 = vshll.u32 %v2869_v35, 16  ;;  %6651 = vmatmul.mubr.msk.bf16.gmra.mrb[4].mxu1 %vm1539_vm8, %v6049_v32  ;;  %v689_v47 = vor.u32 %v687_v28, %v686_v38 }
  0x5d   : > { %v1202_v49 = vshrl.u32 %v1061_v37, 16  ;;  %v1205_v20 = vshll.u32 %v1061_v37, 16  ;;  %v690_v62 = vrot.slane %v686_v38, 4  ;;  %v694_v1 = vrot.slane %v692_v50, 7 }
  0x5e   : > { %6786 = vmatprep.mubr.msk.bf16.mxu0 %vm1539_vm8, %v6195_v43  ;;  %v2983_v54 = vrot.slane %v2981_v21, 4  ;;  %v2986_v55 = vrot.slane %v2984_v44, 5  ;;  %v970_v45 = vsel %vm7555_vm11, %v689_v47, %v969_v46  ;;  %v7731_v10 = vld [vmem:[#allocation2 + $0x34] sm:$0xf]  ;;  %v370_v13 = vmul.f32 %v7492_v5, %v331_v51 }
  0x5f   : > { %v1204_v58 = vrot.slane %v1202_v49, 4  ;;  %v1207_v63 = vrot.slane %v1205_v20, 5  ;;  %v1062_v12 = vld [vmem:[#allocation2 + $0x34] sm:$0xf]  ;;  %971 = vst [vmem:[#allocation2 + $0x3c] sm:$0xf] %v970_v45  ;;  %v7737_v14 = vadd.f32 %v7513_v8, %v369_v61  ;;  %v7740_v15 = vmul.f32 %v7492_v5, %v332_v52 }
  0x60   : > { %v7733_v56 = vld [vmem:[#allocation2 + $0x38] sm:$0x1]  ;;  %v2987_v9 = vor.u32 %v2986_v55, %v2983_v54  ;;  %v2990_v16 = vshll.u32 %v7731_v10, 16  ;;  %v2994_v7 = vshrl.u32 %v7731_v10, 16  ;;  %v1211_v27 = vshll.u32 %v1062_v12, 16 }
  0x61   : > { %v3000_v17 = vshll.u32 %v7733_v56, 16  ;;  %v1090_v23 = vld [vmem:[#allocation2 + $0x38] sm:$0x1]  ;;  %v1208_v24 = vor.u32 %v1207_v63, %v1204_v58  ;;  %v1215_v28 = vshrl.u32 %v1062_v12, 16  ;;  %v697_v38 = vor.u32 %v695_v59, %v694_v1 }
  0x62   : > { %v2988_v25 = vrot.slane %v2987_v9, 4  ;;  %v1221_v29 = vshll.u32 %v1090_v23, 16  ;;  %v2992_v30 = vrot.slane %v2990_v16, 5  ;;  %v2996_v31 = vrot.slane %v2994_v7, 4  ;;  %v976_v9 = vld [vmem:[#allocation2 + $0x48] sm:$0xf] }
  0x63   : > { %v3002_v61 = vrot.slane %v3000_v17, 5  ;;  %v1209_v32 = vrot.slane %v1208_v24, 4  ;;  %v1213_v11 = vrot.slane %v1211_v27, 5  ;;  %v1217_v35 = vrot.slane %v1215_v28, 4 }
  0x64   : > { %v1223_v37 = vrot.slane %v1221_v29, 5  ;;  %v2993_v43 = vsel %vm7537_vm9, %v2988_v25, %v2992_v30  ;;  %v2997_v21 = vor.u32 %v2996_v31, %v2992_v30  ;;  %v699_v44 = vrot.slane %v694_v1, 4  ;;  %v334_v30 = vld [vmem:[%s7508_s14 + $0x80] sm:$0xff] }
  0x65   : > { %v701_v49 = vshrl.u32 %v7721_v41, 16  ;;  %v1214_v46 = vsel %vm7537_vm9, %v1209_v32, %v1213_v11  ;;  %v1218_v20 = vor.u32 %v1217_v35, %v1213_v11  ;;  %v698_v47 = vsel %vm7549_vm10, %v690_v62, %v697_v38 }
  0x66   : > { %v704_v50 = vshll.u32 %v7721_v41, 16  ;;  %v2998_v51 = vrot.slane %v2997_v21, 4  ;;  %972 = vst.msk [vmem:[#allocation2 + $0x40] sm:$0xf] %vm460_vm1, %v698_v47  ;;  %v974_v52 = vsel %vm7561_vm12, %v699_v44, %v973_v60  ;;  %v1063_v54 = vld [vmem:[#allocation2 + $0x3c] sm:$0xf]  ;;  %v409_v59 = vadd.f32 %v7513_v8, %v370_v13 }
  0x67   : > { %v2872_v55 = vld [vmem:[#allocation2 + $0x3c] sm:$0xf]  ;;  %v703_v58 = vrot.slane %v701_v49, 7  ;;  %v1219_v63 = vrot.slane %v1218_v20, 4  ;;  %975 = vst [vmem:[#allocation2 + $0x44] sm:$0x1] %v974_v52 }
  0x68   : > { %v1226_v1 = vshrl.u32 %v1063_v54, 16  ;;  %v1229_v45 = vshll.u32 %v1063_v54, 16  ;;  %v3005_v62 = vshrl.u32 %v2872_v55, 16  ;;  %v3003_v41 = vsel %vm7537_vm9, %v2998_v51, %v3002_v61  ;;  %v333_v13 = vld [vmem:[%s7508_s14 + $0x78] sm:$0xff]  ;;  %v980_v54 = vld [vmem:[#allocation2 + $0x50] sm:$0x1] }
  0x69   : > { %v3008_v12 = vshll.u32 %v2872_v55, 16  ;;  %v706_v16 = vor.u32 %v704_v50, %v703_v58  ;;  %v707_v7 = vrot.slane %v703_v58, 4  ;;  %v6196_v17 = vcombine.low %v2993_v43, %v3003_v41 }
  0x6a   : > { %v1224_v23 = vsel %vm7537_vm9, %v1219_v63, %v1223_v37  ;;  %v1228_v24 = vrot.slane %v1226_v1, 4  ;;  %v1231_v25 = vrot.slane %v1229_v45, 5  ;;  %v3007_v28 = vrot.slane %v3005_v62, 4 }
  0x6b   : > { %v6050_v27 = vcombine.low %v1214_v46, %v1224_v23  ;;  %v3010_v29 = vrot.slane %v3008_v12, 5  ;;  %v709_v60 = vshrl.u32 %v7729_v2, 16  ;;  %6787 = vmatmul.mubr.msk.bf16.gmra.mrb[4].mxu0 %vm1539_vm8, %v6196_v17  ;;  %v712_v61 = vshll.u32 %v7729_v2, 16 }
  0x6c   : > { %v1232_v31 = vor.u32 %v1231_v25, %v1228_v24  ;;  %v977_v32 = vsel %vm7555_vm11, %v706_v16, %v976_v9  ;;  %v440_v11 = vmax.f32 %v7737_v14, 0.0  ;;  %v441_v38 = vmax.f32 %v409_v59, 0.0 }
  0x6d   : > { %6654 = vmatprep.mubr.msk.bf16.mxu1 %vm1539_vm8, %v6050_v27  ;;  %v3011_v35 = vor.u32 %v3010_v29, %v3007_v28  ;;  %v711_v37 = vrot.slane %v709_v60, 7  ;;  %978 = vst [vmem:[#allocation2 + $0x48] sm:$0xf] %v977_v32  ;;  %v7771_v43 = vmul.f32 %v7492_v5, %v333_v13  ;;  %v1064_v21 = vld [vmem:[#allocation2 + $0x40] sm:$0xf]  ;;  %v7777_v2 = vadd.f32 %v7513_v8, %v7740_v15 }
  0x6e   : > { %v1233_v44 = vrot.slane %v1232_v31, 4  ;;  %v7773_v49 = vld [vmem:[#allocation2 + $0x40] sm:$0xf]  ;;  %v6439_v46 = vpack.c.bf16 %v440_v11, %v440_v11  ;;  %v7780_v14 = vmul.f32 %v7492_v5, %v334_v30  ;;  %v1091_v20 = vld [vmem:[#allocation2 + $0x44] sm:$0x1]  ;;  %v1235_v47 = vshll.u32 %v1064_v21, 16 }
  0x6f   : > { %v1239_v50 = vshrl.u32 %v1064_v21, 16  ;;  %v7782_v51 = vld [vmem:[#allocation2 + $0x44] sm:$0x1]  ;;  %v714_v52 = vor.u32 %v712_v61, %v711_v37  ;;  %v7784_v55 = vpack.c.bf16 %v441_v38, %v441_v38  ;;  %v1245_v58 = vshll.u32 %v1091_v20, 16 }
  0x70   : > { %v3012_v59 = vrot.slane %v3011_v35, 4  ;;  %v3014_v63 = vshll.u32 %v7773_v49, 16  ;;  %v3018_v1 = vshrl.u32 %v7773_v49, 16  ;;  %v1237_v15 = vrot.slane %v1235_v47, 5 }
  0x71   : > { %v1241_v45 = vrot.slane %v1239_v50, 4  ;;  %v3024_v5 = vshll.u32 %v7782_v51, 16  ;;  %v715_v62 = vsel %vm7549_vm10, %v707_v7, %v714_v52  ;;  %v1247_v9 = vrot.slane %v1245_v58, 5  ;;  %v983_v58 = vld [vmem:[#allocation2 + $0x54] sm:$0xf] }
  0x72   : > { %v3016_v41 = vrot.slane %v3014_v63, 5  ;;  %v3020_v12 = vrot.slane %v3018_v1, 4  ;;  %v716_v16 = vrot.slane %v711_v37, 4  ;;  %979 = vst.msk [vmem:[#allocation2 + $0x4c] sm:$0xf] %vm460_vm1, %v715_v62  ;;  %v1238_v17 = vsel %vm7537_vm9, %v1233_v44, %v1237_v15 }
  0x73   : > { %v1242_v23 = vor.u32 %v1241_v45, %v1237_v15  ;;  %v3026_v24 = vrot.slane %v3024_v5, 5  ;;  %v718_v25 = vshrl.u32 %v6439_v46, 16  ;;  %v721_v60 = vshll.u32 %v6439_v46, 16 }
  0x74   : > { %v3017_v13 = vsel %vm7537_vm9, %v3012_v59, %v3016_v41  ;;  %v3021_v27 = vor.u32 %v3020_v12, %v3016_v41  ;;  %v981_v28 = vsel %vm7561_vm12, %v716_v16, %v980_v54  ;;  %v2875_v7 = vld [vmem:[#allocation2 + $0x48] sm:$0xf]  ;;  %v726_v38 = vshrl.u32 %v7784_v55, 16  ;;  %v987_v16 = vld [vmem:[#allocation2 + $0x5c] sm:$0x1] }
  0x75   : > { %v1065_v29 = vld [vmem:[#allocation2 + $0x48] sm:$0xf]  ;;  %v1243_v30 = vrot.slane %v1242_v23, 4  ;;  %982 = vst [vmem:[#allocation2 + $0x50] sm:$0x1] %v981_v28  ;;  %v3029_v31 = vshrl.u32 %v2875_v7, 16 }
  0x76   : > { %v3032_v61 = vshll.u32 %v2875_v7, 16  ;;  %v1250_v32 = vshrl.u32 %v1065_v29, 16  ;;  %v3022_v11 = vrot.slane %v3021_v27, 4  ;;  %v1253_v35 = vshll.u32 %v1065_v29, 16 }
  0x77   : > { %v720_v37 = vrot.slane %v718_v25, 7  ;;  %v1248_v21 = vsel %vm7537_vm9, %v1243_v30, %v1247_v9  ;;  %v3031_v44 = vrot.slane %v3029_v31, 4  ;;  %v728_v5 = vrot.slane %v726_v38, 7 }
  0x78   : > { %v3034_v20 = vrot.slane %v3032_v61, 5  ;;  %v1252_v47 = vrot.slane %v1250_v32, 4  ;;  %v6051_v50 = vcombine.low %v1238_v17, %v1248_v21  ;;  %v3027_v46 = vsel %vm7537_vm9, %v3022_v11, %v3026_v24  ;;  %v6126_v17 = vld [vmem:[%s9435_s1 + $0x4] sm:$0x3]  ;;  %v335_v21 = vld [vmem:[%s7508_s14 + $0x88] sm:$0xff] }
  0x79   : > { %v1255_v52 = vrot.slane %v1253_v35, 5  ;;  %v723_v54 = vor.u32 %v721_v60, %v720_v37  ;;  %v6197_v59 = vcombine.low %v3017_v13, %v3027_v46  ;;  %v7803_v63 = vld [vmem:[#allocation2 + $0x4c] sm:$0xf]  ;;  %v724_v45 = vrot.slane %v720_v37, 4  ;;  %7210 = vmatprep.subr.msk.bf16.mxu1 %vm1588_vm0, %v6126_v17  ;;  %v337_v17 = vld [vmem:[%s7508_s14 + $0x98] sm:$0xff] }
  0x7a   : > { %v3035_v1 = vor.u32 %v3034_v20, %v3031_v44  ;;  %v1066_v15 = vld [vmem:[#allocation2 + $0x4c] sm:$0xf]  ;;  %6655 = vmatmul.mubr.msk.bf16.gmra.mrb[8].mxu1 %vm1539_vm8, %v6051_v50  ;;  %v3038_v62 = vshll.u32 %v7803_v63, 16  ;;  %v3042_v9 = vshrl.u32 %v7803_v63, 16  ;;  %v729_v25 = vshll.u32 %v7784_v55, 16 }
  0x7b   : > { %v1256_v41 = vor.u32 %v1255_v52, %v1252_v47  ;;  %v1259_v12 = vshll.u32 %v1066_v15, 16  ;;  %6790 = vmatprep.mubr.msk.bf16.mxu0 %vm1539_vm8, %v6197_v59  ;;  %v1263_v24 = vshrl.u32 %v1066_v15, 16  ;;  %v733_v13 = vrot.slane %v728_v5, 4  ;;  %v7835_v59 = vld [vmem:[%s9436_s2] ss:$0 sm:$0xff] }
  0x7c   : > { %v3036_v23 = vrot.slane %v3035_v1, 4  ;;  %v7814_v27 = vld [vmem:[#allocation2 + $0x50] sm:$0x1]  ;;  %v3040_v28 = vrot.slane %v3038_v62, 5  ;;  %v3044_v7 = vrot.slane %v3042_v9, 4  ;;  %v984_v60 = vsel %vm7555_vm11, %v723_v54, %v983_v58 }
  0x7d   : > { %v1092_v29 = vld [vmem:[#allocation2 + $0x50] sm:$0x1]  ;;  %v411_v30 = vadd.f32 %v7513_v8, %v7771_v43  ;;  %v3048_v31 = vshll.u32 %v7814_v27, 16  ;;  %v1257_v61 = vrot.slane %v1256_v41, 4  ;;  %v1261_v32 = vrot.slane %v1259_v12, 5 }
  0x7e   : > { %v1265_v55 = vrot.slane %v1263_v24, 4  ;;  %985 = vst [vmem:[#allocation2 + $0x54] sm:$0xf] %v984_v60  ;;  %v3041_v11 = vsel %vm7537_vm9, %v3036_v23, %v3040_v28  ;;  %v3045_v35 = vor.u32 %v3044_v7, %v3040_v28  ;;  %v1269_v37 = vshll.u32 %v1092_v29, 16  ;;  %v7841_v15 = vld [vmem:[%s9437_s3] ss:$0 sm:$0xff] }
  0x7f   : > { %v731_v38 = vor.u32 %v729_v25, %v728_v5  ;;  %v3050_v44 = vrot.slane %v3048_v31, 5  ;;  %v1262_v20 = vsel %vm7537_vm9, %v1257_v61, %v1261_v32  ;;  %v988_v8 = vsel %vm7561_vm12, %v733_v13, %v987_v16 }
  0x80   : > { %v1266_v47 = vor.u32 %v1265_v55, %v1261_v32  ;;  %v3046_v43 = vrot.slane %v3045_v35, 4  ;;  %v1271_v50 = vrot.slane %v1269_v37, 5  ;;  %989 = vst [vmem:[#allocation2 + $0x5c] sm:$0x1] %v988_v8  ;;  %v442_v52 = vmax.f32 %v7777_v2, 0.0 }
  0x81   : > { %v732_v46 = vsel %vm7549_vm10, %v724_v45, %v731_v38  ;;  %v443_v58 = vmax.f32 %v411_v30, 0.0  ;;  %v374_v1 = vmul.f32 %v7835_v59, %v335_v21  ;;  %v412_v2 = vadd.f32 %v7841_v15, %v7780_v14  ;;  %v336_v14 = vld [vmem:[%s7508_s14 + $0x90] sm:$0xff] }
  0x82   : > { %v1267_v54 = vrot.slane %v1266_v47, 4  ;;  %986 = vst.msk [vmem:[#allocation2 + $0x58] sm:$0xf] %vm460_vm1, %v732_v46  ;;  %v3051_v45 = vsel %vm7537_vm9, %v3046_v43, %v3050_v44  ;;  %v6441_v5 = vpack.c.bf16 %v442_v52, %v442_v52  ;;  %v7865_v7 = vsel %vm7854_vm15, %v7658_v33, %v3662_v22 }
  0x83   : > { %v6198_v62 = vcombine.low %v3041_v11, %v3051_v45  ;;  %v7849_v41 = vpack.c.bf16 %v443_v58, %v443_v58  ;;  %v7852_v12 = vadd.f32 %v7841_v15, %v374_v1  ;;  %v444_v11 = vmax.f32 %v412_v2, 0.0  ;;  %v990_v58 = vld [vmem:[#allocation2 + $0x60] sm:$0xf] }
  0x84   : > { %v1272_v9 = vsel %vm7537_vm9, %v1267_v54, %v1271_v50  ;;  %v735_v13 = vshrl.u32 %v6441_v5, 16  ;;  %v738_v28 = vshll.u32 %v6441_v5, 16  ;;  %v7874_v22 = vmul.f32 %v7835_v59, %v336_v14 }
  0x85   : > { %v6052_v23 = vcombine.low %v1262_v20, %v1272_v9  ;;  %v1067_v24 = vld [vmem:[#allocation2 + $0x54] sm:$0xf]  ;;  %6791 = vmatmul.mubr.msk.bf16.gmra.mrb[8].mxu0 %vm1539_vm8, %v6198_v62  ;;  %v743_v32 = vshrl.u32 %v7849_v41, 16  ;;  %v746_v55 = vshll.u32 %v7849_v41, 16  ;;  %v7877_v33 = vmul.f32 %v7835_v59, %v337_v17 }
  0x86   : > { %v2878_v25 = vld [vmem:[#allocation2 + $0x54] sm:$0xf]  ;;  %v1274_v29 = vshrl.u32 %v1067_v24, 16  ;;  %v1277_v60 = vshll.u32 %v1067_v24, 16  ;;  %v737_v61 = vrot.slane %v735_v13, 7  ;;  %v6443_v43 = vpack.c.bf16 %v444_v11, %v444_v11 }
  0x87   : > { %v3053_v30 = vshrl.u32 %v2878_v25, 16  ;;  %v3056_v31 = vshll.u32 %v2878_v25, 16  ;;  %6658 = vmatprep.mubr.msk.bf16.mxu1 %vm1539_vm8, %v6052_v23  ;;  %v1093_v48 = vld [vmem:[#allocation2 + $0x5c] sm:$0x1]  ;;  %v994_v11 = vld [vmem:[#allocation2 + $0x68] sm:$0x1] }
  0x88   : > { %v1276_v35 = vrot.slane %v1274_v29, 4  ;;  %v1279_v37 = vrot.slane %v1277_v60, 5  ;;  %v7871_v38 = vld [vmem:[#allocation2 + $0x5c] sm:$0x1]  ;;  %v1293_v44 = vshll.u32 %v1093_v48, 16  ;;  %v740_v8 = vor.u32 %v738_v28, %v737_v61 }
  0x89   : > { %v1068_v21 = vld [vmem:[#allocation2 + $0x58] sm:$0xf]  ;;  %v3055_v47 = vrot.slane %v3053_v30, 4  ;;  %v3058_v54 = vrot.slane %v3056_v31, 5  ;;  %v3072_v5 = vshll.u32 %v7871_v38, 16  ;;  %v741_v25 = vrot.slane %v737_v61, 4 }
  0x8a   : > { %v7879_v20 = vld [vmem:[#allocation2 + $0x58] sm:$0xf]  ;;  %v1280_v50 = vor.u32 %v1279_v37, %v1276_v35  ;;  %v1283_v46 = vshll.u32 %v1068_v21, 16  ;;  %v1287_v52 = vshrl.u32 %v1068_v21, 16  ;;  %v1295_v1 = vrot.slane %v1293_v44, 5 }
  0x8b   : > { %v3062_v2 = vshll.u32 %v7879_v20, 16  ;;  %v3066_v45 = vshrl.u32 %v7879_v20, 16  ;;  %v3059_v14 = vor.u32 %v3058_v54, %v3055_v47  ;;  %v3074_v24 = vrot.slane %v3072_v5, 5  ;;  %v3586_v37 = vld [vmem:[#allocation2 + $0xc] sm:$0xe] }
  0x8c   : > { %v1281_v62 = vrot.slane %v1280_v50, 4  ;;  %v1285_v9 = vrot.slane %v1283_v46, 5  ;;  %v1289_v41 = vrot.slane %v1287_v52, 4  ;;  %v745_v60 = vrot.slane %v743_v32, 7 }
  0x8d   : > { %v3064_v17 = vrot.slane %v3062_v2, 5  ;;  %v3068_v23 = vrot.slane %v3066_v45, 4  ;;  %v3060_v29 = vrot.slane %v3059_v14, 4  ;;  %v991_v31 = vsel %vm7555_vm11, %v740_v8, %v990_v58  ;;  %v997_v58 = vld [vmem:[#allocation2 + $0x6c] sm:$0xf] }
  0x8e   : > { %v1286_v13 = vsel %vm7537_vm9, %v1281_v62, %v1285_v9  ;;  %v1290_v28 = vor.u32 %v1289_v41, %v1285_v9  ;;  %v445_v48 = vmax.f32 %v7852_v12, 0.0  ;;  %v752_v35 = vshrl.u32 %v6443_v43, 16  ;;  %992 = vst [vmem:[#allocation2 + $0x60] sm:$0xf] %v991_v31  ;;  %v3587_v2 = vld [vmem:[#allocation2 + $0x18] sm:$0xe] }
  0x8f   : > { %v3069_v30 = vor.u32 %v3068_v23, %v3064_v17  ;;  %v3065_v44 = vsel %vm7537_vm9, %v3060_v29, %v3064_v17  ;;  %v748_v61 = vor.u32 %v746_v55, %v745_v60  ;;  %v750_v47 = vrot.slane %v745_v60, 4  ;;  %v338_v62 = vld [vmem:[%s7508_s14 + $0xa0] sm:$0xff]  ;;  %v339_v23 = vld [vmem:[%s7508_s14 + $0xa8] sm:$0xff] }
  0x90   : > { %v1291_v21 = vrot.slane %v1290_v28, 4  ;;  %v6444_v46 = vpack.c.bf16 %v445_v48, %v445_v48  ;;  %v7891_v32 = vrot.slane %v752_v35, 7  ;;  %v755_v52 = vshll.u32 %v6443_v43, 16 }
  0x91   : > { %v3070_v50 = vrot.slane %v3069_v30, 4  ;;  %v749_v12 = vsel %vm7549_vm10, %v741_v25, %v748_v61  ;;  %v995_v54 = vsel %vm7561_vm12, %v750_v47, %v994_v11  ;;  %v6225_v55 = vrot.slane %v3586_v37, 9  ;;  %v7912_v25 = vld [vmem:[#allocation2 + $0x24] sm:$0xe] }
  0x92   : > { %v1296_v8 = vsel %vm7537_vm9, %v1291_v21, %v1295_v1  ;;  %993 = vst.msk [vmem:[#allocation2 + $0x64] sm:$0xf] %vm460_vm1, %v749_v12  ;;  %996 = vst [vmem:[#allocation2 + $0x68] sm:$0x1] %v995_v54  ;;  %v757_v43 = vor.u32 %v755_v52, %v7891_v32  ;;  %v758_v1 = vrot.slane %v7891_v32, 4  ;;  %v760_v41 = vshrl.u32 %v6444_v46, 16 }
  0x93   : > { %v6053_v45 = vcombine.low %v1286_v13, %v1296_v8  ;;  %v3075_v5 = vsel %vm7537_vm9, %v3070_v50, %v3074_v24  ;;  %v763_v14 = vshll.u32 %v6444_v46, 16  ;;  %v7909_v17 = vsel %vm7854_vm15, %v6225_v55, %v3652_v39  ;;  %v1001_v32 = vld [vmem:[#allocation2 + $0x74] sm:$0x1] }
  0x94   : > { %v6199_v9 = vcombine.low %v3065_v44, %v3075_v5  ;;  %v998_v24 = vsel %vm7555_vm11, %v757_v43, %v997_v58  ;;  %v3654_v13 = vrot.slane %v3652_v39, 4  ;;  %v6226_v28 = vrot.slane %v3587_v2, 9 }
  0x95   : > { %6659 = vmatmul.mubr.msk.bf16.gmra.mrb[12].mxu1 %vm1539_vm8, %v6053_v45  ;;  %v7921_v29 = vsel %vm1588_vm0, %v7677_v6, 0  ;;  %v762_v60 = vrot.slane %v760_v41, 7  ;;  %999 = vst [vmem:[#allocation2 + $0x6c] sm:$0xf] %v998_v24  ;;  %v7926_v30 = vadd.f32 %v7841_v15, %v7874_v22  ;;  %v7930_v31 = vadd.f32 %v7841_v15, %v7877_v33  ;;  %v2881_v39 = vld [vmem:[#allocation2 + $0x60] sm:$0xf] }
  0x96   : > { %6794 = vmatprep.mubr.msk.bf16.mxu0 %vm1539_vm8, %v6199_v9  ;;  %v377_v18 = vmul.f32 %v7835_v59, %v338_v62  ;;  %v1069_v11 = vld [vmem:[#allocation2 + $0x60] sm:$0xf]  ;;  %v7937_v6 = vsel %vm7854_vm15, %v3654_v13, %v3655_v40  ;;  %v7943_v22 = vsel %vm7854_vm15, %v6226_v28, %v3659_v19  ;;  %v378_v48 = vmul.f32 %v7835_v59, %v339_v23 }
  0x97   : > { %v6227_v33 = vrot.slane %v7912_v25, 9  ;;  %v3077_v35 = vshrl.u32 %v2881_v39, 16  ;;  %v3080_v37 = vshll.u32 %v2881_v39, 16  ;;  %v1298_v21 = vshrl.u32 %v1069_v11, 16 }
  0x98   : > { %v1301_v44 = vshll.u32 %v1069_v11, 16  ;;  %v765_v61 = vor.u32 %v763_v14, %v762_v60  ;;  %v767_v26 = vrot.slane %v762_v60, 4  ;;  %v6242_v40 = vcombine.low %v7909_v17, %v7937_v6 }
  0x99   : > { %v6243_v36 = vcombine.low %v7943_v22, %v7865_v7  ;;  %v7951_v47 = vld [vmem:[#allocation2 + $0x64] sm:$0xf]  ;;  %v7953_v19 = vld [vmem:[#allocation2 + $0x68] sm:$0x1]  ;;  %v3079_v50 = vrot.slane %v3077_v35, 4  ;;  %v3082_v46 = vrot.slane %v3080_v37, 5  ;;  %v416_v52 = vadd.f32 %v7841_v15, %v377_v18 }
  0x9a   : > { %v417_v8 = vadd.f32 %v7841_v15, %v378_v48  ;;  %v3086_v12 = vshll.u32 %v7951_v47, 16  ;;  %v3090_v54 = vshrl.u32 %v7951_v47, 16  ;;  %v3096_v58 = vshll.u32 %v7953_v19, 16  ;;  %v1070_v55 = vld [vmem:[#allocation2 + $0x64] sm:$0xf] }
  0x9b   : > { %v1300_v2 = vrot.slane %v1298_v21, 4  ;;  %v3083_v45 = vor.u32 %v3082_v46, %v3079_v50  ;;  %v1094_v5 = vld [vmem:[#allocation2 + $0x68] sm:$0x1]  ;;  %v1303_v43 = vrot.slane %v1301_v44, 5  ;;  %v1307_v62 = vshll.u32 %v1070_v55, 16 }
  0x9c   : > { %v1311_v9 = vshrl.u32 %v1070_v55, 16  ;;  %v3088_v41 = vrot.slane %v3086_v12, 5  ;;  %v3092_v14 = vrot.slane %v3090_v54, 4  ;;  %v3098_v23 = vrot.slane %v3096_v58, 5  ;;  %v1071_v13 = vld [vmem:[#allocation2 + $0x6c] sm:$0xf] }
  0x9d   : > { %v1317_v24 = vshll.u32 %v1094_v5, 16  ;;  %v3084_v28 = vrot.slane %v3083_v45, 4  ;;  %v1304_v60 = vor.u32 %v1303_v43, %v1300_v2  ;;  %v1309_v18 = vrot.slane %v1307_v62, 5 }
  0x9e   : > { %v1313_v39 = vrot.slane %v1311_v9, 4  ;;  %v3093_v11 = vor.u32 %v3092_v14, %v3088_v41  ;;  %v766_v35 = vsel %vm7549_vm10, %v758_v1, %v765_v61  ;;  %v1002_v37 = vsel %vm7561_vm12, %v767_v26, %v1001_v32  ;;  %v340_v14 = vld [vmem:[%s7508_s14 + $0xb0] sm:$0xff] }
  0x9f   : > { %v1319_v48 = vrot.slane %v1317_v24, 5  ;;  %v3089_v21 = vsel %vm7537_vm9, %v3084_v28, %v3088_v41  ;;  %v1305_v44 = vrot.slane %v1304_v60, 4  ;;  %1000 = vst.msk [vmem:[#allocation2 + $0x70] sm:$0xf] %vm460_vm1, %v766_v35  ;;  %1003 = vst [vmem:[#allocation2 + $0x74] sm:$0x1] %v1002_v37 }
  0xa0   : > { %v1314_v50 = vor.u32 %v1313_v39, %v1309_v18  ;;  %v1322_v46 = vshrl.u32 %v1071_v13, 16  ;;  %v3094_v12 = vrot.slane %v3093_v11, 4  ;;  %v1325_v54 = vshll.u32 %v1071_v13, 16 }
  0xa1   : > { %v446_v58 = vmax.f32 %v7926_v30, 0.0  ;;  %v447_v1 = vmax.f32 %v7930_v31, 0.0  ;;  %v1310_v61 = vsel %vm7537_vm9, %v1305_v44, %v1309_v18  ;;  %v448_v55 = vmax.f32 %v416_v52, 0.0  ;;  %v341_v31 = vld [vmem:[%s7508_s14 + $0xb8] sm:$0xff] }
  0xa2   : > { %v1315_v26 = vrot.slane %v1314_v50, 4  ;;  %v1324_v32 = vrot.slane %v1322_v46, 4  ;;  %v3099_v2 = vsel %vm7537_vm9, %v3094_v12, %v3098_v23  ;;  %v1327_v45 = vrot.slane %v1325_v54, 5  ;;  %v1004_v23 = vld [vmem:[#allocation2 + $0x78] sm:$0xf] }
  0xa3   : > { %v6445_v5 = vpack.c.bf16 %v446_v58, %v446_v58  ;;  %v6446_v43 = vpack.c.bf16 %v447_v1, %v447_v1  ;;  %v6200_v62 = vcombine.low %v3089_v21, %v3099_v2  ;;  %v449_v41 = vmax.f32 %v417_v8, 0.0  ;;  %v1008_v58 = vld [vmem:[#allocation2 + $0x80] sm:$0x1] }
  0xa4   : > { %v1320_v9 = vsel %vm7537_vm9, %v1315_v26, %v1319_v48  ;;  %v6447_v30 = vpack.c.bf16 %v448_v55, %v448_v55  ;;  %v1328_v13 = vor.u32 %v1327_v45, %v1324_v32  ;;  %v379_v21 = vmul.f32 %v7835_v59, %v340_v14  ;;  %v1011_v55 = vld [vmem:[#allocation2 + $0x84] sm:$0xf] }
  0xa5   : > { %v6054_v24 = vcombine.low %v1310_v61, %v1320_v9  ;;  %v769_v28 = vshrl.u32 %v6445_v5, 16  ;;  %v772_v60 = vshll.u32 %v6445_v5, 16  ;;  %6795 = vmatmul.mubr.msk.bf16.gmra.mrb[12].mxu0 %vm1539_vm8, %v6200_v62  ;;  %v777_v52 = vshrl.u32 %v6446_v43, 16  ;;  %v3589_v9 = vld [vmem:[#allocation2 + $0x30] sm:$0xe] }
  0xa6   : > { %v780_v18 = vshll.u32 %v6446_v43, 16  ;;  %v6448_v39 = vpack.c.bf16 %v449_v41, %v449_v41  ;;  %v786_v11 = vshrl.u32 %v6447_v30, 16  ;;  %v1072_v35 = vld [vmem:[#allocation2 + $0x70] sm:$0xf]  ;;  %v1095_v37 = vld [vmem:[#allocation2 + $0x74] sm:$0x1]  ;;  %6816 = vmatprep.mubr.msk.bf16.mxu0 %vm1539_vm8, %v6242_v40  ;;  %v380_v44 = vmul.f32 %v7835_v59, %v341_v31 }
  0xa7   : > { %6662 = vmatprep.mubr.msk.bf16.mxu1 %vm1539_vm8, %v6054_v24  ;;  %v1329_v48 = vrot.slane %v1328_v13, 4  ;;  %v771_v8 = vrot.slane %v769_v28, 7  ;;  %v1331_v50 = vshll.u32 %v1072_v35, 16  ;;  %v1335_v46 = vshrl.u32 %v1072_v35, 16 }
  0xa8   : > { %v1341_v12 = vshll.u32 %v1095_v37, 16  ;;  %v779_v54 = vrot.slane %v777_v52, 7  ;;  %v788_v26 = vrot.slane %v786_v11, 7  ;;  %v789_v32 = vshll.u32 %v6447_v30, 16  ;;  %v8000_v52 = vld [vmem:[%s9435_s1 + $0xe] sm:$0x3] }
  0xa9   : > { %v774_v1 = vor.u32 %v772_v60, %v771_v8  ;;  %v775_v61 = vrot.slane %v771_v8, 4  ;;  %v1333_v2 = vrot.slane %v1331_v50, 5  ;;  %v1337_v45 = vrot.slane %v1335_v46, 4  ;;  %v342_v50 = vld [vmem:[%s7508_s14 + $0xc0] sm:$0xff] }
  0xaa   : > { %v1343_v17 = vrot.slane %v1341_v12, 5  ;;  %v782_v6 = vor.u32 %v780_v18, %v779_v54  ;;  %v784_v40 = vrot.slane %v779_v54, 4  ;;  %v791_v43 = vor.u32 %v789_v32, %v788_v26 }
  0xab   : > { %v1005_v5 = vsel %vm7555_vm11, %v774_v1, %v1004_v23  ;;  %v792_v62 = vrot.slane %v788_v26, 4  ;;  %v1334_v41 = vsel %vm7537_vm9, %v1329_v48, %v1333_v2  ;;  %v1338_v14 = vor.u32 %v1337_v45, %v1333_v2 }
  0xac   : > { %v783_v31 = vsel %vm7549_vm10, %v775_v61, %v782_v6  ;;  %1006 = vst [vmem:[#allocation2 + $0x78] sm:$0xf] %v1005_v5  ;;  %v794_v30 = vshrl.u32 %v6448_v39, 16  ;;  %v1009_v24 = vsel %vm7561_vm12, %v784_v40, %v1008_v58  ;;  %v797_v13 = vshll.u32 %v6448_v39, 16 }
  0xad   : > { %1007 = vst.msk [vmem:[#allocation2 + $0x7c] sm:$0xf] %vm460_vm1, %v783_v31  ;;  %v1012_v28 = vsel %vm7555_vm11, %v791_v43, %v1011_v55  ;;  %v3666_v60 = vrot.slane %v7692_v34, 5  ;;  %v1339_v18 = vrot.slane %v1338_v14, 4  ;;  %6817 = vmatmul.mubr.msk.bf16.vlgmr.msra.gmra.mrb[0].mxu0 %vm1539_vm8, %v6243_v36  ;;  %1010 = vst [vmem:[#allocation2 + $0x80] sm:$0x1] %v1009_v24  ;;  %v419_v54 = vadd.f32 %v7841_v15, %v380_v44 }
  0xae   : > { %v796_v23 = vrot.slane %v794_v30, 7  ;;  %1013 = vst [vmem:[#allocation2 + $0x84] sm:$0xf] %v1012_v28  ;;  %v3669_v39 = vrot.slane %v7699_v53, 5  ;;  %v6228_v11 = vrot.slane %v3589_v9, 9  ;;  %6849 = vmatpush3.bf16.msra.mxu0 %v7921_v29  ;;  %v3673_v7 = vrot.slane %v7731_v10, 5 }
  0xaf   : > { %v1015_v34 = vld [vmem:[#allocation2 + $0x8c] sm:$0x1]  ;;  %v3667_v35 = vsel %vm7854_vm15, %v6227_v33, %v3666_v60  ;;  %v3668_v37 = vrot.slane %v3666_v60, 4  ;;  %v3676_v22 = vrot.slane %v7733_v56, 5  ;;  %v1344_v36 = vsel %vm7537_vm9, %v1339_v18, %v1343_v17  ;;  %7216 = vmatprep.subr.msk.bf16.mxu0 %vm1588_vm0, %v8000_v52  ;;  %v344_v18 = vld [vmem:[%s7508_s14 + $0xd0] sm:$0xff] }
  0xb0   : > { %v799_v48 = vor.u32 %v797_v13, %v796_v23  ;;  %v801_v8 = vrot.slane %v796_v23, 4  ;;  %v418_v53 = vadd.f32 %v7841_v15, %v379_v21  ;;  %v343_v29 = vld [vmem:[%s7508_s14 + $0xc8] sm:$0xff]  ;;  %v6055_v25 = vcombine.low %v1334_v41, %v1344_v36 }
  0xb1   : > { %v3670_v33 = vsel %vm7854_vm15, %v3668_v37, %v3669_v39  ;;  %v3674_v10 = vsel %vm7854_vm15, %v6228_v11, %v3673_v7  ;;  %v3675_v56 = vrot.slane %v3673_v7, 4  ;;  %v381_v26 = vmul.f32 %v7835_v59, %v342_v50 }
  0xb2   : > { %v800_v46 = vsel %vm7549_vm10, %v792_v62, %v799_v48  ;;  %v1016_v12 = vsel %vm7561_vm12, %v801_v8, %v1015_v34  ;;  %v6244_v21 = vcombine.low %v3667_v35, %v3670_v33  ;;  %6663 = vmatmul.mubr.msk.bf16.gmra.mrb[16].mxu1 %vm1539_vm8, %v6055_v25  ;;  %v450_v61 = vmax.f32 %v418_v53, 0.0 }
  0xb3   : > { %v8031_v58 = vld [vmem:[#allocation2 + $0x78] sm:$0xf]  ;;  %1014 = vst.msk [vmem:[#allocation2 + $0x88] sm:$0xf] %vm460_vm1, %v800_v46  ;;  %1017 = vst [vmem:[#allocation2 + $0x8c] sm:$0x1] %v1016_v12  ;;  %v3677_v1 = vsel %vm7854_vm15, %v3675_v56, %v3676_v22  ;;  %v382_v32 = vmul.f32 %v7835_v59, %v343_v29  ;;  %v420_v9 = vadd.f32 %v7841_v15, %v381_v26 }
  0xb4   : > { %v8038_v55 = vld [vmem:[#allocation2 + $0x7c] sm:$0xf]  ;;  %v1346_v2 = vshrl.u32 %v8031_v58, 16  ;;  %v1349_v44 = vshll.u32 %v8031_v58, 16  ;;  %6820 = vmatprep.mubr.msk.bf16.mxu0 %vm1539_vm8, %v6244_v21  ;;  %v6245_v45 = vcombine.low %v3674_v10, %v3677_v1  ;;  %v451_v17 = vmax.f32 %v419_v54, 0.0 }
  0xb5   : > { %v1096_v6 = vld [vmem:[#allocation2 + $0x80] sm:$0x1]  ;;  %v1355_v40 = vshll.u32 %v8038_v55, 16  ;;  %v1359_v5 = vshrl.u32 %v8038_v55, 16  ;;  %v8045_v43 = vld [vmem:[#allocation2 + $0x84] sm:$0xf]  ;;  %v6449_v62 = vpack.c.bf16 %v450_v61, %v450_v61  ;;  %v421_v50 = vadd.f32 %v7841_v15, %v382_v32 }
  0xb6   : > { %v1348_v41 = vrot.slane %v1346_v2, 4  ;;  %v1351_v14 = vrot.slane %v1349_v44, 5  ;;  %v1365_v31 = vshll.u32 %v1096_v6, 16  ;;  %v1370_v30 = vshrl.u32 %v8045_v43, 16  ;;  %6821 = vmatmul.mubr.msk.bf16.gmra.mrb[4].mxu0 %vm1539_vm8, %v6245_v45  ;;  %v1018_v1 = vld [vmem:[#allocation2 + $0x90] sm:$0xf] }
  0xb7   : > { %v1357_v24 = vrot.slane %v1355_v40, 5  ;;  %v1361_v13 = vrot.slane %v1359_v5, 4  ;;  %v1373_v28 = vshll.u32 %v8045_v43, 16  ;;  %v6450_v60 = vpack.c.bf16 %v451_v17, %v451_v17  ;;  %v3590_v61 = vld [vmem:[#allocation2 + $0x3c] sm:$0xe] }
  0xb8   : > { %v1352_v23 = vor.u32 %v1351_v14, %v1348_v41  ;;  %v1367_v39 = vrot.slane %v1365_v31, 5  ;;  %v1372_v11 = vrot.slane %v1370_v30, 4  ;;  %v803_v34 = vshrl.u32 %v6449_v62, 16  ;;  %v1022_v45 = vld [vmem:[#allocation2 + $0x98] sm:$0x1] }
  0xb9   : > { %v1362_v35 = vor.u32 %v1361_v13, %v1357_v24  ;;  %v1375_v37 = vrot.slane %v1373_v28, 5  ;;  %v806_v7 = vshll.u32 %v6449_v62, 16  ;;  %v811_v22 = vshrl.u32 %v6450_v60, 16  ;;  %v3591_v17 = vld [vmem:[#allocation2 + $0x48] sm:$0xe] }
  0xba   : > { %v1353_v36 = vrot.slane %v1352_v23, 4  ;;  %v8052_v48 = vld [vmem:[#allocation2 + $0x88] sm:$0xf]  ;;  %v1097_v8 = vld [vmem:[#allocation2 + $0x8c] sm:$0x1]  ;;  %v805_v53 = vrot.slane %v803_v34, 7  ;;  %v383_v29 = vmul.f32 %v7835_v59, %v344_v18 }
  0xbb   : > { %v1363_v25 = vrot.slane %v1362_v35, 4  ;;  %v1376_v33 = vor.u32 %v1375_v37, %v1372_v11  ;;  %v1379_v10 = vshll.u32 %v8052_v48, 16  ;;  %v1383_v56 = vshrl.u32 %v8052_v48, 16  ;;  %v7324_v16 = vld [vmem:[#allocation2 + $0x88] sm:$0xf] }
  0xbc   : > { %v1358_v46 = vsel %vm7537_vm9, %v1353_v36, %v1357_v24  ;;  %v1389_v12 = vshll.u32 %v1097_v8, 16  ;;  %v808_v21 = vor.u32 %v806_v7, %v805_v53  ;;  %v809_v54 = vrot.slane %v805_v53, 4  ;;  %v345_v7 = vld [vmem:[%s7508_s14 + $0xd8] sm:$0xff] }
  0xbd   : > { %v1368_v26 = vsel %vm7537_vm9, %v1363_v25, %v1367_v39  ;;  %v1377_v32 = vrot.slane %v1376_v33, 4  ;;  %v1381_v2 = vrot.slane %v1379_v10, 5  ;;  %v1385_v44 = vrot.slane %v1383_v56, 4 }
  0xbe   : > { %v6056_v6 = vcombine.low %v1358_v46, %v1368_v26  ;;  %v1391_v40 = vrot.slane %v1389_v12, 5  ;;  %v813_v5 = vrot.slane %v811_v22, 7  ;;  %v814_v62 = vshll.u32 %v6450_v60, 16  ;;  %v346_v22 = vld [vmem:[%s7508_s14 + $0xe0] sm:$0xff] }
  0xbf   : > { %v1382_v41 = vsel %vm7537_vm9, %v1377_v32, %v1381_v2  ;;  %v1386_v14 = vor.u32 %v1385_v44, %v1381_v2  ;;  %v1019_v31 = vsel %vm7555_vm11, %v808_v21, %v1018_v1  ;;  %v452_v30 = vmax.f32 %v420_v9, 0.0  ;;  %v1029_v44 = vld [vmem:[#allocation2 + $0xa4] sm:$0x1] }
  0xc0   : > { %6666 = vmatprep.mubr.msk.bf16.mxu1 %vm1539_vm8, %v6056_v6  ;;  %v816_v24 = vor.u32 %v814_v62, %v813_v5  ;;  %v818_v13 = vrot.slane %v813_v5, 4  ;;  %1020 = vst [vmem:[#allocation2 + $0x90] sm:$0xf] %v1019_v31  ;;  %v453_v28 = vmax.f32 %v421_v50, 0.0  ;;  %v6229_v18 = vrot.slane %v3590_v61, 9  ;;  %v347_v31 = vld [vmem:[%s7508_s14 + $0xe8] sm:$0xff] }
  0xc1   : > { %v1387_v23 = vrot.slane %v1386_v14, 4  ;;  %v6451_v39 = vpack.c.bf16 %v452_v30, %v452_v30  ;;  %v3680_v60 = vrot.slane %v7773_v49, 5  ;;  %v3683_v11 = vrot.slane %v7782_v51, 5 }
  0xc2   : > { %v817_v34 = vsel %vm7549_vm10, %v809_v54, %v816_v24  ;;  %v1023_v9 = vsel %vm7561_vm12, %v818_v13, %v1022_v45  ;;  %v6452_v35 = vpack.c.bf16 %v453_v28, %v453_v28  ;;  %v6230_v37 = vrot.slane %v3591_v17, 9  ;;  %v1025_v54 = vld [vmem:[#allocation2 + $0x9c] sm:$0xf] }
  0xc3   : > { %v1392_v36 = vsel %vm7537_vm9, %v1387_v23, %v1391_v40  ;;  %1021 = vst.msk [vmem:[#allocation2 + $0x94] sm:$0xf] %vm460_vm1, %v817_v34  ;;  %1024 = vst [vmem:[#allocation2 + $0x98] sm:$0x1] %v1023_v9  ;;  %v820_v8 = vshrl.u32 %v6451_v39, 16  ;;  %v823_v49 = vshll.u32 %v6451_v39, 16  ;;  %v3681_v51 = vsel %vm7854_vm15, %v6229_v18, %v3680_v60 }
  0xc4   : > { %v6057_v53 = vcombine.low %v1382_v41, %v1392_v36  ;;  %v828_v50 = vshrl.u32 %v6452_v35, 16  ;;  %v831_v25 = vshll.u32 %v6452_v35, 16  ;;  %v3682_v33 = vrot.slane %v3680_v60, 4 }
  0xc5   : > { %v822_v10 = vrot.slane %v820_v8, 7  ;;  %v3687_v56 = vrot.slane %v7803_v63, 5  ;;  %v3690_v46 = vrot.slane %v7814_v27, 5  ;;  %v384_v12 = vmul.f32 %v7835_v59, %v345_v7 }
  0xc6   : > { %6667 = vmatmul.mubr.msk.bf16.gmra.mrb[20].mxu1 %vm1539_vm8, %v6057_v53  ;;  %v830_v21 = vrot.slane %v828_v50, 7  ;;  %v3684_v1 = vsel %vm7854_vm15, %v3682_v33, %v3683_v11  ;;  %v422_v61 = vadd.f32 %v7841_v15, %v383_v29  ;;  %v385_v26 = vmul.f32 %v7835_v59, %v346_v22  ;;  %v3592_v22 = vld [vmem:[#allocation2 + $0x54] sm:$0xe] }
  0xc7   : > { %v8088_v32 = vld [vmem:[#allocation2 + $0x90] sm:$0xf]  ;;  %v825_v2 = vor.u32 %v823_v49, %v822_v10  ;;  %v826_v63 = vrot.slane %v822_v10, 4  ;;  %v6246_v27 = vcombine.low %v3681_v51, %v3684_v1  ;;  %v3688_v45 = vsel %vm7854_vm15, %v6230_v37, %v3687_v56 }
  0xc8   : > { %v1394_v17 = vshrl.u32 %v8088_v32, 16  ;;  %v1397_v6 = vshll.u32 %v8088_v32, 16  ;;  %v833_v40 = vor.u32 %v831_v25, %v830_v21  ;;  %v835_v5 = vrot.slane %v830_v21, 4 }
  0xc9   : > { %v1026_v29 = vsel %vm7555_vm11, %v825_v2, %v1025_v54  ;;  %6824 = vmatprep.mubr.msk.bf16.mxu0 %vm1539_vm8, %v6246_v27  ;;  %v3689_v62 = vrot.slane %v3687_v56, 4  ;;  %v423_v41 = vadd.f32 %v7841_v15, %v384_v12  ;;  %v454_v14 = vmax.f32 %v422_v61, 0.0 }
  0xca   : > { %v8099_v30 = vld [vmem:[#allocation2 + $0x94] sm:$0xf]  ;;  %v1098_v24 = vld [vmem:[#allocation2 + $0x98] sm:$0x1]  ;;  %v1396_v13 = vrot.slane %v1394_v17, 4  ;;  %v1399_v28 = vrot.slane %v1397_v6, 5  ;;  %v834_v18 = vsel %vm7549_vm10, %v826_v63, %v833_v40  ;;  %v1030_v23 = vsel %vm7561_vm12, %v835_v5, %v1029_v44 }
  0xcb   : > { %1027 = vst [vmem:[#allocation2 + $0x9c] sm:$0xf] %v1026_v29  ;;  %v1403_v39 = vshll.u32 %v8099_v30, 16  ;;  %v1407_v60 = vshrl.u32 %v8099_v30, 16  ;;  %v1413_v11 = vshll.u32 %v1098_v24, 16  ;;  %v3691_v34 = vsel %vm7854_vm15, %v3689_v62, %v3690_v46 }
  0xcc   : > { %1028 = vst.msk [vmem:[#allocation2 + $0xa0] sm:$0xf] %vm460_vm1, %v834_v18  ;;  %1031 = vst [vmem:[#allocation2 + $0xa4] sm:$0x1] %v1030_v23  ;;  %v1400_v9 = vor.u32 %v1399_v28, %v1396_v13  ;;  %v6247_v35 = vcombine.low %v3688_v45, %v3691_v34  ;;  %v455_v37 = vmax.f32 %v423_v41, 0.0  ;;  %v6453_v7 = vpack.c.bf16 %v454_v14, %v454_v14 }
  0xcd   : > { %v1405_v36 = vrot.slane %v1403_v39, 5  ;;  %v1409_v8 = vrot.slane %v1407_v60, 4  ;;  %v1415_v49 = vrot.slane %v1413_v11, 5  ;;  %v386_v51 = vmul.f32 %v7835_v59, %v347_v31  ;;  %v1032_v41 = vld [vmem:[#allocation2 + $0xa8] sm:$0xf] }
  0xce   : > { %v1401_v53 = vrot.slane %v1400_v9, 4  ;;  %6825 = vmatmul.mubr.msk.bf16.gmra.mrb[8].mxu0 %vm1539_vm8, %v6247_v35  ;;  %v6454_v50 = vpack.c.bf16 %v455_v37, %v455_v37  ;;  %v837_v25 = vshrl.u32 %v6453_v7, 16  ;;  %v840_v33 = vshll.u32 %v6453_v7, 16  ;;  %v1036_v11 = vld [vmem:[#allocation2 + $0xb0] sm:$0x1] }
  0xcf   : > { %v1410_v10 = vor.u32 %v1409_v8, %v1405_v36  ;;  %v424_v56 = vadd.f32 %v7841_v15, %v385_v26  ;;  %v425_v46 = vadd.f32 %v7841_v15, %v386_v51  ;;  %v6231_v12 = vrot.slane %v3592_v22, 9 }
  0xd0   : > { %v1406_v21 = vsel %vm7537_vm9, %v1401_v53, %v1405_v36  ;;  %v839_v54 = vrot.slane %v837_v25, 7  ;;  %v845_v1 = vshrl.u32 %v6454_v50, 16  ;;  %v848_v61 = vshll.u32 %v6454_v50, 16  ;;  %v3593_v53 = vld [vmem:[#allocation2 + $0x60] sm:$0xe] }
  0xd1   : > { %v1411_v2 = vrot.slane %v1410_v10, 4  ;;  %v456_v63 = vmax.f32 %v424_v56, 0.0  ;;  %v457_v44 = vmax.f32 %v425_v46, 0.0  ;;  %v3694_v27 = vrot.slane %v7879_v20, 5 }
  0xd2   : > { %v8116_v59 = vld [vmem:[#allocation2 + $0x9c] sm:$0xf]  ;;  %v842_v6 = vor.u32 %v840_v33, %v839_v54  ;;  %v843_v24 = vrot.slane %v839_v54, 4  ;;  %v847_v23 = vrot.slane %v845_v1, 7  ;;  %v1039_v1 = vld [vmem:[#allocation2 + $0xb4] sm:$0xf] }
  0xd3   : > { %v8119_v45 = vld [vmem:[#allocation2 + $0xa0] sm:$0xf]  ;;  %v1099_v17 = vld [vmem:[#allocation2 + $0xa4] sm:$0x1]  ;;  %v1418_v26 = vshrl.u32 %v8116_v59, 16  ;;  %v1421_v15 = vshll.u32 %v8116_v59, 16  ;;  %v1416_v40 = vsel %vm7537_vm9, %v1411_v2, %v1415_v49  ;;  %v6455_v34 = vpack.c.bf16 %v456_v63, %v456_v63 }
  0xd4   : > { %v1427_v5 = vshll.u32 %v8119_v45, 16  ;;  %v1431_v29 = vshrl.u32 %v8119_v45, 16  ;;  %v1437_v62 = vshll.u32 %v1099_v17, 16  ;;  %v6058_v14 = vcombine.low %v1406_v21, %v1416_v40  ;;  %v3594_v40 = vld [vmem:[#allocation2 + $0x6c] sm:$0xe] }
  0xd5   : > { %v1420_v31 = vrot.slane %v1418_v26, 4  ;;  %v1423_v20 = vrot.slane %v1421_v15, 5  ;;  %v1033_v60 = vsel %vm7555_vm11, %v842_v6, %v1032_v41  ;;  %v6456_v9 = vpack.c.bf16 %v457_v44, %v457_v44  ;;  %v1043_v6 = vld [vmem:[#allocation2 + $0xbc] sm:$0x1]  ;;  %v2885_v41 = vld [vmem:[#allocation2 + $0x70] sm:$0xf] }
  0xd6   : > { %v1429_v13 = vrot.slane %v1427_v5, 5  ;;  %v1433_v28 = vrot.slane %v1431_v29, 4  ;;  %v1439_v18 = vrot.slane %v1437_v62, 5  ;;  %6670 = vmatprep.mubr.msk.bf16.mxu1 %vm1539_vm8, %v6058_v14  ;;  %v850_v37 = vor.u32 %v848_v61, %v847_v23  ;;  %1034 = vst [vmem:[#allocation2 + $0xa8] sm:$0xf] %v1033_v60 }
  0xd7   : > { %v1424_v39 = vor.u32 %v1423_v20, %v1420_v31  ;;  %v852_v7 = vrot.slane %v847_v23, 4  ;;  %v3695_v22 = vsel %vm7854_vm15, %v6231_v12, %v3694_v27  ;;  %v854_v8 = vshrl.u32 %v6455_v34, 16  ;;  %v2886_v14 = vld [vmem:[#allocation2 + $0x74] sm:$0x1] }
  0xd8   : > { %v1434_v35 = vor.u32 %v1433_v28, %v1429_v13  ;;  %v857_v49 = vshll.u32 %v6455_v34, 16  ;;  %v862_v51 = vshrl.u32 %v6456_v9, 16  ;;  %v851_v25 = vsel %vm7549_vm10, %v843_v24, %v850_v37 }
  0xd9   : > { %v1425_v36 = vrot.slane %v1424_v39, 4  ;;  %v1037_v33 = vsel %vm7561_vm12, %v852_v7, %v1036_v11  ;;  %v865_v10 = vshll.u32 %v6456_v9, 16  ;;  %1035 = vst.msk [vmem:[#allocation2 + $0xac] sm:$0xf] %vm460_vm1, %v851_v25  ;;  %v856_v46 = vrot.slane %v854_v8, 7 }
  0xda   : > { %v1435_v50 = vrot.slane %v1434_v35, 4  ;;  %1038 = vst [vmem:[#allocation2 + $0xb0] sm:$0x1] %v1037_v33  ;;  %v864_v12 = vrot.slane %v862_v51, 7  ;;  %v3696_v21 = vrot.slane %v3694_v27, 4  ;;  %v3697_v61 = vrot.slane %v7871_v38, 5 }
  0xdb   : > { %v1430_v56 = vsel %vm7537_vm9, %v1425_v36, %v1429_v13  ;;  %v6232_v2 = vrot.slane %v3593_v53, 9  ;;  %v3701_v63 = vrot.slane %v7951_v47, 5  ;;  %v859_v17 = vor.u32 %v857_v49, %v856_v46 }
  0xdc   : > { %v1440_v54 = vsel %vm7537_vm9, %v1435_v50, %v1439_v18  ;;  %v860_v26 = vrot.slane %v856_v46, 4  ;;  %v867_v15 = vor.u32 %v865_v10, %v864_v12  ;;  %v869_v5 = vrot.slane %v864_v12, 4  ;;  %v3595_v10 = vld [vmem:[#allocation2 + $0x78] sm:$0xe] }
  0xdd   : > { %v6059_v44 = vcombine.low %v1430_v56, %v1440_v54  ;;  %v3698_v29 = vsel %vm7854_vm15, %v3696_v21, %v3697_v61  ;;  %v3702_v27 = vsel %vm7854_vm15, %v6232_v2, %v3701_v63  ;;  %v3703_v62 = vrot.slane %v3701_v63, 4  ;;  %v8148_v38 = vld [vmem:[#allocation2 + $0xa8] sm:$0xf]  ;;  %v8181_v61 = vld [vmem:[#allocation2 + $0x80] sm:$0x1] }
  0xde   : > { %v868_v47 = vsel %vm7549_vm10, %v860_v26, %v867_v15  ;;  %v1040_v31 = vsel %vm7555_vm11, %v859_v17, %v1039_v1  ;;  %v6248_v20 = vcombine.low %v3695_v22, %v3698_v29  ;;  %v3704_v24 = vrot.slane %v7953_v19, 5  ;;  %v8179_v1 = vld [vmem:[#allocation2 + $0x7c] sm:$0xf]  ;;  %v3596_v26 = vld [vmem:[#allocation2 + $0x84] sm:$0xe] }
  0xdf   : > { %6671 = vmatmul.mubr.msk.bf16.gmra.mrb[24].mxu1 %vm1539_vm8, %v6059_v44  ;;  %v1442_v13 = vshrl.u32 %v8148_v38, 16  ;;  %v1445_v28 = vshll.u32 %v8148_v38, 16  ;;  %1041 = vst [vmem:[#allocation2 + $0xb4] sm:$0xf] %v1040_v31  ;;  %1042 = vst.msk [vmem:[#allocation2 + $0xb8] sm:$0xf] %vm460_vm1, %v868_v47  ;;  %v1044_v18 = vsel %vm7561_vm12, %v869_v5, %v1043_v6 }
  0xe0   : > { %1045 = vst [vmem:[#allocation2 + $0xbc] sm:$0x1] %v1044_v18  ;;  %6828 = vmatprep.mubr.msk.bf16.mxu0 %vm1539_vm8, %v6248_v20  ;;  %v3705_v23 = vsel %vm7854_vm15, %v3703_v62, %v3704_v24  ;;  %v6233_v39 = vrot.slane %v3594_v40, 9  ;;  %v3708_v60 = vrot.slane %v2885_v41, 5  ;;  %v3711_v11 = vrot.slane %v2886_v14, 5 }
  0xe1   : > { %v8163_v19 = vld [vmem:[#allocation2 + $0xac] sm:$0xf]  ;;  %v8165_v34 = vld [vmem:[#allocation2 + $0xb0] sm:$0x1]  ;;  %v1444_v9 = vrot.slane %v1442_v13, 4  ;;  %v1447_v35 = vrot.slane %v1445_v28, 5  ;;  %v6249_v37 = vcombine.low %v3702_v27, %v3705_v23 }
  0xe2   : > { %v1451_v7 = vshll.u32 %v8163_v19, 16  ;;  %v1455_v22 = vshrl.u32 %v8163_v19, 16  ;;  %v1461_v36 = vshll.u32 %v8165_v34, 16  ;;  %v3709_v49 = vsel %vm7854_vm15, %v6233_v39, %v3708_v60  ;;  %v2891_v29 = vld [vmem:[#allocation2 + $0x88] sm:$0xf] }
  0xe3   : > { %v1448_v8 = vor.u32 %v1447_v35, %v1444_v9  ;;  %6829 = vmatmul.mubr.msk.bf16.gmra.mrb[12].mxu0 %vm1539_vm8, %v6249_v37  ;;  %v3710_v51 = vrot.slane %v3708_v60, 4  ;;  %v6234_v14 = vrot.slane %v3595_v10, 9  ;;  %v2892_v47 = vld [vmem:[#allocation2 + $0x8c] sm:$0x1]  ;;  %v2894_v24 = vld [vmem:[#allocation2 + $0x94] sm:$0xf] }
  0xe4   : > { %v1453_v53 = vrot.slane %v1451_v7, 5  ;;  %v1457_v50 = vrot.slane %v1455_v22, 4  ;;  %v1463_v46 = vrot.slane %v1461_v36, 5  ;;  %v3597_v13 = vld [vmem:[#allocation2 + $0x90] sm:$0xe]  ;;  %v3715_v23 = vrot.slane %v8179_v1, 5 }
  0xe5   : > { %v1449_v25 = vrot.slane %v1448_v8, 4  ;;  %v3712_v33 = vsel %vm7854_vm15, %v3710_v51, %v3711_v11  ;;  %v3718_v39 = vrot.slane %v8181_v61, 5  ;;  %v6235_v9 = vrot.slane %v3596_v26, 9  ;;  %v2895_v37 = vld [vmem:[#allocation2 + $0x98] sm:$0x1] }
  0xe6   : > { %v1458_v56 = vor.u32 %v1457_v50, %v1453_v53  ;;  %v8175_v12 = vld [vmem:[#allocation2 + $0xb4] sm:$0xf]  ;;  %v8177_v21 = vld [vmem:[#allocation2 + $0xb8] sm:$0xf]  ;;  %v6250_v54 = vcombine.low %v3709_v49, %v3712_v33  ;;  %v3722_v35 = vrot.slane %v2891_v29, 5  ;;  %v3716_v22 = vsel %vm7854_vm15, %v6234_v14, %v3715_v23 }
  0xe7   : > { %v8183_v2 = vld [vmem:[#allocation2 + $0xbc] sm:$0x1]  ;;  %v1466_v63 = vshrl.u32 %v8175_v12, 16  ;;  %v1469_v44 = vshll.u32 %v8175_v12, 16  ;;  %v1475_v17 = vshll.u32 %v8177_v21, 16  ;;  %v1454_v15 = vsel %vm7537_vm9, %v1449_v25, %v1453_v53 }
  0xe8   : > { %v1459_v6 = vrot.slane %v1458_v56, 4  ;;  %v1479_v40 = vshrl.u32 %v8177_v21, 16  ;;  %v1485_v5 = vshll.u32 %v8183_v2, 16  ;;  %6832 = vmatprep.mubr.msk.bf16.mxu0 %vm1539_vm8, %v6250_v54  ;;  %v3717_v36 = vrot.slane %v3715_v23, 4  ;;  %v2897_v25 = vld [vmem:[#allocation2 + $0xa0] sm:$0xf] }
  0xe9   : > { %v1468_v27 = vrot.slane %v1466_v63, 4  ;;  %v1471_v62 = vrot.slane %v1469_v44, 5  ;;  %v1477_v41 = vrot.slane %v1475_v17, 5  ;;  %v3725_v8 = vrot.slane %v2892_v47, 5  ;;  %v2898_v54 = vld [vmem:[#allocation2 + $0xa4] sm:$0x1] }
  0xea   : > { %v1464_v31 = vsel %vm7537_vm9, %v1459_v6, %v1463_v46  ;;  %v1481_v20 = vrot.slane %v1479_v40, 4  ;;  %v1487_v11 = vrot.slane %v1485_v5, 5  ;;  %v3723_v51 = vsel %vm7854_vm15, %v6235_v9, %v3722_v35  ;;  %v3598_v63 = vld [vmem:[#allocation2 + $0x9c] sm:$0xe]  ;;  %v7277_v17 = vld [vmem:[#allocation2] sm:$0xf] }
  0xeb   : > { %v6060_v28 = vcombine.low %v1454_v15, %v1464_v31  ;;  %v1472_v18 = vor.u32 %v1471_v62, %v1468_v27  ;;  %v3724_v53 = vrot.slane %v3722_v35, 4  ;;  %v6236_v50 = vrot.slane %v3597_v13, 9  ;;  %v8208_v26 = vld [vmem:[#allocation2 + $0x4] sm:$0xf]  ;;  %v2900_v5 = vld [vmem:[#allocation2 + $0xac] sm:$0xf] }
  0xec   : > { %v1482_v60 = vor.u32 %v1481_v20, %v1477_v41  ;;  %v3719_v10 = vsel %vm7854_vm15, %v3717_v36, %v3718_v39  ;;  %v3729_v56 = vrot.slane %v2894_v24, 5  ;;  %v3732_v46 = vrot.slane %v2895_v37, 5  ;;  %v3599_v31 = vld [vmem:[#allocation2 + $0xa8] sm:$0xe]  ;;  %v7279_v9 = vld [vmem:[#allocation2 + $0xc] sm:$0xf] }
  0xed   : > { %6674 = vmatprep.mubr.msk.bf16.mxu1 %vm1539_vm8, %v6060_v28  ;;  %v1473_v7 = vrot.slane %v1472_v18, 4  ;;  %v6078_v15 = vcombine.low %v7277_v17, %v8208_v26  ;;  %v6251_v6 = vcombine.low %v3716_v22, %v3719_v10  ;;  %v3726_v40 = vsel %vm7854_vm15, %v3724_v53, %v3725_v8  ;;  %v2903_v28 = vld [vmem:[#allocation2 + $0xb8] sm:$0xf]  ;;  %v348_v18 = vld [vmem:[%s7508_s14 + $0xf0] sm:$0xff]  ;;  %v8228_v22 = vld [vmem:[#allocation2 + $0x1c] sm:$0xf] }
  0xee   : > { %v1483_v49 = vrot.slane %v1482_v60, 4  ;;  %v6252_v27 = vcombine.low %v3723_v51, %v3726_v40  ;;  %v3731_v62 = vrot.slane %v3729_v56, 4  ;;  %v3736_v14 = vrot.slane %v2897_v25, 5  ;;  %v2901_v60 = vld [vmem:[#allocation2 + $0xb0] sm:$0x1] }
  0xef   : > { %v1478_v33 = vsel %vm7537_vm9, %v1473_v7, %v1477_v41  ;;  %6833 = vmatmul.mubr.msk.bf16.gmra.mrb[16].mxu0 %vm1539_vm8, %v6251_v6  ;;  %v6237_v41 = vrot.slane %v3598_v63, 9  ;;  %v3739_v47 = vrot.slane %v2898_v54, 5  ;;  %v3730_v20 = vsel %vm7854_vm15, %v6236_v50, %v3729_v56  ;;  %v8225_v35 = vld [vmem:[#allocation2 + $0x10] sm:$0xf]  ;;  %v7281_v7 = vld [vmem:[#allocation2 + $0x18] sm:$0xf] }
  0xf0   : > { %v1488_v44 = vsel %vm7537_vm9, %v1483_v49, %v1487_v11  ;;  %6836 = vmatprep.mubr.msk.bf16.mxu0 %vm1539_vm8, %v6252_v27  ;;  %v3733_v24 = vsel %vm7854_vm15, %v3731_v62, %v3732_v46  ;;  %v3743_v13 = vrot.slane %v2900_v5, 5  ;;  %v3738_v39 = vrot.slane %v3736_v14, 4  ;;  %v349_v11 = vld [vmem:[%s7508_s14 + $0xf8] sm:$0xff]  ;;  %v3600_v51 = vld [vmem:[#allocation2 + $0xb4] sm:$0xe] }
  0xf1   : > { %v6061_v29 = vcombine.low %v1478_v33, %v1488_v44  ;;  %v3737_v23 = vsel %vm7854_vm15, %v6237_v41, %v3736_v14  ;;  %v6079_v37 = vcombine.low %v7279_v9, %v8225_v35  ;;  %v6080_v36 = vcombine.low %v7281_v7, %v8228_v22  ;;  %v2904_v49 = vld [vmem:[#allocation2 + $0xbc] sm:$0x1]  ;;  %v7283_v33 = vld [vmem:[%s9436_s2] ss:$0 sm:$0xff]  ;;  %v7285_v5 = vld [vmem:[%s9435_s1 + $0x4] sm:$0x3] }
  0xf2   : > { %v6238_v8 = vrot.slane %v3599_v31, 9  ;;  %v6253_v53 = vcombine.low %v3730_v20, %v3733_v24  ;;  %v3740_v50 = vsel %vm7854_vm15, %v3738_v39, %v3739_v47  ;;  %v3750_v25 = vrot.slane %v2903_v28, 5  ;;  %v7284_v6 = vld [vmem:[%s9437_s3] ss:$0 sm:$0xff]  ;;  %v8247_v41 = vld [vmem:[%s9435_s1 + $0x6] sm:$0x3] }
  0xf3   : > { %6675 = vmatmul.mubr.msk.bf16.gmra.mrb[28].mxu1 %vm1539_vm8, %v6061_v29  ;;  %v387_v10 = vmul.f32 %v7283_v33, %v348_v18  ;;  %v6254_v56 = vcombine.low %v3737_v23, %v3740_v50  ;;  %v3745_v46 = vrot.slane %v3743_v13, 4  ;;  %v3746_v54 = vrot.slane %v2901_v60, 5  ;;  %v7286_v60 = vld [vmem:[#allocation2 + $0x24] sm:$0xf] }
  0xf4   : > { %6680 = vmatprep.mubr.msk.bf16.mxu1 %vm1539_vm8, %v6078_v15  ;;  %v388_v63 = vmul.f32 %v7283_v33, %v349_v11  ;;  %v6239_v44 = vrot.slane %v3600_v51, 9  ;;  %v3752_v17 = vrot.slane %v3750_v25, 4  ;;  %v3753_v15 = vrot.slane %v2904_v49, 5  ;;  %v8262_v11 = vld [vmem:[#allocation2 + $0x28] sm:$0xf] }
  0xf5   : > { %v426_v40 = vadd.f32 %v7284_v6, %v387_v10  ;;  %v2307_v29 = vsel %vm1588_vm0, %v7285_v5, 0  ;;  %v3744_v14 = vsel %vm7854_vm15, %v6238_v8, %v3743_v13  ;;  %v3747_v47 = vsel %vm7854_vm15, %v3745_v46, %v3746_v54  ;;  %v7288_v8 = vld [vmem:[#allocation2 + $0x30] sm:$0xf]  ;;  %v8265_v49 = vld [vmem:[#allocation2 + $0x34] sm:$0xf] }
  0xf6   : > { %v427_v27 = vadd.f32 %v7284_v6, %v388_v63  ;;  %v3751_v20 = vsel %vm7854_vm15, %v6239_v44, %v3750_v25  ;;  %v3754_v24 = vsel %vm7854_vm15, %v3752_v17, %v3753_v15  ;;  %v6255_v23 = vcombine.low %v3744_v14, %v3747_v47  ;;  %v1046_v25 = vld [vmem:[#allocation2 + $0xc0] sm:$0xf]  ;;  %v7290_v15 = vld [vmem:[#allocation2 + $0x3c] sm:$0xf]  ;;  %v7292_v5 = vld [vmem:[#allocation2 + $0x48] sm:$0xf] }
  0xf7   : > { %6837 = vmatmul.mubr.msk.bf16.gmra.mrb[20].mxu0 %vm1539_vm8, %v6253_v53  ;;  %v458_v62 = vmax.f32 %v426_v40, 0.0  ;;  %v6081_v9 = vcombine.low %v7286_v60, %v8262_v11  ;;  %v6082_v51 = vcombine.low %v7288_v8, %v8265_v49  ;;  %v8279_v6 = vld [vmem:[#allocation2 + $0x40] sm:$0xf]  ;;  %v3134_v57 = vshll.u32 %v8179_v1, 16  ;;  %v8294_v60 = vld [vmem:[#allocation2 + $0x64] sm:$0xf] }
  0xf8   : > { %6840 = vmatprep.mubr.msk.bf16.mxu0 %vm1539_vm8, %v6254_v56  ;;  %v459_v31 = vmax.f32 %v427_v27, 0.0  ;;  %v1050_v56 = vld [vmem:[#allocation2 + $0xc8] sm:$0x1]  ;;  %v6083_v40 = vcombine.low %v7290_v15, %v8279_v6  ;;  %v3138_v27 = vshrl.u32 %v8179_v1, 16  ;;  %v7243_v8 = vld [vmem:[#allocation2 + $0x18] sm:$0xff]  }
  0xf9   : > { %v6457_v28 = vpack.c.bf16 %v458_v62, %v458_v62  ;;  %v8297_v1 = vrot.slane %v3134_v57, 5 }
  0xfa   : > { %v6458_v18 = vpack.c.bf16 %v459_v31, %v459_v31 }
  0xfb   : > { %6681 = vmatmul.mubr.msk.bf16.vlgmr.msra.gmra.mrb[0].mxu1 %vm1539_vm8, %v6079_v37  ;;  %v871_v13 = vshrl.u32 %v6457_v28, 16  ;;  %v874_v39 = vshll.u32 %v6457_v28, 16  ;;  %v6256_v37 = vcombine.low %v3751_v20, %v3754_v24  ;;  %v7294_v24 = vld [vmem:[#allocation2 + $0x54] sm:$0xf]  ;;  %v8289_v28 = vld [vmem:[#allocation2 + $0x58] sm:$0xf] }
  0xfc   : > { %6713 = vmatpush3.bf16.msra.mxu1 %v2307_v29  ;;  %6684 = vmatprep.mubr.msk.bf16.mxu1 %vm1539_vm8, %v6080_v36  ;;  %v879_v7 = vshrl.u32 %v6458_v18, 16  ;;  %v882_v36 = vshll.u32 %v6458_v18, 16  ;;  %v8282_v29 = vld [vmem:[#allocation2 + $0x4c] sm:$0xf]  ;;  %v6085_v18 = vcombine.low %v7294_v24, %v8289_v28  ;;  %9466 = vst [vmem:[#allocation4_spill] sm:$0xff] %v8297_v1  ;;  %v7244_v24 = vld [vmem:[#allocation2 + $0x24] sm:$0xff]  }
  0xfd   : > { %7211 = vmatprep.subr.msk.bf16.mxu1 %vm1588_vm0, %v8247_v41  ;;  %v873_v53 = vrot.slane %v871_v13, 7  ;;  %v6084_v0 = vcombine.low %v7292_v5, %v8282_v29 }
  0xfe   : > { %v881_v50 = vrot.slane %v879_v7, 7  ;;  %v3144_v7 = vshll.u32 %v8181_v61, 16 }
  0xff   : > { %6841 = vmatmul.mubr.msk.bf16.gmra.mrb[24].mxu0 %vm1539_vm8, %v6255_v23  ;;  %v876_v33 = vor.u32 %v874_v39, %v873_v53  ;;  %v877_v10 = vrot.slane %v873_v53, 4  ;;  %v7296_v39 = vld [vmem:[#allocation2 + $0x60] sm:$0xf] }
 0x100   : > { %6844 = vmatprep.mubr.msk.bf16.mxu0 %vm1539_vm8, %v6256_v37  ;;  %v884_v46 = vor.u32 %v882_v36, %v881_v50  ;;  %v886_v54 = vrot.slane %v881_v50, 4  ;;  %v3140_v37 = vrot.slane %v3138_v27, 4  ;;  %v2098_v50 = vrot.slane %v8208_v26, 5  ;;  %v7300_v26 = vld [vmem:[#allocation2 + $0x6c] sm:$0xf] }
 0x101   : > { %v1047_v63 = vsel %vm7555_vm11, %v876_v33, %v1046_v25  ;;  %v2045_v25 = vld [vmem:[#allocation2] sm:$0xe]  ;;  %v2046_v33 = vld [vmem:[#allocation2 + $0xc] sm:$0xe]  ;;  %v8310_v15 = vrot.slane %v3144_v7, 5 }
 0x102   : > { %v885_v44 = vsel %vm7549_vm10, %v877_v10, %v884_v46  ;;  %1048 = vst [vmem:[#allocation2 + $0xc0] sm:$0xf] %v1047_v63  ;;  %v1051_v17 = vsel %vm7561_vm12, %v886_v54, %v1050_v56  ;;  %v2112_v10 = vrot.slane %v8228_v22, 5  ;;  %v7298_v56 = vld [vmem:[#allocation2 + $0x8] sm:$0x1]  ;;  %v3141_v61 = vor.u32 %v3140_v37, %v8297_v1  ;;  %v7249_v7 = vld [vmem:[#allocation2 + $0x60] sm:$0xff]  }
 0x103   : > { %6685 = vmatmul.mubr.msk.bf16.gmra.mrb[4].mxu1 %vm1539_vm8, %v6081_v9  ;;  %1049 = vst.msk [vmem:[#allocation2 + $0xc4] sm:$0xf] %vm460_vm1, %v885_v44  ;;  %1052 = vst [vmem:[#allocation2 + $0xc8] sm:$0x1] %v1051_v17  ;;  %v6086_v9 = vcombine.low %v7296_v39, %v8294_v60  ;;  %v2101_v46 = vrot.slane %v7298_v56, 5  ;;  %v6088_v22 = vcombine.low %v8031_v58, %v8038_v55  ;;  %v2100_v57 = vrot.slane %v2098_v50, 4 }
 0x104   : > { %6688 = vmatprep.mubr.msk.bf16.mxu1 %vm1539_vm8, %v6082_v51  ;;  %v2105_v51 = vrot.slane %v8225_v35, 5  ;;  %v2047_v54 = vld [vmem:[#allocation2 + $0x18] sm:$0xe]  ;;  %v2048_v63 = vld [vmem:[#allocation2 + $0x24] sm:$0xe]  ;;  %v2119_v35 = vrot.slane %v8262_v11, 5  ;;  %v6089_v55 = vcombine.low %v8045_v43, %v8052_v48  ;;  %v6090_v37 = vcombine.low %v8088_v32, %v8099_v30 }
 0x105   : > { %v7299_v44 = vld [vmem:[#allocation2 + $0x14] sm:$0x1]  ;;  %9467 = vst [vmem:[#allocation5_spill] sm:$0xff] %v8310_v15  ;;  %v2114_v11 = vrot.slane %v2112_v10, 4  ;;  %v2126_v39 = vrot.slane %v8265_v49, 5  ;;  %v4946_v58 = vsel %vm1588_vm0, %v8000_v52, 0  ;;  %v8336_v52 = vsel %vm7854_vm15, %v2100_v57, %v2101_v46 }
 0x106   : > { %v2108_v17 = vrot.slane %v7299_v44, 5  ;;  %v2107_v27 = vrot.slane %v2105_v51, 4  ;;  %v2050_v32 = vld [vmem:[#allocation2 + $0x3c] sm:$0xe]  ;;  %v7304_v46 = vld [vmem:[#allocation2 + $0x38] sm:$0x1] }
 0x107   : > { %v2128_v56 = vrot.slane %v2126_v39, 4  ;;  %v4415_v44 = vld [vmem:[#allocation2 + $0x18] sm:$0xf] }
 0x108   : > { %v8344_v48 = vsel %vm7854_vm15, %v2107_v27, %v2108_v17  ;;  %v7305_v27 = vld [vmem:[#allocation2 + $0x44] sm:$0x1]  ;;  %v7248_v17 = vld [vmem:[#allocation2 + $0x54] sm:$0xff]  }
 0x109   : > { %v3601_v4 = vld [vmem:[#allocation2 + $0xc0] sm:$0xe] }
 0x10a   : > { %v2906_v62 = vld [vmem:[#allocation2 + $0xc4] sm:$0xf]  ;;  %v2907_v14 = vld [vmem:[#allocation2 + $0xc8] sm:$0x1]  ;;  %v6240_v47 = vrot.slane %v3601_v4, 9  ;;  %v6111_v4 = vrot.slane %v2046_v33, 9 }
 0x10b   : > { %6689 = vmatmul.mubr.msk.bf16.gmra.mrb[8].mxu1 %vm1539_vm8, %v6083_v40  ;;  %v3757_v31 = vrot.slane %v2906_v62, 5  ;;  %v3760_v20 = vrot.slane %v2907_v14, 5  ;;  %v8312_v40 = vld [vmem:[#allocation2 + $0x70] sm:$0xf]  ;;  %v6112_v62 = vrot.slane %v2047_v54, 9 }
 0x10c   : > { %6692 = vmatprep.mubr.msk.bf16.mxu1 %vm1539_vm8, %v6084_v0  ;;  %v6087_v5 = vcombine.low %v7300_v26, %v8312_v40  ;;  %v6110_v0 = vrot.slane %v2045_v25, 9  ;;  %v7302_v14 = vld [vmem:[#allocation2 + $0x20] sm:$0x1]  ;;  %v8340_v43 = vsel %vm7854_vm15, %v6111_v4, %v2105_v51  ;;  %v2133_v51 = vrot.slane %v8279_v6, 5  ;;  %v8363_v25 = vld [vmem:[%s9435_s1 + $0x10] sm:$0x3] }
 0x10d   : > { %v3758_v23 = vsel %vm7854_vm15, %v6240_v47, %v3757_v31  ;;  %v3759_v13 = vrot.slane %v3757_v31, 4  ;;  %v2115_v47 = vrot.slane %v7302_v14, 5  ;;  %v6113_v31 = vrot.slane %v2048_v63, 9  ;;  %v7246_v14 = vld [vmem:[#allocation2 + $0x3c] sm:$0xff]  }
 0x10e   : > { %v8349_v30 = vsel %vm7854_vm15, %v6112_v62, %v2112_v10  ;;  %v8377_v63 = vsel %vm1588_vm0, %v8247_v41, 0  ;;  %v2135_v4 = vrot.slane %v2133_v51, 4  ;;  %v2136_v62 = vrot.slane %v7305_v27, 5 }
 0x10f   : > { %v3761_v36 = vsel %vm7854_vm15, %v3759_v13, %v3760_v20  ;;  %v8318_v20 = vrot.slane %v3141_v61, 4  ;;  %v8353_v49 = vsel %vm7854_vm15, %v2114_v11, %v2115_v47  ;;  %v2129_v61 = vrot.slane %v7304_v46, 5  ;;  %v8390_v11 = vld [vmem:[#allocation2 + $0x54] sm:$0xe]  ;;  %v4419_v46 = vld [vmem:[#allocation2 + $0x28] sm:$0xf] }
 0x110   : > { %v6257_v53 = vcombine.low %v3758_v23, %v3761_v36  ;;  %v7303_v23 = vld [vmem:[#allocation2 + $0x2c] sm:$0x1]  ;;  %v2049_v36 = vld [vmem:[#allocation2 + $0x30] sm:$0xe] }
 0x111   : > { %9468 = vst [vmem:[#allocation6_spill] sm:$0xff] %v8318_v20  ;;  %v2122_v13 = vrot.slane %v7303_v23, 5  ;;  %v6114_v10 = vrot.slane %v2049_v36, 9 }
 0x112   : > { %6845 = vmatmul.mubr.msk.bf16.gmra.mrb[28].mxu0 %vm1539_vm8, %v6257_v53  ;;  %v8357_v53 = vsel %vm7854_vm15, %v6113_v31, %v2119_v35  ;;  %v4464_v31 = vshrl.u32 %v4415_v44, 16 }
 0x113   : > { %6693 = vmatmul.mubr.msk.bf16.gmra.mrb[12].mxu1 %vm1539_vm8, %v6085_v18  ;;  %6850 = vmatprep.mubr.msk.bf16.mxu0 %vm1539_vm8, %v7243_v8  ;;  %v2121_v18 = vrot.slane %v2119_v35, 4  ;;  %v8332_v8 = vsel %vm7854_vm15, %v6110_v0, %v2098_v50  ;;  %v2051_v50 = vld [vmem:[#allocation2 + $0x48] sm:$0xe]  ;;  %v6115_v35 = vrot.slane %v2050_v32, 9  ;;  %v4416_v0 = vld [vmem:[#allocation2 + $0x1c] sm:$0xf]  ;;  %v8394_v47 = vsel %vm7854_vm15, %v6114_v10, %v2126_v39 }
 0x114   : > { %6696 = vmatprep.mubr.msk.bf16.mxu1 %vm1539_vm8, %v6086_v9  ;;  %v7245_v9 = vld [vmem:[#allocation2 + $0x30] sm:$0xff]   ;;  %v4477_v36 = vshrl.u32 %v4416_v0, 16  ;;  %v4418_v32 = vld [vmem:[#allocation2 + $0x24] sm:$0xf]  ;;  %v6117_v10 = vrot.slane %v8390_v11, 9 }
 0x115   : > { %v8368_v33 = vsel %vm7854_vm15, %v2121_v18, %v2122_v13  ;;  %v7247_v18 = vld [vmem:[#allocation2 + $0x48] sm:$0xff]   ;;  %v8402_v23 = vsel %vm7854_vm15, %v6115_v35, %v2133_v51  ;;  %v7306_v13 = vld [vmem:[#allocation2 + $0x50] sm:$0x1]  ;;  %v2154_v35 = vrot.slane %v8294_v60, 5  ;;  %v4491_v27 = vshll.u32 %v4418_v32, 16 }
 0x116   : > { %v4479_v11 = vrot.slane %v4477_v36, 4  ;;  %v7307_v51 = vld [vmem:[#allocation2 + $0x5c] sm:$0x1]  ;;  %v4420_v36 = vld [vmem:[#allocation2 + $0x2c] sm:$0x1] }
 0x117   : > { %v2156_v57 = vrot.slane %v2154_v35, 4 }
 0x11a   : > { %6851 = vmatmul.mubr.msk.bf16.vlgmr.msra.gmra.mrb[0].mxu0 %vm1539_vm8, %v7244_v24  ;;  %v4467_v24 = vshll.u32 %v4415_v44, 16  ;;  %v2161_v44 = vrot.slane %v8312_v40, 5  ;;  %v2150_v40 = vrot.slane %v7307_v51, 5 }
 0x11b   : > { %6697 = vmatmul.mubr.msk.bf16.gmra.mrb[16].mxu1 %vm1539_vm8, %v6087_v5  ;;  %6883 = vmatpush3.bf16.msra.mxu0 %v4946_v58  ;;  %v6116_v5 = vrot.slane %v2051_v50, 9  ;;  %v2143_v58 = vrot.slane %v7306_v13, 5  ;;  %v4497_v13 = vshll.u32 %v4419_v46, 16 }
 0x11c   : > { %6700 = vmatprep.mubr.msk.bf16.mxu1 %vm1539_vm8, %v6088_v22  ;;  %6854 = vmatprep.mubr.msk.bf16.mxu0 %vm1539_vm8, %v7245_v9  ;;  %v2140_v22 = vrot.slane %v8282_v29, 5  ;;  %v8398_v29 = vsel %vm7854_vm15, %v2128_v56, %v2129_v61  ;;  %v4473_v9 = vshll.u32 %v4416_v0, 16  ;;  %v2147_v56 = vrot.slane %v8289_v28, 5 }
 0x11d   : > { %7217 = vmatprep.subr.msk.bf16.mxu0 %vm1588_vm0, %v8363_v25  ;;  %v8416_v61 = vsel %vm7854_vm15, %v2135_v4, %v2136_v62  ;;  %v4469_v28 = vrot.slane %v4467_v24, 5  ;;  %v4488_v0 = vshrl.u32 %v4418_v32, 16  ;;  %v4501_v4 = vshrl.u32 %v4419_v46, 16 }
 0x11e   : > { %v8407_v39 = vsel %vm7854_vm15, %v6116_v5, %v2140_v22  ;;  %v2142_v50 = vrot.slane %v2140_v22, 4  ;;  %v2054_v5 = vld [vmem:[#allocation2 + $0x6c] sm:$0xe]  ;;  %v4466_v22 = vrot.slane %v4464_v31, 4  ;;  %v2149_v60 = vrot.slane %v2147_v56, 4 }
 0x11f   : > { %v7308_v31 = vld [vmem:[#allocation2 + $0x68] sm:$0x1]  ;;  %v6119_v26 = vrot.slane %v2054_v5, 9  ;;  %v2163_v32 = vrot.slane %v2161_v44, 4  ;;  %v4490_v6 = vrot.slane %v4488_v0, 4  ;;  %v4493_v46 = vrot.slane %v4491_v27, 5 }
 0x120   : > { %v2157_v24 = vrot.slane %v7308_v31, 5  ;;  %v4470_v54 = vor.u32 %v4469_v28, %v4466_v22  ;;  %v8427_v1 = vrot.slane %v4497_v13, 5  ;;  %v4503_v51 = vrot.slane %v4501_v4, 4 }
 0x121   : > { %v9469_v31 = vcombine.low %v8116_v59, %v8119_v45  ;;  %v8435_v5 = vsel %vm7854_vm15, %v2142_v50, %v2143_v58  ;;  %v8439_v22 = vsel %vm7854_vm15, %v6117_v10, %v2147_v56  ;;  %v8443_v28 = vsel %vm7854_vm15, %v2149_v60, %v2150_v40  ;;  %v7310_v56 = vld [vmem:[#allocation2 + $0x7c] sm:$0xf]  ;;  %v8474_v40 = vld [vmem:[#allocation2 + $0x34] sm:$0xf] }
 0x122   : > { %6855 = vmatmul.mubr.msk.bf16.gmra.mrb[4].mxu0 %vm1539_vm8, %v7246_v14  ;;  %v4417_v14 = vld [vmem:[#allocation2 + $0x20] sm:$0x1]  ;;  %v9470_v59 = vcombine.low %v8148_v38, %v8163_v19  ;;  %v8455_v58 = vsel %vm7854_vm15, %v2156_v57, %v2157_v24  ;;  %v8459_v50 = vsel %vm7854_vm15, %v6119_v26, %v2161_v44  ;;  %v4507_v10 = vshll.u32 %v4420_v36, 16  ;;  %9471 = vst [vmem:[#allocation7_spill] sm:$0xff] %v8474_v40  ;;  %v2057_v57 = vld [vmem:[#allocation2 + $0x90] sm:$0xe] }
 0x123   : > { %6701 = vmatmul.mubr.msk.bf16.gmra.mrb[20].mxu1 %vm1539_vm8, %v6089_v55  ;;  %v2053_v55 = vld [vmem:[#allocation2 + $0x60] sm:$0xe]  ;;  %6858 = vmatprep.mubr.msk.bf16.mxu0 %vm1539_vm8, %v7247_v18  ;;  %v7309_v18 = vld [vmem:[#allocation2 + $0x74] sm:$0x1]  ;;  %v4483_v3 = vshll.u32 %v4417_v14, 16  ;;  %v2168_v27 = vrot.slane %v7310_v56, 5  ;;  %v4504_v4 = vor.u32 %v4503_v51, %v8427_v1 }
 0x124   : > { %6704 = vmatprep.mubr.msk.bf16.mxu1 %vm1539_vm8, %v6090_v37  ;;  %v8422_v37 = vrot.slane %v4473_v9, 5  ;;  %v6118_v41 = vrot.slane %v2053_v55, 9  ;;  %v2164_v9 = vrot.slane %v7309_v18, 5  ;;  %v2055_v55 = vld [vmem:[#allocation2 + $0x78] sm:$0xe]  ;;  %v4471_v38 = vrot.slane %v4470_v54, 4 }
 0x125   : > { %v6120_v13 = vrot.slane %v2055_v55, 9  ;;  %v4485_v44 = vrot.slane %v4483_v3, 5  ;;  %v7250_v14 = vld [vmem:[#allocation2 + $0x6c] sm:$0xff]   ;;  %v4509_v24 = vrot.slane %v4507_v10, 5  ;;  %v4424_v18 = vld [vmem:[#allocation2 + $0x3c] sm:$0xf] }
 0x126   : > { %v4480_v62 = vor.u32 %v4479_v11, %v8422_v37  ;;  %v8447_v0 = vsel %vm7854_vm15, %v6118_v41, %v2154_v35  ;;  %v4421_v11 = vld [vmem:[#allocation2 + $0x30] sm:$0xf]  ;;  %v8464_v41 = vsel %vm7854_vm15, %v2163_v32, %v2164_v9  ;;  %v4494_v35 = vor.u32 %v4493_v46, %v4490_v6  ;;  %v2056_v55 = vld [vmem:[#allocation2 + $0x84] sm:$0xe] }
 0x127   : > { %v4512_v54 = vshrl.u32 %v4421_v11, 16  ;;  %v4515_v6 = vshll.u32 %v4421_v11, 16  ;;  %v2170_v32 = vrot.slane %v2168_v27, 4  ;;  %v4476_v9 = vsel %vm7537_vm9, %v4471_v38, %v8422_v37  ;;  %v8499_v38 = vld [vmem:[#allocation2 + $0x38] sm:$0x1] }
 0x128   : > { %v4481_v26 = vrot.slane %v4480_v62, 4  ;;  %v7311_v62 = vld [vmem:[#allocation2 + $0x80] sm:$0x1]  ;;  %v4495_v36 = vrot.slane %v4494_v35, 4  ;;  %v8483_v46 = vsel %vm1588_vm0, %v8363_v25, 0  ;;  %v8487_v51 = vsel %vm7854_vm15, %v6120_v13, %v2168_v27  ;;  %9475 = vst [vmem:[#allocation10_spill] sm:$0xff] %v8499_v38 }
 0x129   : > { %v2171_v3 = vrot.slane %v7311_v62, 5  ;;  %9472 = vst [vmem:[#allocation8_spill] sm:$0xff] %v8483_v46  ;;  %v4505_v56 = vrot.slane %v4504_v4, 4  ;;  %v4521_v11 = vshll.u32 %v8474_v40, 16  ;;  %v4525_v37 = vshrl.u32 %v8474_v40, 16 }
 0x12a   : > { %6859 = vmatmul.mubr.msk.bf16.gmra.mrb[8].mxu0 %vm1539_vm8, %v7248_v17  ;;  %v4486_v10 = vsel %vm7537_vm9, %v4481_v26, %v4485_v44  ;;  %v9474_v25 = vcombine.low %v8175_v12, %v8177_v21  ;;  %v4514_v27 = vrot.slane %v4512_v54, 4  ;;  %v4517_v35 = vrot.slane %v4515_v6, 5  ;;  %v7314_v40 = vld [vmem:[#allocation2 + $0x94] sm:$0xf] }
 0x12b   : > { %6705 = vmatmul.mubr.msk.bf16.gmra.mrb[24].mxu1 %vm1539_vm8, %v9469_v31  ;;  %6862 = vmatprep.mubr.msk.bf16.mxu0 %vm1539_vm8, %v7249_v7  ;;  %v8489_v31 = vld [vmem:[#allocation2 + $0x40] sm:$0xf]  ;;  %v4536_v13 = vshrl.u32 %v4424_v18, 16  ;;  %v4539_v62 = vshll.u32 %v4424_v18, 16  ;;  %v9476_v7 = vcombine.low %v8332_v8, %v8336_v52  ;;  %v8507_v26 = vsel %vm7854_vm15, %v2170_v32, %v2171_v3  ;;  %v7312_v8 = vld [vmem:[#allocation2 + $0x88] sm:$0xf] }
 0x12c   : > { %6708 = vmatprep.mubr.msk.bf16.mxu1 %vm1539_vm8, %v9470_v59  ;;  %9473 = vst [vmem:[#allocation9_spill] sm:$0xff] %v8489_v31  ;;  %v7251_v59 = vld [vmem:[#allocation2 + $0x78] sm:$0xff]   ;;  %v6121_v44 = vrot.slane %v2056_v55, 9  ;;  %v4545_v12 = vshll.u32 %v8489_v31, 16  ;;  %v4549_v4 = vshrl.u32 %v8489_v31, 16  ;;  %v8512_v54 = vcombine.low %v4476_v9, %v4486_v10 }
 0x12d   : > { %v4500_v6 = vsel %vm7537_vm9, %v4495_v36, %v8427_v1  ;;  %v2175_v52 = vrot.slane %v7312_v8, 5  ;;  %v4427_v3 = vld [vmem:[#allocation2 + $0x48] sm:$0xf]  ;;  %v4510_v18 = vsel %vm7537_vm9, %v4505_v56, %v4509_v24  ;;  %v8523_v55 = vrot.slane %v4521_v11, 5  ;;  %v8526_v10 = vld [vmem:[#allocation2 + $0x4c] sm:$0xf] }
 0x12e   : > { %v4531_v9 = vshll.u32 %v8499_v38, 16  ;;  %9477 = vst [vmem:[#allocation11_spill] sm:$0xff] %v8526_v10  ;;  %v4518_v36 = vor.u32 %v4517_v35, %v4514_v27  ;;  %v4538_v8 = vrot.slane %v4536_v13, 4  ;;  %v4541_v17 = vrot.slane %v4539_v62, 5  ;;  %v7252_v11 = vld [vmem:[#allocation2 + $0x84] sm:$0xff]   ;;  %v7253_v35 = vld [vmem:[#allocation2 + $0x90] sm:$0xff]  }
 0x12f   : > { %v8532_v60 = vrot.slane %v4545_v12, 5  ;;  %v4560_v24 = vshrl.u32 %v4427_v3, 16  ;;  %v4563_v56 = vshll.u32 %v4427_v3, 16  ;;  %v2177_v32 = vrot.slane %v2175_v52, 4 }
 0x130   : > { %v4569_v31 = vshll.u32 %v8526_v10, 16  ;;  %v4573_v27 = vshrl.u32 %v8526_v10, 16  ;;  %v8540_v1 = vcombine.low %v4500_v6, %v4510_v18  ;;  %v8543_v62 = vrot.slane %v4531_v9, 5  ;;  %v8552_v6 = vld [vmem:[#allocation2 + $0x58] sm:$0xf]  ;;  %v7254_v10 = vld [vmem:[#allocation2 + $0x9c] sm:$0xff]  }
 0x131   : > { %v9480_v3 = vcombine.low %v8340_v43, %v8344_v48  ;;  %v6122_v38 = vrot.slane %v2057_v57, 9  ;;  %v2182_v20 = vrot.slane %v7314_v40, 5  ;;  %9481 = vst [vmem:[#allocation14_spill] sm:$0xff] %v8552_v6  ;;  %v9482_v18 = vcombine.low %v8349_v30, %v8353_v49  ;;  %v2058_v43 = vld [vmem:[#allocation2 + $0x9c] sm:$0xe] }
 0x132   : > { %6863 = vmatmul.mubr.msk.bf16.gmra.mrb[12].mxu0 %vm1539_vm8, %v7250_v14  ;;  %v4527_v14 = vrot.slane %v4525_v37, 4  ;;  %v8536_v37 = vsel %vm7854_vm15, %v6121_v44, %v2175_v52  ;;  %9479 = vst [vmem:[#allocation13_spill] sm:$0xff] %v8540_v1  ;;  %v8550_v44 = vrot.slane %v4518_v36, 4  ;;  %v4542_v52 = vor.u32 %v4541_v17, %v4538_v8  ;;  %v7315_v30 = vld [vmem:[%s9435_s1 + $0x8] sm:$0x3] }
 0x133   : > { %6709 = vmatmul.mubr.msk.bf16.gmra.mrb[28].mxu1 %vm1539_vm8, %v9474_v25  ;;  %6866 = vmatprep.mubr.msk.bf16.mxu0 %vm1539_vm8, %v7251_v59  ;;  %v8530_v25 = vld [vmem:[#allocation2 + $0x44] sm:$0x1]  ;;  %v4551_v59 = vrot.slane %v4549_v4, 4  ;;  %v4430_v4 = vld [vmem:[#allocation2 + $0x54] sm:$0xf]  ;;  %v2189_v48 = vrot.slane %v8119_v45, 5 }
 0x134   : > { %6714 = vmatprep.mubr.msk.bf16.mxu1 %vm1539_vm8, %v9476_v7  ;;  %v8517_v7 = vld [vmem:[#allocation2 + $0x8c] sm:$0x1]  ;;  %9478 = vst [vmem:[#allocation12_spill] sm:$0xff] %v8530_v25  ;;  %v4528_v13 = vor.u32 %v4527_v14, %v8523_v55  ;;  %v4555_v12 = vshll.u32 %v8530_v25, 16  ;;  %v4562_v9 = vrot.slane %v4560_v24, 4  ;;  %v4565_v36 = vrot.slane %v4563_v56, 5 }
 0x135   : > { %v4552_v14 = vor.u32 %v4551_v59, %v8532_v60  ;;  %v8562_v57 = vrot.slane %v4569_v31, 5  ;;  %v4575_v17 = vrot.slane %v4573_v27, 4  ;;  %v4584_v40 = vshrl.u32 %v4430_v4, 16  ;;  %v8569_v45 = vld [vmem:[#allocation2 + $0x50] sm:$0x1]  ;;  %v7255_v1 = vld [vmem:[#allocation2 + $0xa8] sm:$0xff]  }
 0x136   : > { %v4587_v8 = vshll.u32 %v4430_v4, 16  ;;  %v4529_v49 = vrot.slane %v4528_v13, 4  ;;  %v4593_v59 = vshll.u32 %v8552_v6, 16  ;;  %v4597_v31 = vshrl.u32 %v8552_v6, 16  ;;  %v7317_v25 = vld [vmem:[#allocation2 + $0xa4] sm:$0x1] }
 0x137   : > { %v4543_v24 = vrot.slane %v4542_v52, 4  ;;  %v2184_v56 = vrot.slane %v2182_v20, 4  ;;  %v6123_v4 = vrot.slane %v2058_v43, 9  ;;  %v2192_v15 = vrot.slane %v7317_v25, 5 }
 0x138   : > { %v4579_v13 = vshll.u32 %v8569_v45, 16  ;;  %v4589_v46 = vrot.slane %v4587_v8, 5  ;;  %v9483_v6 = vrot.slane %v8517_v7, 5  ;;  %v8585_v25 = vrot.slane %v4593_v59, 5 }
 0x139   : > { %v4599_v43 = vrot.slane %v4597_v31, 4  ;;  %v4524_v7 = vsel %vm7537_vm9, %v8550_v44, %v8523_v55 }
 0x13a   : > { %6867 = vmatmul.mubr.msk.bf16.gmra.mrb[16].mxu0 %vm1539_vm8, %v7252_v11  ;;  %v7316_v11 = vld [vmem:[#allocation2 + $0x98] sm:$0x1]  ;;  %v8579_v52 = vsel %vm7854_vm15, %v2177_v32, %v9483_v6  ;;  %v4534_v32 = vsel %vm7537_vm9, %v4529_v49, %v8543_v62  ;;  %v9485_v6 = vcombine.low %v8394_v47, %v8398_v29  ;;  %v8615_v62 = vsel %vm7854_vm15, %v6123_v4, %v2189_v48  ;;  %v2059_v47 = vld [vmem:[#allocation2 + $0xa8] sm:$0xe] }
 0x13b   : > { %6715 = vmatmul.mubr.msk.bf16.vlgmr.msra.gmra.mrb[0].mxu1 %vm1539_vm8, %v9480_v3  ;;  %6870 = vmatprep.mubr.msk.bf16.mxu0 %vm1539_vm8, %v7253_v35  ;;  %v2185_v27 = vrot.slane %v7316_v11, 5  ;;  %v4553_v3 = vrot.slane %v4552_v14, 4  ;;  %v4576_v35 = vor.u32 %v4575_v17, %v8562_v57  ;;  %v8583_v14 = vsel %vm7854_vm15, %v6122_v38, %v2182_v20  ;;  %v8640_v11 = vld [vmem:[#allocation2 + $0x64] sm:$0xf]  ;;  %v7256_v4 = vld [vmem:[#allocation2 + $0xb4] sm:$0xff]  }
 0x13c   : > { %6747 = vmatpush3.bf16.msra.mxu1 %v8377_v63  ;;  %6718 = vmatprep.mubr.msk.bf16.mxu1 %vm1539_vm8, %v9482_v18  ;;  %v4557_v63 = vrot.slane %v4555_v12, 5  ;;  %v2191_v18 = vrot.slane %v2189_v48, 4  ;;  %v4586_v12 = vrot.slane %v4584_v40, 4  ;;  %v4548_v20 = vsel %vm7537_vm9, %v4543_v24, %v8532_v60 }
 0x13d   : > { %7213 = vmatprep.subr.msk.bf16.mxu1 %vm1588_vm0, %v7315_v30  ;;  %v4566_v30 = vor.u32 %v4565_v36, %v4562_v9  ;;  %v9484_v9 = vcombine.low %v8357_v53, %v8368_v33  ;;  %v8603_v38 = vsel %vm7854_vm15, %v2184_v56, %v2185_v27  ;;  %v8605_v53 = vld [vmem:[#allocation2 + $0x5c] sm:$0x1]  ;;  %v4433_v33 = vld [vmem:[#allocation2 + $0x60] sm:$0xf]  ;;  %v4577_v36 = vrot.slane %v4576_v35, 4 }
 0x13e   : > { %v4558_v55 = vsel %vm7537_vm9, %v4553_v3, %v4557_v63  ;;  %v8619_v60 = vsel %vm7854_vm15, %v2191_v18, %v2192_v15  ;;  %v4581_v17 = vrot.slane %v4579_v13, 5  ;;  %v4590_v40 = vor.u32 %v4589_v46, %v4586_v12  ;;  %v2060_v15 = vld [vmem:[#allocation2 + $0xb4] sm:$0xe]  ;;  %v8642_v27 = vld [vmem:[#allocation2 + $0x68] sm:$0x1]  ;;  %v7257_v12 = vld [vmem:[#allocation2 + $0xc0] sm:$0xff]  }
 0x13f   : > { %v4567_v44 = vrot.slane %v4566_v30, 4  ;;  %v2196_v29 = vrot.slane %v8163_v19, 5  ;;  %v4600_v48 = vor.u32 %v4599_v43, %v8585_v25  ;;  %v4603_v49 = vshll.u32 %v8605_v53, 16  ;;  %9486 = vst [vmem:[#allocation15_spill] sm:$0xff] %v8642_v27  ;;  %v4436_v13 = vld [vmem:[#allocation2 + $0x6c] sm:$0xf] }
 0x140   : > { %v4608_v63 = vshrl.u32 %v4433_v33, 16  ;;  %v8628_v59 = vcombine.low %v4524_v7, %v4534_v32  ;;  %v4611_v31 = vshll.u32 %v4433_v33, 16  ;;  %v6124_v24 = vrot.slane %v2059_v47, 9  ;;  %v8711_v19 = vld [vmem:[#allocation2 + $0x74] sm:$0x1] }
 0x141   : > { %v2199_v56 = vrot.slane %v8165_v34, 5  ;;  %v4582_v3 = vsel %vm7537_vm9, %v4577_v36, %v4581_v17  ;;  %v8646_v18 = vrot.slane %v4590_v40, 4  ;;  %v2198_v30 = vrot.slane %v2196_v29, 4  ;;  %v4439_v17 = vld [vmem:[#allocation2 + $0x78] sm:$0xf]  ;;  %9493 = vst [vmem:[#allocation20_spill] sm:$0xff] %v8711_v19 }
 0x142   : > { %6871 = vmatmul.mubr.msk.bf16.gmra.mrb[20].mxu0 %vm1539_vm8, %v7254_v10  ;;  %v8630_v10 = vcombine.low %v4548_v20, %v4558_v55  ;;  %v6125_v35 = vrot.slane %v2060_v15, 9  ;;  %v8648_v43 = vrot.slane %v4600_v48, 4  ;;  %v2203_v34 = vrot.slane %v8177_v21, 5  ;;  %v8664_v55 = vld [vmem:[#allocation2 + $0x70] sm:$0xf] }
 0x143   : > { %6719 = vmatmul.mubr.msk.bf16.gmra.mrb[4].mxu1 %vm1539_vm8, %v9484_v9  ;;  %6874 = vmatprep.mubr.msk.bf16.mxu0 %vm1539_vm8, %v7255_v1  ;;  %v4572_v1 = vsel %vm7537_vm9, %v4567_v44, %v8562_v57  ;;  %v8650_v57 = vrot.slane %v4603_v49, 5  ;;  %v8653_v9 = vrot.slane %v4608_v63, 4  ;;  %v9487_v7 = vcombine.low %v8402_v23, %v8416_v61  ;;  %9488 = vst [vmem:[#allocation16_spill] sm:$0xff] %v8664_v55  ;;  %v4442_v48 = vld [vmem:[#allocation2 + $0x84] sm:$0xf] }
 0x144   : > { %6722 = vmatprep.mubr.msk.bf16.mxu1 %vm1539_vm8, %v9485_v6  ;;  %v8659_v32 = vrot.slane %v4611_v31, 5  ;;  %v4617_v20 = vshll.u32 %v8640_v11, 16  ;;  %v4621_v33 = vshrl.u32 %v8640_v11, 16  ;;  %v4627_v6 = vshll.u32 %v8642_v27, 16  ;;  %v8753_v27 = vld [vmem:[#allocation2 + $0xa0] sm:$0xf] }
 0x145   : > { %v9489_v21 = vcombine.low %v8407_v39, %v8435_v5  ;;  %v8670_v44 = vcombine.low %v4572_v1, %v4582_v3  ;;  %v8674_v23 = vsel %vm7854_vm15, %v6124_v24, %v2196_v29  ;;  %v4632_v61 = vshrl.u32 %v4436_v13, 16  ;;  %v8690_v29 = vld [vmem:[#allocation2 + $0x7c] sm:$0xf]  ;;  %v8701_v1 = vld [vmem:[#allocation2 + $0x88] sm:$0xf]  ;;  %v7258_v24 = vld [vmem:[#allocation2 + $0xcc] sm:$0xff]  }
 0x146   : > { %v4635_v36 = vshll.u32 %v4436_v13, 16  ;;  %v8683_v39 = vsel %vm7854_vm15, %v2198_v30, %v2199_v56  ;;  %v8687_v5 = vsel %vm7854_vm15, %v6125_v35, %v2203_v34  ;;  %9490 = vst [vmem:[#allocation17_spill] sm:$0xff] %v8690_v29  ;;  %v8697_v15 = vrot.slane %v2203_v34, 4  ;;  %9491 = vst [vmem:[#allocation18_spill] sm:$0xff] %v8701_v1  ;;  %v4445_v35 = vld [vmem:[#allocation2 + $0x90] sm:$0xf] }
 0x147   : > { %v4641_v63 = vshll.u32 %v8664_v55, 16  ;;  %v4645_v31 = vshrl.u32 %v8664_v55, 16  ;;  %v4614_v56 = vor.u32 %v8659_v32, %v8653_v9  ;;  %v4623_v3 = vrot.slane %v4621_v33, 4  ;;  %v4448_v55 = vld [vmem:[#allocation2 + $0x9c] sm:$0xf] }
 0x148   : > { %v8707_v30 = vrot.slane %v4627_v6, 5  ;;  %v4634_v13 = vrot.slane %v4632_v61, 4  ;;  %v4656_v34 = vshrl.u32 %v4439_v17, 16  ;;  %v4665_v46 = vshll.u32 %v8690_v29, 16 }
 0x149   : > { %v4669_v40 = vshrl.u32 %v8690_v29, 16  ;;  %v4680_v49 = vshrl.u32 %v4442_v48, 16  ;;  %v4683_v9 = vshll.u32 %v4442_v48, 16  ;;  %v8715_v32 = vrot.slane %v4641_v63, 5 }
 0x14a   : > { %6875 = vmatmul.mubr.msk.bf16.gmra.mrb[24].mxu0 %vm1539_vm8, %v7256_v4  ;;  %v8705_v4 = vrot.slane %v4617_v20, 5  ;;  %v4647_v20 = vrot.slane %v4645_v31, 4  ;;  %v4689_v33 = vshll.u32 %v8701_v1, 16  ;;  %v4693_v6 = vshrl.u32 %v8701_v1, 16 }
 0x14b   : > { %6723 = vmatmul.mubr.msk.bf16.gmra.mrb[8].mxu1 %vm1539_vm8, %v9487_v7  ;;  %6878 = vmatprep.mubr.msk.bf16.mxu0 %vm1539_vm8, %v7257_v12  ;;  %v4637_v12 = vrot.slane %v4635_v36, 5  ;;  %v4659_v7 = vshll.u32 %v4439_v17, 16  ;;  %v9494_v61 = vcombine.low %v8439_v22, %v8443_v28  ;;  %v4704_v36 = vshrl.u32 %v4445_v35, 16 }
 0x14c   : > { %6726 = vmatprep.mubr.msk.bf16.mxu1 %vm1539_vm8, %v9489_v21  ;;  %v8709_v21 = vld [vmem:[#allocation2 + $0x94] sm:$0xf]  ;;  %v4707_v17 = vshll.u32 %v4445_v35, 16  ;;  %v9495_v48 = vcombine.low %v8447_v0, %v8455_v58  ;;  %v4624_v63 = vor.u32 %v4623_v3, %v8705_v4  ;;  %v4651_v31 = vshll.u32 %v8711_v19, 16 }
 0x14d   : > { %9492 = vst [vmem:[#allocation19_spill] sm:$0xff] %v8709_v21  ;;  %v4713_v8 = vshll.u32 %v8709_v21, 16  ;;  %v4717_v47 = vshrl.u32 %v8709_v21, 16  ;;  %v4658_v1 = vrot.slane %v4656_v34, 4  ;;  %v4661_v29 = vrot.slane %v4659_v7, 5 }
 0x14e   : > { %v8732_v22 = vrot.slane %v4665_v46, 5  ;;  %v4671_v28 = vrot.slane %v4669_v40, 4  ;;  %v4682_v35 = vrot.slane %v4680_v49, 4  ;;  %v4638_v0 = vor.u32 %v4637_v12, %v4634_v13  ;;  %v8741_v7 = vld [vmem:[#allocation2 + $0x8c] sm:$0x1] }
 0x14f   : > { %v4648_v58 = vor.u32 %v4647_v20, %v8715_v32  ;;  %v8739_v3 = vrot.slane %v4689_v33, 5  ;;  %v4695_v34 = vrot.slane %v4693_v6, 4  ;;  %v4709_v46 = vrot.slane %v4707_v17, 5 }
 0x150   : > { %v8743_v21 = vrot.slane %v4713_v8, 5  ;;  %v4719_v40 = vrot.slane %v4717_v47, 4  ;;  %v8745_v49 = vrot.slane %v4614_v56, 4  ;;  %v4728_v13 = vshrl.u32 %v4448_v55, 16 }
 0x151   : > { %v4731_v12 = vshll.u32 %v4448_v55, 16  ;;  %v4662_v20 = vor.u32 %v4661_v29, %v4658_v1  ;;  %v4672_v33 = vor.u32 %v4671_v28, %v8732_v22  ;;  %v4639_v8 = vrot.slane %v4638_v0, 4 }
 0x152   : > { %6879 = vmatmul.mubr.msk.bf16.gmra.mrb[28].mxu0 %vm1539_vm8, %v7258_v24  ;;  %v4706_v24 = vrot.slane %v4704_v36, 4  ;;  %v4625_v36 = vrot.slane %v4624_v63, 4  ;;  %v4696_v47 = vor.u32 %v4695_v34, %v8739_v3  ;;  %v4699_v56 = vshll.u32 %v8741_v7, 16 }
 0x153   : > { %6727 = vmatmul.mubr.msk.bf16.gmra.mrb[12].mxu1 %vm1539_vm8, %v9494_v61  ;;  %v4685_v61 = vrot.slane %v4683_v9, 5  ;;  %6884 = vmatprep.mubr.msk.bf16.mxu0 %vm1539_vm8, %v8512_v54  ;;  %v8747_v9 = vrot.slane %v4651_v31, 5  ;;  %v8749_v54 = vld [vmem:[#allocation2 + $0x98] sm:$0x1]  ;;  %v9496_v17 = vcombine.low %v8459_v50, %v8464_v41  ;;  %v4649_v55 = vrot.slane %v4648_v58, 4  ;;  %v9498_v50 = vld [vmem:[#allocation13_spill] sm:$0xff] }
 0x154   : > { %6730 = vmatprep.mubr.msk.bf16.mxu1 %vm1539_vm8, %v9495_v48  ;;  %v8737_v48 = vld [vmem:[#allocation2 + $0x80] sm:$0x1]  ;;  %v4710_v29 = vor.u32 %v4709_v46, %v4706_v24  ;;  %v4720_v1 = vor.u32 %v4719_v40, %v8743_v21  ;;  %v4723_v31 = vshll.u32 %v8749_v54, 16  ;;  %v9497_v28 = vcombine.low %v8487_v51, %v8507_v26 }
 0x155   : > { %v4675_v6 = vshll.u32 %v8737_v48, 16  ;;  %v4686_v19 = vor.u32 %v4685_v61, %v4682_v35  ;;  %v4730_v63 = vrot.slane %v4728_v13, 4  ;;  %v4733_v35 = vrot.slane %v4731_v12, 5  ;;  %v9499_v46 = vld [vmem:[#allocation8_spill] sm:$0xff] }
 0x156   : > { %v4737_v61 = vshll.u32 %v8753_v27, 16  ;;  %v4741_v0 = vshrl.u32 %v8753_v27, 16  ;;  %v4663_v41 = vrot.slane %v4662_v20, 4  ;;  %v4673_v58 = vrot.slane %v4672_v33, 4 }
 0x157   : > { %v4677_v34 = vrot.slane %v4675_v6, 5  ;;  %v4687_v24 = vrot.slane %v4686_v19, 4  ;;  %v9500_v51 = vrot.slane %v8183_v2, 5  ;;  %v4620_v40 = vsel %vm7537_vm9, %v8745_v49, %v8705_v4  ;;  %v8785_v19 = vld [vmem:[#allocation2 + $0xa4] sm:$0x1] }
 0x158   : > { %v4697_v13 = vrot.slane %v4696_v47, 4  ;;  %v4701_v12 = vrot.slane %v4699_v56, 5  ;;  %v4711_v20 = vrot.slane %v4710_v29, 4  ;;  %v4721_v2 = vrot.slane %v4720_v1, 4  ;;  %v4451_v6 = vld [vmem:[#allocation2 + $0xa8] sm:$0xf] }
 0x159   : > { %v8779_v26 = vsel %vm7854_vm15, %v8697_v15, %v9500_v51  ;;  %v4725_v33 = vrot.slane %v4723_v31, 5  ;;  %v4644_v15 = vsel %vm7537_vm9, %v4639_v8, %v8715_v32  ;;  %v4743_v4 = vrot.slane %v4741_v0, 4  ;;  %v8806_v32 = vld [vmem:[#allocation2 + $0xac] sm:$0xf] }
 0x15a   : > { %6885 = vmatmul.mubr.msk.bf16.vlgmr.msra.gmra.mrb[0].mxu0 %vm1539_vm8, %v9498_v50  ;;  %v4654_v49 = vsel %vm7537_vm9, %v4649_v55, %v8747_v9  ;;  %v4692_v47 = vsel %vm7537_vm9, %v4687_v24, %v8739_v3  ;;  %v4702_v8 = vsel %vm7537_vm9, %v4697_v13, %v4701_v12  ;;  %v4747_v56 = vshll.u32 %v8785_v19, 16  ;;  %v5147_v13 = vld [vmem:[#allocation2 + $0x60] sm:$0xe] }
 0x15b   : > { %6731 = vmatmul.mubr.msk.bf16.gmra.mrb[16].mxu1 %vm1539_vm8, %v9496_v17  ;;  %6917 = vmatpush3.bf16.msra.mxu0 %v9499_v46  ;;  %v4734_v17 = vor.u32 %v4733_v35, %v4730_v63  ;;  %v4752_v29 = vshrl.u32 %v4451_v6, 16  ;;  %v4755_v9 = vshll.u32 %v4451_v6, 16  ;;  %v9501_v55 = vcombine.low %v8536_v37, %v8579_v52  ;;  %v9505_v46 = vld [vmem:[#allocation11_spill] sm:$0xff] }
 0x15c   : > { %6734 = vmatprep.mubr.msk.bf16.mxu1 %vm1539_vm8, %v9497_v28  ;;  %6888 = vmatprep.mubr.msk.bf16.mxu0 %vm1539_vm8, %v8628_v59  ;;  %v4630_v59 = vsel %vm7537_vm9, %v4625_v36, %v8707_v30  ;;  %v8793_v28 = vrot.slane %v4737_v61, 5  ;;  %v4668_v30 = vsel %vm7537_vm9, %v4663_v41, %v8732_v22  ;;  %v4678_v36 = vsel %vm7537_vm9, %v4673_v58, %v4677_v34  ;;  %v4454_v61 = vld [vmem:[#allocation2 + $0xb4] sm:$0xf] }
 0x15d   : > { %v9502_v22 = vsel %vm7537_vm9, %v8648_v43, %v8650_v57  ;;  %v9503_v3 = vsel %vm7537_vm9, %v8646_v18, %v8585_v25  ;;  %v6141_v31 = vcombine.low %v8674_v23, %v8683_v39  ;;  %v4716_v37 = vsel %vm7537_vm9, %v4711_v20, %v8743_v21  ;;  %v5145_v23 = vld [vmem:[#allocation2 + $0x48] sm:$0xe] }
 0x15e   : > { %v6313_v1 = vcombine.low %v9503_v3, %v9502_v22  ;;  %v4726_v52 = vsel %vm7537_vm9, %v4721_v2, %v4725_v33  ;;  %v9504_v63 = vcombine.low %v8583_v14, %v8603_v38  ;;  %v6142_v43 = vcombine.low %v8687_v5, %v8779_v26  ;;  %v8850_v38 = vld [vmem:[#allocation2 + $0xb0] sm:$0x1]  ;;  %v8957_v26 = vld [vmem:[#allocation2 + $0xbc] sm:$0x1] }
 0x15f   : > { %v8838_v25 = vrot.slane %v4734_v17, 4  ;;  %v4744_v18 = vor.u32 %v4743_v4, %v8793_v28  ;;  %v4761_v57 = vshll.u32 %v8806_v32, 16  ;;  %v6314_v39 = vcombine.low %v4620_v40, %v4630_v59  ;;  %v9506_v4 = vld [vmem:[#allocation14_spill] sm:$0xff] }
 0x160   : > { %v8844_v21 = vcombine.low %v4644_v15, %v4654_v49  ;;  %v8846_v35 = vcombine.low %v4668_v30, %v4678_v36  ;;  %v8848_v14 = vcombine.low %v4692_v47, %v4702_v8  ;;  %v8854_v0 = vcombine.low %v4716_v37, %v4726_v52  ;;  %v9509_v52 = vld [vmem:[#allocation16_spill] sm:$0xff] }
 0x161   : > { %v8856_v50 = vrot.slane %v4747_v56, 5  ;;  %v4754_v41 = vrot.slane %v4752_v29, 4  ;;  %v4757_v58 = vrot.slane %v4755_v9, 5  ;;  %v4765_v34 = vshrl.u32 %v8806_v32, 16  ;;  %v8880_v56 = vld [vmem:[#allocation2 + $0xb8] sm:$0xf] }
 0x162   : > { %6889 = vmatmul.mubr.msk.bf16.gmra.mrb[4].mxu0 %vm1539_vm8, %v8630_v10  ;;  %v5146_v10 = vld [vmem:[#allocation2 + $0x54] sm:$0xe]  ;;  %v6344_v24 = vrot.slane %v5145_v23, 9  ;;  %v5235_v51 = vrot.slane %v9505_v46, 5  ;;  %v5238_v40 = vrot.slane %v8569_v45, 5  ;;  %v8865_v12 = vrot.slane %v4744_v18, 4 }
 0x163   : > { %6735 = vmatmul.mubr.msk.bf16.gmra.mrb[20].mxu1 %vm1539_vm8, %v9501_v55  ;;  %6892 = vmatprep.mubr.msk.bf16.mxu0 %vm1539_vm8, %v8670_v44  ;;  %v4740_v44 = vsel %vm7537_vm9, %v8838_v25, %v8793_v28  ;;  %v8867_v59 = vrot.slane %v4761_v57, 5  ;;  %v4771_v20 = vshll.u32 %v8850_v38, 16  ;;  %v4776_v2 = vshrl.u32 %v4454_v61, 16  ;;  %v5148_v45 = vld [vmem:[#allocation2 + $0x6c] sm:$0xe]  ;;  %v9508_v55 = vld [vmem:[#allocation15_spill] sm:$0xff] }
 0x164   : > { %6738 = vmatprep.mubr.msk.bf16.mxu1 %vm1539_vm8, %v9504_v63  ;;  %v8872_v33 = vsel %vm7854_vm15, %v6344_v24, %v5235_v51  ;;  %v5237_v6 = vrot.slane %v5235_v51, 4  ;;  %v6345_v15 = vrot.slane %v5146_v10, 9  ;;  %v4779_v17 = vshll.u32 %v4454_v61, 16  ;;  %v9510_v18 = vld [vmem:[#allocation20_spill] sm:$0xff] }
 0x165   : > { %v5242_v49 = vrot.slane %v9506_v4, 5  ;;  %v5245_v30 = vrot.slane %v8605_v53, 5  ;;  %v6346_v36 = vrot.slane %v5147_v13, 9  ;;  %v9507_v47 = vcombine.low %v8615_v62, %v8619_v60  ;;  %v4457_v4 = vld [vmem:[#allocation2 + $0xc0] sm:$0xf] }
 0x166   : > { %v4767_v8 = vrot.slane %v4765_v34, 4  ;;  %v8884_v29 = vsel %vm7854_vm15, %v5237_v6, %v5238_v40  ;;  %v5249_v9 = vrot.slane %v8640_v11, 5  ;;  %v5252_v22 = vrot.slane %v9508_v55, 5  ;;  %v5149_v6 = vld [vmem:[#allocation2 + $0x78] sm:$0xe]  ;;  %v7263_v28 = vld [vmem:[#allocation2 + $0x3c] sm:$0xff]  }
 0x167   : > { %v6361_v53 = vcombine.low %v8872_v33, %v8884_v29  ;;  %v8893_v62 = vsel %vm7854_vm15, %v6345_v15, %v5242_v49  ;;  %v5244_v60 = vrot.slane %v5242_v49, 4  ;;  %v6347_v3 = vrot.slane %v5148_v45, 9  ;;  %v7325_v29 = vld [vmem:[#allocation2 + $0x8c] sm:$0x1] }
 0x168   : > { %v8898_v37 = vsel %vm7854_vm15, %v6346_v36, %v5249_v9  ;;  %v5251_v11 = vrot.slane %v5249_v9, 4  ;;  %v5256_v63 = vrot.slane %v9509_v52, 5  ;;  %v4758_v57 = vor.u32 %v4757_v58, %v4754_v41  ;;  %v7259_v58 = vld [vmem:[#allocation2 + $0xc] sm:$0xff]  }
 0x169   : > { %v4785_v23 = vshll.u32 %v8880_v56, 16  ;;  %v4789_v61 = vshrl.u32 %v8880_v56, 16  ;;  %v8907_v10 = vsel %vm7854_vm15, %v5244_v60, %v5245_v30  ;;  %v4750_v46 = vsel %vm7537_vm9, %v8865_v12, %v8856_v50  ;;  %v9512_v9 = vld [vmem:[#allocation6_spill] sm:$0xff] }
 0x16a   : > { %6893 = vmatmul.mubr.msk.bf16.gmra.mrb[8].mxu0 %vm1539_vm8, %v6313_v1  ;;  %v2887_v1 = vld [vmem:[#allocation2 + $0x78] sm:$0xf]  ;;  %v6362_v34 = vcombine.low %v8893_v62, %v8907_v10  ;;  %v8913_v24 = vsel %vm7854_vm15, %v5251_v11, %v5252_v22  ;;  %v5258_v41 = vrot.slane %v5256_v63, 4  ;;  %v8923_v51 = vrot.slane %v4771_v20, 5  ;;  %v8951_v11 = vld [vmem:[#allocation2 + $0xc4] sm:$0xf] }
 0x16b   : > { %6739 = vmatmul.mubr.msk.bf16.gmra.mrb[24].mxu1 %vm1539_vm8, %v9507_v47  ;;  %6896 = vmatprep.mubr.msk.bf16.mxu0 %vm1539_vm8, %v6314_v39  ;;  %v8917_v39 = vsel %vm7854_vm15, %v6347_v3, %v5256_v63  ;;  %v8925_v40 = vrot.slane %v4776_v2, 4  ;;  %v6363_v13 = vcombine.low %v8898_v37, %v8913_v24  ;;  %v4768_v15 = vor.u32 %v4767_v8, %v8867_v59  ;;  %v9511_v47 = vld [vmem:[#allocation5_spill] sm:$0xff]  ;;  %v5150_v8 = vld [vmem:[#allocation2 + $0x84] sm:$0xe]  ;;  %v7329_v24 = vld [vmem:[#allocation2 + $0xa4] sm:$0x1] }
 0x16c   : > { %6742 = vmatprep.mubr.msk.bf16.mxu1 %vm1539_vm8, %v6141_v31  ;;  %v5259_v31 = vrot.slane %v9510_v18, 5  ;;  %v8930_v45 = vrot.slane %v4779_v17, 5  ;;  %v3125_v30 = vshrl.u32 %v2887_v1, 16  ;;  %v8936_v36 = vrot.slane %v4758_v57, 4  ;;  %v9513_v18 = vld [vmem:[#allocation17_spill] sm:$0xff] }
 0x16d   : > { %v3128_v2 = vshll.u32 %v2887_v1, 16  ;;  %v3147_v55 = vsel %vm7537_vm9, %v9512_v9, %v9511_v47  ;;  %v8948_v17 = vrot.slane %v4785_v23, 5  ;;  %v4791_v22 = vrot.slane %v4789_v61, 4  ;;  %v9514_v23 = vld [vmem:[#allocation18_spill] sm:$0xff]  ;;  %v7261_v47 = vld [vmem:[#allocation2 + $0x24] sm:$0xff]  }
 0x16e   : > { %v8934_v49 = vsel %vm7854_vm15, %v5258_v41, %v5259_v31  ;;  %v3127_v60 = vrot.slane %v3125_v30, 4  ;;  %v6348_v3 = vrot.slane %v5149_v6, 9  ;;  %v4800_v52 = vshrl.u32 %v4457_v4, 16  ;;  %v7260_v30 = vld [vmem:[#allocation2 + $0x18] sm:$0xff]  }
 0x16f   : > { %v6364_v20 = vcombine.low %v8917_v39, %v8934_v49  ;;  %v3130_v63 = vrot.slane %v3128_v2, 5  ;;  %v5263_v31 = vrot.slane %v9513_v18, 5  ;;  %v5266_v57 = vrot.slane %v8737_v48, 5  ;;  %v4460_v18 = vld [vmem:[#allocation2 + $0xcc] sm:$0xf] }
 0x170   : > { %v4769_v5 = vrot.slane %v4768_v15, 4  ;;  %v5270_v61 = vrot.slane %v9514_v23, 5  ;;  %v5273_v1 = vrot.slane %v8741_v7, 5  ;;  %v4803_v41 = vshll.u32 %v4457_v4, 16 }
 0x171   : > { %v8965_v6 = vsel %vm7854_vm15, %v6348_v3, %v5263_v31  ;;  %v5265_v48 = vrot.slane %v5263_v31, 4  ;;  %v4813_v15 = vshrl.u32 %v8951_v11, 16  ;;  %v4795_v4 = vshll.u32 %v8957_v26, 16 }
 0x172   : > { %6897 = vmatmul.mubr.msk.bf16.gmra.mrb[12].mxu0 %vm1539_vm8, %v8844_v21  ;;  %v4809_v21 = vshll.u32 %v8951_v11, 16  ;;  %v5272_v7 = vrot.slane %v5270_v61, 4  ;;  %v4792_v3 = vor.u32 %v4791_v22, %v8948_v17  ;;  %v4774_v31 = vsel %vm7537_vm9, %v4769_v5, %v8923_v51  ;;  %v5151_v5 = vld [vmem:[#allocation2 + $0x90] sm:$0xe] }
 0x173   : > { %6743 = vmatmul.mubr.msk.bf16.gmra.mrb[28].mxu1 %vm1539_vm8, %v6142_v43  ;;  %v6349_v43 = vrot.slane %v5150_v8, 9  ;;  %6900 = vmatprep.mubr.msk.bf16.mxu0 %vm1539_vm8, %v8846_v35  ;;  %v4782_v35 = vor.u32 %v8930_v45, %v8925_v40  ;;  %v8978_v8 = vsel %vm7854_vm15, %v5265_v48, %v5266_v57  ;;  %v4802_v57 = vrot.slane %v4800_v52, 4  ;;  %v9516_v48 = vld [vmem:[#allocation3_spill] sm:$0xff] }
 0x174   : > { %6748 = vmatprep.mubr.msk.bf16.mxu1 %vm1539_vm8, %v7259_v58  ;;  %v3131_v58 = vor.u32 %v3130_v63, %v3127_v60  ;;  %v4764_v60 = vsel %vm7537_vm9, %v8936_v36, %v8867_v59  ;;  %v8985_v63 = vld [vmem:[#allocation2 + $0xc8] sm:$0x1]  ;;  %v6365_v40 = vcombine.low %v8965_v6, %v8978_v8  ;;  %v8991_v45 = vsel %vm7854_vm15, %v5272_v7, %v5273_v1  ;;  %v9515_v59 = vld [vmem:[#allocation4_spill] sm:$0xff] }
 0x175   : > { %v8971_v2 = vsel %vm7854_vm15, %v6349_v43, %v5270_v61  ;;  %v8996_v43 = vld [vmem:[#allocation2 + $0xd0] sm:$0xf]  ;;  %v4805_v23 = vrot.slane %v4803_v41, 5  ;;  %v9004_v61 = vrot.slane %v4809_v21, 5  ;;  %v4815_v1 = vrot.slane %v4813_v15, 4 }
 0x176   : > { %v3132_v9 = vrot.slane %v3131_v58, 4  ;;  %v6366_v22 = vcombine.low %v8971_v2, %v8991_v45  ;;  %v4819_v51 = vshll.u32 %v8985_v63, 16  ;;  %v4824_v52 = vshrl.u32 %v4460_v18, 16 }
 0x177   : > { %v4827_v41 = vshll.u32 %v4460_v18, 16  ;;  %v6320_v21 = vcombine.low %v4764_v60, %v4774_v31  ;;  %v4783_v15 = vrot.slane %v4782_v35, 4  ;;  %v4837_v7 = vshrl.u32 %v8996_v43, 16 }
 0x178   : > { %v3137_v36 = vsel %vm7537_vm9, %v3132_v9, %v9515_v59  ;;  %v7262_v9 = vld [vmem:[#allocation2 + $0x30] sm:$0xff]   ;;  %v4793_v50 = vrot.slane %v4792_v3, 4  ;;  %v4806_v12 = vor.u32 %v4805_v23, %v4802_v57  ;;  %v4816_v59 = vor.u32 %v4815_v1, %v9004_v61 }
 0x179   : > { %v9006_v58 = vcombine.low %v3137_v36, %v3147_v55  ;;  %v6319_v55 = vcombine.low %v4740_v44, %v4750_v46  ;;  %v6350_v36 = vrot.slane %v5151_v5, 9  ;;  %v4821_v25 = vrot.slane %v4819_v51, 5  ;;  %v9517_v46 = vld [vmem:[#allocation19_spill] sm:$0xff] }
 0x17a   : > { %6901 = vmatmul.mubr.msk.bf16.gmra.mrb[16].mxu0 %vm1539_vm8, %v8848_v14  ;;  %v4797_v14 = vrot.slane %v4795_v4, 5  ;;  %v4826_v44 = vrot.slane %v4824_v52, 4  ;;  %v5277_v18 = vrot.slane %v9517_v46, 5  ;;  %v5284_v4 = vrot.slane %v8753_v27, 5  ;;  %v9039_v52 = vld [vmem:[#allocation2 + $0xd4] sm:$0x1] }
 0x17b   : > { %6749 = vmatmul.mubr.msk.bf16.vlgmr.msra.gmra.mrb[0].mxu1 %vm1539_vm8, %v7260_v30  ;;  %v4833_v30 = vshll.u32 %v8996_v43, 16  ;;  %6904 = vmatprep.mubr.msk.bf16.mxu0 %vm1539_vm8, %v8854_v0  ;;  %v4829_v0 = vrot.slane %v4827_v41, 5  ;;  %v4839_v31 = vrot.slane %v4837_v7, 4  ;;  %v5287_v23 = vrot.slane %v8785_v19, 5 }
 0x17c   : > { %6951 = vmatpush3.bf16.msra.mxu1 %v9516_v48  ;;  %6752 = vmatprep.mubr.msk.bf16.mxu1 %vm1539_vm8, %v7261_v47  ;;  %v5152_v47 = vld [vmem:[#allocation2 + $0x9c] sm:$0xe]  ;;  %v5280_v48 = vrot.slane %v8749_v54, 5  ;;  %v9035_v3 = vsel %vm7854_vm15, %v6350_v36, %v5277_v18  ;;  %v5279_v57 = vrot.slane %v5277_v18, 4  ;;  %v4807_v1 = vrot.slane %v4806_v12, 4 }
 0x17d   : > { %v9030_v60 = vrot.slane %v4833_v30, 5  ;;  %v6351_v35 = vrot.slane %v5152_v47, 9  ;;  %v4817_v51 = vrot.slane %v4816_v59, 4  ;;  %v5286_v5 = vrot.slane %v5284_v4, 4  ;;  %v5141_v12 = vld [vmem:[#allocation2 + $0x18] sm:$0xe] }
 0x17e   : > { %v9048_v27 = vsel %vm7854_vm15, %v5279_v57, %v5280_v48  ;;  %v4788_v19 = vsel %vm7537_vm9, %v4783_v15, %v8948_v17  ;;  %v4798_v41 = vsel %vm7537_vm9, %v4793_v50, %v4797_v14  ;;  %v4830_v47 = vor.u32 %v4829_v0, %v4826_v44  ;;  %v7264_v15 = vld [vmem:[#allocation2 + $0x48] sm:$0xff]   ;;  %v7318_v59 = vld [vmem:[#allocation2 + $0x1c] sm:$0xf] }
 0x17f   : > { %v9043_v54 = vsel %vm7854_vm15, %v6351_v35, %v5284_v4  ;;  %v6367_v30 = vcombine.low %v9035_v3, %v9048_v27  ;;  %v9060_v7 = vsel %vm7854_vm15, %v5286_v5, %v5287_v23  ;;  %v4812_v14 = vsel %vm7537_vm9, %v4807_v1, %v9004_v61  ;;  %v5154_v1 = vld [vmem:[#allocation2 + $0xb4] sm:$0xe]  ;;  %v5142_v5 = vld [vmem:[#allocation2 + $0x24] sm:$0xe] }
 0x180   : > { %v6368_v17 = vcombine.low %v9043_v54, %v9060_v7  ;;  %v4822_v50 = vsel %vm7537_vm9, %v4817_v51, %v4821_v25  ;;  %v5207_v36 = vrot.slane %v7318_v59, 5  ;;  %v6321_v44 = vcombine.low %v4788_v19, %v4798_v41  ;;  %v7320_v19 = vld [vmem:[#allocation2 + $0x28] sm:$0xf]  ;;  %v9518_v59 = vld [vmem:[#allocation7_spill] sm:$0xff] }
 0x181   : > { %v6340_v46 = vrot.slane %v5141_v12, 9  ;;  %v6322_v18 = vcombine.low %v4812_v14, %v4822_v50  ;;  %v4831_v48 = vrot.slane %v4830_v47, 4  ;;  %v5291_v61 = vrot.slane %v8806_v32, 5  ;;  %v5143_v50 = vld [vmem:[#allocation2 + $0x30] sm:$0xe] }
 0x182   : > { %6905 = vmatmul.mubr.msk.bf16.gmra.mrb[20].mxu0 %vm1539_vm8, %v6319_v55  ;;  %v4843_v55 = vshll.u32 %v9039_v52, 16  ;;  %v5209_v4 = vrot.slane %v5207_v36, 4  ;;  %v5294_v25 = vrot.slane %v8850_v38, 5  ;;  %v5214_v41 = vrot.slane %v7320_v19, 5 }
 0x183   : > { %6753 = vmatmul.mubr.msk.bf16.gmra.mrb[4].mxu1 %vm1539_vm8, %v7262_v9  ;;  %6908 = vmatprep.mubr.msk.bf16.mxu0 %vm1539_vm8, %v6320_v21  ;;  %v4840_v9 = vor.u32 %v4839_v31, %v9030_v60  ;;  %v7265_v21 = vld [vmem:[#allocation2 + $0x54] sm:$0xff]   ;;  %v7319_v31 = vld [vmem:[#allocation2 + $0x20] sm:$0x1]  ;;  %v5208_v51 = vsel %vm7854_vm15, %v6340_v46, %v5207_v36  ;;  %v4836_v32 = vsel %vm7537_vm9, %v4831_v48, %v9030_v60  ;;  %v5298_v12 = vrot.slane %v8880_v56, 5  ;;  %v7267_v60 = vld [vmem:[#allocation2 + $0x6c] sm:$0xff]  }
 0x184   : > { %6756 = vmatprep.mubr.msk.bf16.mxu1 %vm1539_vm8, %v7263_v28  ;;  %v5153_v28 = vld [vmem:[#allocation2 + $0xa8] sm:$0xe]  ;;  %v4845_v35 = vrot.slane %v4843_v55, 5  ;;  %v5210_v57 = vrot.slane %v7319_v31, 5  ;;  %v6353_v55 = vrot.slane %v5154_v1, 9  ;;  %v5221_v36 = vrot.slane %v9518_v59, 5 }
 0x185   : > { %v4841_v0 = vrot.slane %v4840_v9, 4  ;;  %v6352_v23 = vrot.slane %v5153_v28, 9  ;;  %v5293_v9 = vrot.slane %v5291_v61, 4  ;;  %v5301_v28 = vrot.slane %v8957_v26, 5  ;;  %v7321_v46 = vld [vmem:[#allocation2 + $0x2c] sm:$0x1] }
 0x186   : > { %v5211_v14 = vsel %vm7854_vm15, %v5209_v4, %v5210_v57  ;;  %v5300_v4 = vrot.slane %v5298_v12, 4  ;;  %v6342_v57 = vrot.slane %v5143_v50, 9  ;;  %v9519_v26 = vld [vmem:[#allocation10_spill] sm:$0xff]  ;;  %v5144_v1 = vld [vmem:[#allocation2 + $0x3c] sm:$0xe]  ;;  %vm5849_vm0 = vcmask 60416  }
 0x187   : > { %v9081_v47 = vsel %vm7854_vm15, %v6352_v23, %v5291_v61  ;;  %v4846_v38 = vsel %vm7537_vm9, %v4841_v0, %v4845_v35  ;;  %v5216_v0 = vrot.slane %v5214_v41, 4  ;;  %v9102_v35 = vsel %vm7854_vm15, %v6353_v55, %v5298_v12  ;;  %v2884_v55 = vld [vmem:[#allocation2 + $0x6c] sm:$0xf]  ;;  %v7268_v50 = vld [vmem:[#allocation2 + $0x78] sm:$0xff]  }
 0x188   : > { %v6323_v48 = vcombine.low %v4836_v32, %v4846_v38  ;;  %v6357_v31 = vcombine.low %v5208_v51, %v5211_v14  ;;  %v5223_v23 = vrot.slane %v5221_v36, 4  ;;  %v5224_v61 = vrot.slane %v9519_v26, 5  ;;  %v5155_v32 = vld [vmem:[#allocation2 + $0xc0] sm:$0xe]  ;;  %v5156_v14 = vld [vmem:[#allocation2 + $0xcc] sm:$0xe] }
 0x189   : > { %v5222_v12 = vsel %vm7854_vm15, %v6342_v57, %v5221_v36  ;;  %v6355_v26 = vrot.slane %v5156_v14, 9 }
 0x18a   : > { %6909 = vmatmul.mubr.msk.bf16.gmra.mrb[24].mxu0 %vm1539_vm8, %v6321_v44  ;;  %v6341_v44 = vrot.slane %v5142_v5, 9  ;;  %v9520_v5 = vld [vmem:[#allocation9_spill] sm:$0xff]  ;;  %v5225_v59 = vsel %vm7854_vm15, %v5223_v23, %v5224_v61  ;;  %v7322_v23 = vld [vmem:[#allocation2 + $0x70] sm:$0xf] }
 0x18b   : > { %6757 = vmatmul.mubr.msk.bf16.gmra.mrb[8].mxu1 %vm1539_vm8, %v7264_v15  ;;  %6912 = vmatprep.mubr.msk.bf16.mxu0 %vm1539_vm8, %v6322_v18  ;;  %v7266_v15 = vld [vmem:[#allocation2 + $0x60] sm:$0xff]   ;;  %v5217_v18 = vrot.slane %v7321_v46, 5  ;;  %v5228_v19 = vrot.slane %v9520_v5, 5  ;;  %v3110_v61 = vshll.u32 %v7322_v23, 16  ;;  %v3114_v5 = vshrl.u32 %v7322_v23, 16 }
 0x18c   : > { %6760 = vmatprep.mubr.msk.bf16.mxu1 %vm1539_vm8, %v7265_v21  ;;  %v9095_v21 = vsel %vm7854_vm15, %v5293_v9, %v5294_v25  ;;  %v9108_v25 = vsel %vm7854_vm15, %v5300_v4, %v5301_v28  ;;  %v5215_v51 = vsel %vm7854_vm15, %v6341_v44, %v5214_v41  ;;  %v6354_v28 = vrot.slane %v5155_v32, 9  ;;  %v7269_v46 = vld [vmem:[#allocation2 + $0x84] sm:$0xff]   ;;  %v2893_v23 = vld [vmem:[#allocation2 + $0x90] sm:$0xf] }
 0x18d   : > { %v6369_v56 = vcombine.low %v9081_v47, %v9095_v21  ;;  %v6370_v9 = vcombine.low %v9102_v35, %v9108_v25  ;;  %v5218_v38 = vsel %vm7854_vm15, %v5216_v0, %v5217_v18  ;;  %v5308_v41 = vrot.slane %v8985_v63, 5 }
 0x18e   : > { %v6358_v44 = vcombine.low %v5215_v51, %v5218_v38  ;;  %v5230_v18 = vrot.slane %v5228_v19, 4  ;;  %v3101_v4 = vshrl.u32 %v2884_v55, 16  ;;  %v5315_v32 = vrot.slane %v9039_v52, 5 }
 0x192   : > { %6913 = vmatmul.mubr.msk.bf16.gmra.mrb[28].mxu0 %vm1539_vm8, %v6323_v48  ;;  %v9521_v48 = vld [vmem:[#allocation12_spill] sm:$0xff] }
 0x193   : > { %6761 = vmatmul.mubr.msk.bf16.gmra.mrb[12].mxu1 %vm1539_vm8, %v7266_v15  ;;  %6918 = vmatprep.mubr.msk.bf16.mxu0 %vm1539_vm8, %v6357_v31  ;;  %v6343_v15 = vrot.slane %v5144_v1, 9  ;;  %v5231_v0 = vrot.slane %v9521_v48, 5  ;;  %v3104_v31 = vshll.u32 %v2884_v55, 16  ;;  %v6359_v1 = vcombine.low %v5222_v12, %v5225_v59 }
 0x194   : > { %6764 = vmatprep.mubr.msk.bf16.mxu1 %vm1539_vm8, %v7267_v60  ;;  %v5305_v60 = vrot.slane %v8951_v11, 5  ;;  %v5312_v11 = vrot.slane %v8996_v43, 5  ;;  %v3103_v12 = vrot.slane %v3101_v4, 4  ;;  %v3116_v59 = vrot.slane %v3114_v5, 4  ;;  %v7323_v4 = vld [vmem:[#allocation2 + $0x74] sm:$0x1] }
 0x195   : > { %v5229_v43 = vsel %vm7854_vm15, %v6343_v15, %v5228_v19  ;;  %v3106_v14 = vrot.slane %v3104_v31, 5  ;;  %v5232_v52 = vsel %vm7854_vm15, %v5230_v18, %v5231_v0  ;;  %v3120_v31 = vshll.u32 %v7323_v4, 16 }
 0x196   : > { %v9129_v36 = vsel %vm7854_vm15, %v6354_v28, %v5305_v60  ;;  %v5307_v57 = vrot.slane %v5305_v60, 4  ;;  %v9143_v38 = vsel %vm7854_vm15, %v6355_v26, %v5312_v11  ;;  %v5314_v55 = vrot.slane %v5312_v11, 4  ;;  %v7270_v60 = vld [vmem:[#allocation2 + $0x90] sm:$0xff]   ;;  %v7272_v11 = vld [vmem:[#allocation2 + $0xa8] sm:$0xff]  }
 0x197   : > { %v6360_v19 = vcombine.low %v5229_v43, %v5232_v52  ;;  %v3107_v15 = vor.u32 %v3106_v14, %v3103_v12  ;;  %v3162_v26 = vshrl.u32 %v7324_v16, 16  ;;  %v3122_v5 = vrot.slane %v3120_v31, 5  ;;  %v7327_v31 = vld [vmem:[#allocation2 + $0xa0] sm:$0xf] }
 0x198   : > { %v9135_v63 = vsel %vm7854_vm15, %v5307_v57, %v5308_v41  ;;  %v9153_v28 = vsel %vm7854_vm15, %v5314_v55, %v5315_v32  ;;  %v3158_v57 = vshll.u32 %v7324_v16, 16  ;;  %v7273_v32 = vld [vmem:[#allocation2 + $0xb4] sm:$0xff]   ;;  %v3173_v52 = vshrl.u32 %v2893_v23, 16 }
 0x199   : > { %v6371_v51 = vcombine.low %v9129_v36, %v9135_v63  ;;  %v6372_v41 = vcombine.low %v9143_v38, %v9153_v28  ;;  %v3164_v14 = vrot.slane %v3162_v26, 4 }
 0x19a   : > { %6919 = vmatmul.mubr.msk.bf16.vlgmr.msra.gmra.mrb[0].mxu0 %vm1539_vm8, %v6358_v44  ;;  %v7271_v44 = vld [vmem:[#allocation2 + $0x9c] sm:$0xff]   ;;  %v9164_v12 = vrot.slane %v3158_v57, 5  ;;  %v3175_v57 = vrot.slane %v3173_v52, 4  ;;  %v2899_v52 = vld [vmem:[#allocation2 + $0xa8] sm:$0xf] }
 0x19b   : > { %6765 = vmatmul.mubr.msk.bf16.gmra.mrb[16].mxu1 %vm1539_vm8, %v7268_v50  ;;  %6922 = vmatprep.mubr.msk.bf16.mxu0 %vm1539_vm8, %v6359_v1  ;;  %v3112_v50 = vrot.slane %v3110_v61, 5  ;;  %v3108_v1 = vrot.slane %v3107_v15, 4 }
 0x19c   : > { %6768 = vmatprep.mubr.msk.bf16.mxu1 %vm1539_vm8, %v7269_v46  ;;  %v2890_v46 = vld [vmem:[#allocation2 + $0x84] sm:$0xf] }
 0x19d   : > { %v3117_v48 = vor.u32 %v3116_v59, %v3112_v50  ;;  %v3149_v18 = vshrl.u32 %v2890_v46, 16  ;;  %v3152_v0 = vshll.u32 %v2890_v46, 16  ;;  %v3176_v59 = vshll.u32 %v2893_v23, 16  ;;  %v7326_v46 = vld [vmem:[#allocation2 + $0x94] sm:$0xf] }
 0x19e   : > { %v3186_v15 = vshrl.u32 %v7326_v46, 16 }
 0x19f   : > { %v3118_v61 = vrot.slane %v3117_v48, 4  ;;  %v3151_v55 = vrot.slane %v3149_v18, 4  ;;  %v3154_v43 = vrot.slane %v3152_v0, 5  ;;  %v3206_v18 = vshll.u32 %v7327_v31, 16 }
 0x1a0   : > { %v3210_v0 = vshrl.u32 %v7327_v31, 16  ;;  %v3178_v26 = vrot.slane %v3176_v59, 5  ;;  %v7328_v59 = vld [vmem:[#allocation2 + $0x98] sm:$0x1] }
 0x1a1   : > { %v3123_v33 = vsel %vm7537_vm9, %v3118_v61, %v3122_v5  ;;  %v3155_v16 = vor.u32 %v3154_v43, %v3151_v55  ;;  %v9183_v43 = vrot.slane %v3206_v18, 5 }
 0x1a2   : > { %6923 = vmatmul.mubr.msk.bf16.gmra.mrb[4].mxu0 %vm1539_vm8, %v6360_v19  ;;  %v3182_v19 = vshll.u32 %v7326_v46, 16 }
 0x1a3   : > { %6769 = vmatmul.mubr.msk.bf16.gmra.mrb[20].mxu1 %vm1539_vm8, %v7270_v60  ;;  %6926 = vmatprep.mubr.msk.bf16.mxu0 %vm1539_vm8, %v6361_v53  ;;  %v2896_v60 = vld [vmem:[#allocation2 + $0x9c] sm:$0xf]  ;;  %v3168_v53 = vshll.u32 %v7325_v29, 16  ;;  %v3156_v62 = vrot.slane %v3155_v16, 4  ;;  %v2902_v29 = vld [vmem:[#allocation2 + $0xb4] sm:$0xf] }
 0x1a4   : > { %6772 = vmatprep.mubr.msk.bf16.mxu1 %vm1539_vm8, %v7271_v44  ;;  %v3113_v44 = vsel %vm7537_vm9, %v3108_v1, %v3112_v50  ;;  %v3197_v48 = vshrl.u32 %v2896_v60, 16  ;;  %v3200_v4 = vshll.u32 %v2896_v60, 16  ;;  %v3165_v50 = vor.u32 %v3164_v14, %v9164_v12  ;;  %v7274_v1 = vld [vmem:[#allocation2 + $0xc0] sm:$0xff]  }
 0x1a5   : > { %v6201_v23 = vcombine.low %v3113_v44, %v3123_v33  ;;  %v3170_v61 = vrot.slane %v3168_v53, 5  ;;  %v9181_v5 = vrot.slane %v3182_v19, 5  ;;  %v3212_v14 = vrot.slane %v3210_v0, 4  ;;  %v7330_v19 = vld [vmem:[#allocation2 + $0xac] sm:$0xf] }
 0x1a6   : > { %v3202_v55 = vrot.slane %v3200_v4, 5  ;;  %v3166_v10 = vrot.slane %v3165_v50, 4  ;;  %v3192_v60 = vshll.u32 %v7328_v59, 16  ;;  %v3221_v44 = vshrl.u32 %v2899_v52, 16 }
 0x1a7   : > { %v3224_v33 = vshll.u32 %v2899_v52, 16  ;;  %v3213_v46 = vor.u32 %v3212_v14, %v9183_v43  ;;  %v3161_v4 = vsel %vm7537_vm9, %v3156_v62, %v9164_v12  ;;  %v3245_v16 = vshrl.u32 %v2902_v29, 16 }
 0x1a8   : > { %v3171_v31 = vsel %vm7537_vm9, %v3166_v10, %v3170_v61  ;;  %v3194_v0 = vrot.slane %v3192_v60, 5  ;;  %v3248_v50 = vshll.u32 %v2902_v29, 16  ;;  %v3223_v61 = vrot.slane %v3221_v44, 4 }
 0x1a9   : > { %v6203_v49 = vcombine.low %v3161_v4, %v3171_v31 }
 0x1aa   : > { %6927 = vmatmul.mubr.msk.bf16.gmra.mrb[8].mxu0 %vm1539_vm8, %v6362_v34  ;;  %v3179_v34 = vor.u32 %v3178_v26, %v3175_v57  ;;  %v7331_v57 = vld [vmem:[#allocation2 + $0xb8] sm:$0xf]  ;;  %v3250_v52 = vrot.slane %v3248_v50, 5 }
 0x1ab   : > { %6773 = vmatmul.mubr.msk.bf16.gmra.mrb[24].mxu1 %vm1539_vm8, %v7272_v11  ;;  %6930 = vmatprep.mubr.msk.bf16.mxu0 %vm1539_vm8, %v6363_v13  ;;  %v3188_v11 = vrot.slane %v3186_v15, 4  ;;  %v3216_v13 = vshll.u32 %v7329_v24, 16  ;;  %v3230_v15 = vshll.u32 %v7330_v19, 16  ;;  %v3254_v26 = vshll.u32 %v7331_v57, 16 }
 0x1ac   : > { %6776 = vmatprep.mubr.msk.bf16.mxu1 %vm1539_vm8, %v7273_v32  ;;  %v3199_v32 = vrot.slane %v3197_v48, 4  ;;  %v3234_v48 = vshrl.u32 %v7330_v19, 16  ;;  %v3180_v18 = vrot.slane %v3179_v34, 4  ;;  %v2905_v34 = vld [vmem:[#allocation2 + $0xc0] sm:$0xf] }
 0x1ad   : > { %v3189_v37 = vor.u32 %v3188_v11, %v9181_v5  ;;  %v3226_v11 = vrot.slane %v3224_v33, 5  ;;  %v3232_v14 = vrot.slane %v3230_v15, 5  ;;  %v3256_v62 = vrot.slane %v3254_v26, 5  ;;  %v7333_v33 = vld [vmem:[#allocation2 + $0xc4] sm:$0xf] }
 0x1ae   : > { %v3203_v53 = vor.u32 %v3202_v55, %v3199_v32  ;;  %v3214_v55 = vrot.slane %v3213_v46, 4  ;;  %v3236_v39 = vrot.slane %v3234_v48, 4  ;;  %v3185_v6 = vsel %vm7537_vm9, %v3180_v18, %v9181_v5 }
 0x1af   : > { %v3190_v12 = vrot.slane %v3189_v37, 4  ;;  %v3227_v24 = vor.u32 %v3226_v11, %v3223_v61  ;;  %v3269_v5 = vshrl.u32 %v2905_v34, 16  ;;  %v3272_v44 = vshll.u32 %v2905_v34, 16 }
 0x1b0   : > { %v3204_v32 = vrot.slane %v3203_v53, 4  ;;  %v3278_v29 = vshll.u32 %v7333_v33, 16  ;;  %v3282_v53 = vshrl.u32 %v7333_v33, 16 }
 0x1b1   : > { %v3195_v8 = vsel %vm7537_vm9, %v3190_v12, %v3194_v0  ;;  %v3228_v4 = vrot.slane %v3227_v24, 4  ;;  %v3271_v0 = vrot.slane %v3269_v5, 4 }
 0x1b2   : > { %6931 = vmatmul.mubr.msk.bf16.gmra.mrb[12].mxu0 %vm1539_vm8, %v6364_v20  ;;  %v3247_v20 = vrot.slane %v3245_v16, 4  ;;  %v3209_v60 = vsel %vm7537_vm9, %v3204_v32, %v9183_v43  ;;  %v7334_v43 = vld [vmem:[#allocation2 + $0xbc] sm:$0x1]  ;;  %v6204_v15 = vcombine.low %v3185_v6, %v3195_v8  ;;  %v3274_v16 = vrot.slane %v3272_v44, 5  ;;  %v9282_v8 = vld [vmem:[%s9439_s5] ss:$0 sm:$0xff] }
 0x1b3   : > { %6777 = vmatmul.mubr.msk.bf16.gmra.mrb[28].mxu1 %vm1539_vm8, %v7274_v1  ;;  %v3258_v1 = vshrl.u32 %v7331_v57, 16  ;;  %6934 = vmatprep.mubr.msk.bf16.mxu0 %vm1539_vm8, %v6365_v40  ;;  %v7332_v40 = vld [vmem:[#allocation2 + $0xb0] sm:$0x1]  ;;  %v3264_v19 = vshll.u32 %v7334_v43, 16  ;;  %v3280_v50 = vrot.slane %v3278_v29, 5  ;;  %v3284_v2 = vrot.slane %v3282_v53, 4 }
 0x1b4   : > { %6798 = vmatprep.mubr.msk.bf16.mxu1 %vm1539_vm8, %v6201_v23  ;;  %v3218_v23 = vrot.slane %v3216_v13, 5  ;;  %v3240_v59 = vshll.u32 %v7332_v40, 16  ;;  %v3237_v13 = vor.u32 %v3236_v39, %v3232_v14  ;;  %v3233_v26 = vsel %vm7537_vm9, %v3228_v4, %v3232_v14 }
 0x1b5   : > { %v3260_v10 = vrot.slane %v3258_v1, 4  ;;  %v3266_v57 = vrot.slane %v3264_v19, 5  ;;  %v3275_v27 = vor.u32 %v3274_v16, %v3271_v0  ;;  %v7335_v1 = vld [vmem:[#allocation2 + $0xc8] sm:$0x1] }
 0x1b6   : > { %v3219_v37 = vsel %vm7537_vm9, %v3214_v55, %v3218_v23  ;;  %v3238_v31 = vrot.slane %v3237_v13, 4  ;;  %v3242_v18 = vrot.slane %v3240_v59, 5  ;;  %v3288_v12 = vshll.u32 %v7335_v1, 16 }
 0x1b7   : > { %v3261_v46 = vor.u32 %v3260_v10, %v3256_v62  ;;  %v6205_v48 = vcombine.low %v3209_v60, %v3219_v37  ;;  %v3276_v55 = vrot.slane %v3275_v27, 4  ;;  %v9277_v10 = vld [vmem:[%s9438_s4] ss:$0 sm:$0xff] }
 0x1b8   : > { %v3243_v3 = vsel %vm7537_vm9, %v3238_v31, %v3242_v18  ;;  %v3290_v39 = vrot.slane %v3288_v12, 5 }
 0x1b9   : > { %v6206_v11 = vcombine.low %v3233_v26, %v3243_v3  ;;  %v3281_v54 = vsel %vm7537_vm9, %v3276_v55, %v3280_v50 }
 0x1ba   : > { %6935 = vmatmul.mubr.msk.bf16.gmra.mrb[16].mxu0 %vm1539_vm8, %v6366_v22  ;;  %v3262_v22 = vrot.slane %v3261_v46, 4 }
 0x1bb   : > { %6799 = vmatmul.mubr.msk.bf16.vlgmr.msra.gmra.mrb[16].mxu1 %vm1539_vm8, %v9006_v58  ;;  %v3251_v58 = vor.u32 %v3250_v52, %v3247_v20  ;;  %6938 = vmatprep.mubr.msk.bf16.mxu0 %vm1539_vm8, %v6367_v30  ;;  %v3285_v30 = vor.u32 %v3284_v2, %v3280_v50 }
 0x1bc   : > { %6802 = vmatprep.mubr.msk.bf16.mxu1 %vm1539_vm8, %v6203_v49  ;;  %v3267_v61 = vsel %vm7537_vm9, %v3262_v22, %v3266_v57 }
 0x1bd   : > { %v3252_v45 = vrot.slane %v3251_v58, 4  ;;  %v3286_v14 = vrot.slane %v3285_v30, 4 }
 0x1bf   : > { %v3257_v23 = vsel %vm7537_vm9, %v3252_v45, %v3256_v62  ;;  %v3291_v7 = vsel %vm7537_vm9, %v3286_v14, %v3290_v39 }
 0x1c0   : > { %v6207_v32 = vcombine.low %v3257_v23, %v3267_v61 }
 0x1c2   : > { %6939 = vmatmul.mubr.msk.bf16.gmra.mrb[20].mxu0 %vm1539_vm8, %v6368_v17  ;;  %v6208_v17 = vcombine.low %v3281_v54, %v3291_v7 }
 0x1c3   : > { %6803 = vmatmul.mubr.msk.bf16.gmra.mrb[20].mxu1 %vm1539_vm8, %v6204_v15  ;;  %6942 = vmatprep.mubr.msk.bf16.mxu0 %vm1539_vm8, %v6369_v56 }
 0x1c4   : > { %6806 = vmatprep.mubr.msk.bf16.mxu1 %vm1539_vm8, %v6205_v48 }
 0x1ca   : > { %6943 = vmatmul.mubr.msk.bf16.gmra.mrb[24].mxu0 %vm1539_vm8, %v6370_v9 }
 0x1cb   : > { %6807 = vmatmul.mubr.msk.bf16.gmra.mrb[24].mxu1 %vm1539_vm8, %v6206_v11  ;;  %6946 = vmatprep.mubr.msk.bf16.mxu0 %vm1539_vm8, %v6371_v51 }
 0x1cc   : > { %6810 = vmatprep.mubr.msk.bf16.mxu1 %vm1539_vm8, %v6207_v32 }
 0x1d2   : > { %6947 = vmatmul.mubr.msk.bf16.gmra.mrb[28].mxu0 %vm1539_vm8, %v6372_v41 }
 0x1d3   : > { %6811 = vmatmul.mubr.msk.bf16.gmra.mrb[28].mxu1 %vm1539_vm8, %v6208_v17 }
 0x24e   : > { %v6750_v42 = vpop.f32.mrb[0].mxu1 }
 0x24f   : > { %v2701_v47 = vpop.f32.mrb[1].mxu1 }
 0x250   : > { %v6751_v21 = vpop.f32.mrb[2].mxu1 }
 0x251   : > { %v2704_v56 = vpop.f32.mrb[3].mxu1 }
 0x256   : > { %v6754_v35 = vpop.f32.mrb[4].mxu1 }
 0x257   : > { %v2717_v25 = vpop.f32.mrb[5].mxu1 }
 0x258   : > { %v6755_v9 = vpop.f32.mrb[6].mxu1 }
 0x259   : > { %v2720_v49 = vpop.f32.mrb[7].mxu1 }
 0x25e   : > { %v6758_v20 = vpop.f32.mrb[8].mxu1 }
 0x25f   : > { %v9260_v36 = vpop.f32.mrb[9].mxu1 }
 0x260   : > { %v9262_v63 = vpop.f32.mrb[10].mxu1 }
 0x261   : > { %v9264_v51 = vpop.f32.mrb[11].mxu1 }
 0x266   : > { %v9266_v52 = vpop.f32.mrb[12].mxu1 }
 0x267   : > { %v9268_v38 = vpop.f32.mrb[13].mxu1 }
 0x268   : > { %v9270_v28 = vpop.f32.mrb[14].mxu1 }
 0x269   : > { %v9272_v41 = vpop.f32.mrb[15].mxu1 }
 0x26d   : > { %v6920_v62 = vpop.f32.mrb[0].mxu0 }
 0x26e   : > { %v6952_v34 = vadd.f32 %v6920_v62, %v6750_v42  ;;  %v5452_v6 = vpop.f32.mrb[1].mxu0 }
 0x26f   : > { %v6953_v40 = vadd.f32 %v5452_v6, %v2701_v47  ;;  %v6921_v59 = vpop.f32.mrb[2].mxu0 }
 0x270   : > { %v5620_v60 = vmul.f32 %v6952_v34, %v9277_v10  ;;  %v6954_v37 = vadd.f32 %v6921_v59, %v6751_v21  ;;  %v5455_v24 = vpop.f32.mrb[3].mxu0 }
 0x271   : > { %v5618_v13 = vmul.f32 %v6953_v40, %v9277_v10  ;;  %v6955_v5 = vadd.f32 %v5455_v24, %v2704_v56 }
 0x272   : > { %v5659_v44 = vadd.f32 %v9282_v8, %v5620_v60  ;;  %v5621_v33 = vmul.f32 %v6954_v37, %v9277_v10 }
 0x273   : > { %v5657_v29 = vadd.f32 %v9282_v8, %v5618_v13  ;;  %v5619_v53 = vmul.f32 %v6955_v5, %v9277_v10 }
 0x274   : > { %v5691_v58 = vmax.f32 %v5659_v44, 0.0  ;;  %v5660_v46 = vadd.f32 %v9282_v8, %v5621_v33 }
 0x275   : > { %v5689_v43 = vmax.f32 %v5657_v29, 0.0  ;;  %v5658_v19 = vadd.f32 %v9282_v8, %v5619_v53  ;;  %v6924_v15 = vpop.f32.mrb[4].mxu0 }
 0x276   : > { %v6461_v48 = vpack.c.bf16 %v5691_v58, %v5691_v58  ;;  %v5692_v4 = vmax.f32 %v5660_v46, 0.0  ;;  %v6956_v31 = vadd.f32 %v6924_v15, %v6754_v35  ;;  %v5468_v18 = vpop.f32.mrb[5].mxu0 }
 0x277   : > { %v6459_v0 = vpack.c.bf16 %v5689_v43, %v5689_v43  ;;  %v5690_v16 = vmax.f32 %v5658_v19, 0.0  ;;  %v6957_v50 = vadd.f32 %v5468_v18, %v2717_v25  ;;  %v6925_v2 = vpop.f32.mrb[6].mxu0 }
 0x278   : > { %5852 = vst.msk [vmem:[%s9295_s30 + $0x8] sm:$0xf] %vm5849_vm0, %v6461_v48  ;;  %v6462_v45 = vpack.c.bf16 %v5692_v4, %v5692_v4  ;;  %v5624_v22 = vmul.f32 %v6956_v31, %v9277_v10  ;;  %v6958_v57 = vadd.f32 %v6925_v2, %v6755_v9  ;;  %v5471_v26 = vpop.f32.mrb[7].mxu0 }
 0x279   : > { %5850 = vst.msk [vmem:[%s9295_s30] sm:$0xf] %vm5849_vm0, %v6459_v0  ;;  %v6460_v3 = vpack.c.bf16 %v5690_v16, %v5690_v16  ;;  %v5622_v27 = vmul.f32 %v6957_v50, %v9277_v10  ;;  %v6959_v30 = vadd.f32 %v5471_v26, %v2720_v49 }
 0x27a   : > { %5853 = vst.msk [vmem:[%s9295_s30 + $0xc] sm:$0xf] %vm5849_vm0, %v6462_v45  ;;  %v5663_v1 = vadd.f32 %v9282_v8, %v5624_v22  ;;  %v5625_v12 = vmul.f32 %v6958_v57, %v9277_v10 }
 0x27b   : > { %5851 = vst.msk [vmem:[%s9295_s30 + $0x4] sm:$0xf] %vm5849_vm0, %v6460_v3  ;;  %v5661_v23 = vadd.f32 %v9282_v8, %v5622_v27  ;;  %v5623_v61 = vmul.f32 %v6959_v30, %v9277_v10 }
 0x27c   : > { %v5695_v11 = vmax.f32 %v5663_v1, 0.0  ;;  %v5664_v32 = vadd.f32 %v9282_v8, %v5625_v12 }
 0x27d   : > { %v5693_v55 = vmax.f32 %v5661_v23, 0.0  ;;  %v5662_v14 = vadd.f32 %v9282_v8, %v5623_v61  ;;  %v6928_v39 = vpop.f32.mrb[8].mxu0 }
 0x27e   : > { %v6465_v54 = vpack.c.bf16 %v5695_v11, %v5695_v11  ;;  %v5696_v7 = vmax.f32 %v5664_v32, 0.0  ;;  %v6960_v17 = vadd.f32 %v6928_v39, %v6758_v20  ;;  %v5484_v42 = vpop.f32.mrb[9].mxu0 }
 0x27f   : > { %v6463_v47 = vpack.c.bf16 %v5693_v55, %v5693_v55  ;;  %v5694_v21 = vmax.f32 %v5662_v14, 0.0  ;;  %v6961_v56 = vadd.f32 %v5484_v42, %v9260_v36  ;;  %v6929_v35 = vpop.f32.mrb[10].mxu0 }
 0x280   : > { %5856 = vst.msk [vmem:[%s9295_s30 + $0x18] sm:$0xf] %vm5849_vm0, %v6465_v54  ;;  %v6466_v25 = vpack.c.bf16 %v5696_v7, %v5696_v7  ;;  %v5628_v9 = vmul.f32 %v6960_v17, %v9277_v10  ;;  %v6962_v49 = vadd.f32 %v6929_v35, %v9262_v63  ;;  %v5487_v62 = vpop.f32.mrb[11].mxu0 }
 0x281   : > { %5854 = vst.msk [vmem:[%s9295_s30 + $0x10] sm:$0xf] %vm5849_vm0, %v6463_v47  ;;  %v6464_v34 = vpack.c.bf16 %v5694_v21, %v5694_v21  ;;  %v5626_v20 = vmul.f32 %v6961_v56, %v9277_v10  ;;  %v6963_v6 = vadd.f32 %v5487_v62, %v9264_v51 }
 0x282   : > { %5857 = vst.msk [vmem:[%s9295_s30 + $0x1c] sm:$0xf] %vm5849_vm0, %v6466_v25  ;;  %v5667_v36 = vadd.f32 %v9282_v8, %v5628_v9  ;;  %v5629_v40 = vmul.f32 %v6962_v49, %v9277_v10 }
 0x283   : > { %5855 = vst.msk [vmem:[%s9295_s30 + $0x14] sm:$0xf] %vm5849_vm0, %v6464_v34  ;;  %v5665_v59 = vadd.f32 %v9282_v8, %v5626_v20  ;;  %v5627_v63 = vmul.f32 %v6963_v6, %v9277_v10 }
 0x284   : > { %v5699_v60 = vmax.f32 %v5667_v36, 0.0  ;;  %v5668_v37 = vadd.f32 %v9282_v8, %v5629_v40 }
 0x285   : > { %v5697_v24 = vmax.f32 %v5665_v59, 0.0  ;;  %v5666_v51 = vadd.f32 %v9282_v8, %v5627_v63  ;;  %v6932_v13 = vpop.f32.mrb[12].mxu0 }
 0x286   : > { %v6469_v5 = vpack.c.bf16 %v5699_v60, %v5699_v60  ;;  %v5700_v44 = vmax.f32 %v5668_v37, 0.0  ;;  %v6964_v33 = vadd.f32 %v6932_v13, %v9266_v52  ;;  %v5500_v29 = vpop.f32.mrb[13].mxu0 }
 0x287   : > { %v6467_v53 = vpack.c.bf16 %v5697_v24, %v5697_v24  ;;  %v5698_v58 = vmax.f32 %v5666_v51, 0.0  ;;  %v6965_v46 = vadd.f32 %v5500_v29, %v9268_v38  ;;  %v6933_v43 = vpop.f32.mrb[14].mxu0 }
 0x288   : > { %5860 = vst.msk [vmem:[%s9295_s30 + $0x28] sm:$0xf] %vm5849_vm0, %v6469_v5  ;;  %v6470_v19 = vpack.c.bf16 %v5700_v44, %v5700_v44  ;;  %v5632_v15 = vmul.f32 %v6964_v33, %v9277_v10  ;;  %v6966_v48 = vadd.f32 %v6933_v43, %v9270_v28  ;;  %v5503_v4 = vpop.f32.mrb[15].mxu0 }
 0x289   : > { %5858 = vst.msk [vmem:[%s9295_s30 + $0x20] sm:$0xf] %vm5849_vm0, %v6467_v53  ;;  %v6468_v31 = vpack.c.bf16 %v5698_v58, %v5698_v58  ;;  %v5630_v52 = vmul.f32 %v6965_v46, %v9277_v10  ;;  %v6967_v18 = vadd.f32 %v5503_v4, %v9272_v41 }
 0x28a   : > { %5861 = vst.msk [vmem:[%s9295_s30 + $0x2c] sm:$0xf] %vm5849_vm0, %v6470_v19  ;;  %v5671_v38 = vadd.f32 %v9282_v8, %v5632_v15  ;;  %v5633_v0 = vmul.f32 %v6966_v48, %v9277_v10 }
 0x28b   : > { %5859 = vst.msk [vmem:[%s9295_s30 + $0x24] sm:$0xf] %vm5849_vm0, %v6468_v31  ;;  %v5669_v16 = vadd.f32 %v9282_v8, %v5630_v52  ;;  %v5631_v28 = vmul.f32 %v6967_v18, %v9277_v10 }
 0x28c   : > { %v5703_v2 = vmax.f32 %v5671_v38, 0.0  ;;  %v5672_v45 = vadd.f32 %v9282_v8, %v5633_v0 }
 0x28d   : > { %v5701_v57 = vmax.f32 %v5669_v16, 0.0  ;;  %v5670_v41 = vadd.f32 %v9282_v8, %v5631_v28  ;;  %v6936_v26 = vpop.f32.mrb[16].mxu0 }
 0x28e   : > { %v6800_v50 = vpop.f32.mrb[16].mxu1  ;;  %v6473_v27 = vpack.c.bf16 %v5703_v2, %v5703_v2  ;;  %v5704_v30 = vmax.f32 %v5672_v45, 0.0  ;;  %v5516_v12 = vpop.f32.mrb[17].mxu0 }
 0x28f   : > { %v3491_v22 = vpop.f32.mrb[17].mxu1  ;;  %v6968_v1 = vadd.f32 %v6936_v26, %v6800_v50  ;;  %v6471_v61 = vpack.c.bf16 %v5701_v57, %v5701_v57  ;;  %v5702_v11 = vmax.f32 %v5670_v41, 0.0  ;;  %v6937_v55 = vpop.f32.mrb[18].mxu0 }
 0x290   : > { %v6801_v3 = vpop.f32.mrb[18].mxu1  ;;  %v6969_v32 = vadd.f32 %v5516_v12, %v3491_v22  ;;  %5864 = vst.msk [vmem:[%s9295_s30 + $0x38] sm:$0xf] %vm5849_vm0, %v6473_v27  ;;  %v6474_v14 = vpack.c.bf16 %v5704_v30, %v5704_v30  ;;  %v5519_v7 = vpop.f32.mrb[19].mxu0 }
 0x291   : > { %v3494_v23 = vpop.f32.mrb[19].mxu1  ;;  %v5636_v39 = vmul.f32 %v6968_v1, %v9277_v10  ;;  %v6970_v54 = vadd.f32 %v6937_v55, %v6801_v3  ;;  %5862 = vst.msk [vmem:[%s9295_s30 + $0x30] sm:$0xf] %vm5849_vm0, %v6471_v61  ;;  %v6472_v17 = vpack.c.bf16 %v5702_v11, %v5702_v11 }
 0x292   : > { %v5634_v42 = vmul.f32 %v6969_v32, %v9277_v10  ;;  %v6971_v47 = vadd.f32 %v5519_v7, %v3494_v23  ;;  %5865 = vst.msk [vmem:[%s9295_s30 + $0x3c] sm:$0xf] %vm5849_vm0, %v6474_v14 }
 0x293   : > { %v5675_v21 = vadd.f32 %v9282_v8, %v5636_v39  ;;  %v5637_v56 = vmul.f32 %v6970_v54, %v9277_v10  ;;  %5863 = vst.msk [vmem:[%s9295_s30 + $0x34] sm:$0xf] %vm5849_vm0, %v6472_v17 }
 0x294   : > { %v5673_v35 = vadd.f32 %v9282_v8, %v5634_v42  ;;  %v5635_v25 = vmul.f32 %v6971_v47, %v9277_v10 }
 0x295   : > { %v5707_v49 = vmax.f32 %v5675_v21, 0.0  ;;  %v5676_v62 = vadd.f32 %v9282_v8, %v5637_v56  ;;  %v6940_v36 = vpop.f32.mrb[20].mxu0 }
 0x296   : > { %v6804_v9 = vpop.f32.mrb[20].mxu1  ;;  %v5705_v20 = vmax.f32 %v5673_v35, 0.0  ;;  %v5674_v6 = vadd.f32 %v9282_v8, %v5635_v25  ;;  %v5532_v37 = vpop.f32.mrb[21].mxu0 }
 0x297   : > { %v3507_v34 = vpop.f32.mrb[21].mxu1  ;;  %v6477_v59 = vpack.c.bf16 %v5707_v49, %v5707_v49  ;;  %v5708_v63 = vmax.f32 %v5676_v62, 0.0  ;;  %v6972_v60 = vadd.f32 %v6940_v36, %v6804_v9  ;;  %v6941_v44 = vpop.f32.mrb[22].mxu0 }
 0x298   : > { %v6805_v40 = vpop.f32.mrb[22].mxu1  ;;  %v6475_v51 = vpack.c.bf16 %v5705_v20, %v5705_v20  ;;  %v5706_v13 = vmax.f32 %v5674_v6, 0.0  ;;  %v6973_v5 = vadd.f32 %v5532_v37, %v3507_v34  ;;  %v5535_v58 = vpop.f32.mrb[23].mxu0 }
 0x299   : > { %v3510_v24 = vpop.f32.mrb[23].mxu1  ;;  %5868 = vst.msk [vmem:[%s9295_s30 + $0x48] sm:$0xf] %vm5849_vm0, %v6477_v59  ;;  %v6478_v33 = vpack.c.bf16 %v5708_v63, %v5708_v63  ;;  %v5640_v29 = vmul.f32 %v6972_v60, %v9277_v10  ;;  %v6974_v53 = vadd.f32 %v6941_v44, %v6805_v40 }
 0x29a   : > { %5866 = vst.msk [vmem:[%s9295_s30 + $0x40] sm:$0xf] %vm5849_vm0, %v6475_v51  ;;  %v6476_v46 = vpack.c.bf16 %v5706_v13, %v5706_v13  ;;  %v5638_v43 = vmul.f32 %v6973_v5, %v9277_v10  ;;  %v6975_v19 = vadd.f32 %v5535_v58, %v3510_v24 }
 0x29b   : > { %5869 = vst.msk [vmem:[%s9295_s30 + $0x4c] sm:$0xf] %vm5849_vm0, %v6478_v33  ;;  %v5679_v15 = vadd.f32 %v9282_v8, %v5640_v29  ;;  %v5641_v48 = vmul.f32 %v6974_v53, %v9277_v10 }
 0x29c   : > { %5867 = vst.msk [vmem:[%s9295_s30 + $0x44] sm:$0xf] %vm5849_vm0, %v6476_v46  ;;  %v5677_v4 = vadd.f32 %v9282_v8, %v5638_v43  ;;  %v5639_v31 = vmul.f32 %v6975_v19, %v9277_v10 }
 0x29d   : > { %v5711_v18 = vmax.f32 %v5679_v15, 0.0  ;;  %v5680_v38 = vadd.f32 %v9282_v8, %v5641_v48  ;;  %v6944_v50 = vpop.f32.mrb[24].mxu0 }
 0x29e   : > { %v6808_v52 = vpop.f32.mrb[24].mxu1  ;;  %v5709_v16 = vmax.f32 %v5677_v4, 0.0  ;;  %v5678_v28 = vadd.f32 %v9282_v8, %v5639_v31  ;;  %v5548_v41 = vpop.f32.mrb[25].mxu0 }
 0x29f   : > { %v3523_v0 = vpop.f32.mrb[25].mxu1  ;;  %v6481_v45 = vpack.c.bf16 %v5711_v18, %v5711_v18  ;;  %v5712_v22 = vmax.f32 %v5680_v38, 0.0  ;;  %v6976_v57 = vadd.f32 %v6944_v50, %v6808_v52  ;;  %v6945_v1 = vpop.f32.mrb[26].mxu0 }
 0x2a0   : > { %v6809_v2 = vpop.f32.mrb[26].mxu1  ;;  %v6479_v3 = vpack.c.bf16 %v5709_v16, %v5709_v16  ;;  %v5710_v27 = vmax.f32 %v5678_v28, 0.0  ;;  %v6977_v30 = vadd.f32 %v5548_v41, %v3523_v0  ;;  %v5551_v11 = vpop.f32.mrb[27].mxu0 }
 0x2a1   : > { %v3526_v26 = vpop.f32.mrb[27].mxu1  ;;  %5872 = vst.msk [vmem:[%s9295_s30 + $0x58] sm:$0xf] %vm5849_vm0, %v6481_v45  ;;  %v6482_v12 = vpack.c.bf16 %v5712_v22, %v5712_v22  ;;  %v5644_v23 = vmul.f32 %v6976_v57, %v9277_v10  ;;  %v6978_v61 = vadd.f32 %v6945_v1, %v6809_v2 }
 0x2a2   : > { %5870 = vst.msk [vmem:[%s9295_s30 + $0x50] sm:$0xf] %vm5849_vm0, %v6479_v3  ;;  %v6480_v32 = vpack.c.bf16 %v5710_v27, %v5710_v27  ;;  %v5642_v55 = vmul.f32 %v6977_v30, %v9277_v10  ;;  %v6979_v14 = vadd.f32 %v5551_v11, %v3526_v26 }
 0x2a3   : > { %5873 = vst.msk [vmem:[%s9295_s30 + $0x5c] sm:$0xf] %vm5849_vm0, %v6482_v12  ;;  %v5683_v39 = vadd.f32 %v9282_v8, %v5644_v23  ;;  %v5645_v54 = vmul.f32 %v6978_v61, %v9277_v10 }
 0x2a4   : > { %5871 = vst.msk [vmem:[%s9295_s30 + $0x54] sm:$0xf] %vm5849_vm0, %v6480_v32  ;;  %v5681_v7 = vadd.f32 %v9282_v8, %v5642_v55  ;;  %v5643_v17 = vmul.f32 %v6979_v14, %v9277_v10 }
 0x2a5   : > { %v5715_v47 = vmax.f32 %v5683_v39, 0.0  ;;  %v5684_v21 = vadd.f32 %v9282_v8, %v5645_v54  ;;  %v6948_v9 = vpop.f32.mrb[28].mxu0 }
 0x2a6   : > { %v6812_v42 = vpop.f32.mrb[28].mxu1  ;;  %v5713_v35 = vmax.f32 %v5681_v7, 0.0  ;;  %v5682_v25 = vadd.f32 %v9282_v8, %v5643_v17  ;;  %v5564_v6 = vpop.f32.mrb[29].mxu0 }
 0x2a7   : > { %v3539_v56 = vpop.f32.mrb[29].mxu1  ;;  %v6485_v62 = vpack.c.bf16 %v5715_v47, %v5715_v47  ;;  %v5716_v34 = vmax.f32 %v5684_v21, 0.0  ;;  %v6980_v20 = vadd.f32 %v6948_v9, %v6812_v42  ;;  %v6949_v60 = vpop.f32.mrb[30].mxu0 }
 0x2a8   : > { %v6813_v49 = vpop.f32.mrb[30].mxu1  ;;  %v6483_v40 = vpack.c.bf16 %v5713_v35, %v5713_v35  ;;  %v5714_v59 = vmax.f32 %v5682_v25, 0.0  ;;  %v6981_v63 = vadd.f32 %v5564_v6, %v3539_v56  ;;  %v5567_v13 = vpop.f32.mrb[31].mxu0 }
 0x2a9   : > { %v3542_v36 = vpop.f32.mrb[31].mxu1  ;;  %5876 = vst.msk [vmem:[%s9295_s30 + $0x68] sm:$0xf] %vm5849_vm0, %v6485_v62  ;;  %v6486_v37 = vpack.c.bf16 %v5716_v34, %v5716_v34  ;;  %v5648_v24 = vmul.f32 %v6980_v20, %v9277_v10  ;;  %v6982_v51 = vadd.f32 %v6949_v60, %v6813_v49 }
 0x2aa   : > { %5874 = vst.msk [vmem:[%s9295_s30 + $0x60] sm:$0xf] %vm5849_vm0, %v6483_v40  ;;  %v6484_v5 = vpack.c.bf16 %v5714_v59, %v5714_v59  ;;  %v5646_v44 = vmul.f32 %v6981_v63, %v9277_v10  ;;  %v6983_v33 = vadd.f32 %v5567_v13, %v3542_v36 }
 0x2ab   : > { %5877 = vst.msk [vmem:[%s9295_s30 + $0x6c] sm:$0xf] %vm5849_vm0, %v6486_v37  ;;  %v5687_v29 = vadd.f32 %v9282_v8, %v5648_v24  ;;  %v5649_v53 = vmul.f32 %v6982_v51, %v9277_v10 }
 0x2ac   : > { %5875 = vst.msk [vmem:[%s9295_s30 + $0x64] sm:$0xf] %vm5849_vm0, %v6484_v5  ;;  %v5685_v58 = vadd.f32 %v9282_v8, %v5646_v44  ;;  %v5647_v46 = vmul.f32 %v6983_v33, %v9277_v10 }
 0x2ad   : > { %v5719_v43 = vmax.f32 %v5687_v29, 0.0  ;;  %v5688_v19 = vadd.f32 %v9282_v8, %v5649_v53 }
 0x2ae   : > { %v5717_v15 = vmax.f32 %v5685_v58, 0.0  ;;  %v5686_v48 = vadd.f32 %v9282_v8, %v5647_v46 }
 0x2af   : > { %v6489_v4 = vpack.c.bf16 %v5719_v43, %v5719_v43  ;;  %v5720_v31 = vmax.f32 %v5688_v19, 0.0 }
 0x2b0   : > { %v6487_v52 = vpack.c.bf16 %v5717_v15, %v5717_v15  ;;  %v5718_v18 = vmax.f32 %v5686_v48, 0.0 }
 0x2b1   : > { %5880 = vst.msk [vmem:[%s9295_s30 + $0x78] sm:$0xf] %vm5849_vm0, %v6489_v4  ;;  %v6490_v38 = vpack.c.bf16 %v5720_v31, %v5720_v31 }
 0x2b2   : > { %5878 = vst.msk [vmem:[%s9295_s30 + $0x70] sm:$0xf] %vm5849_vm0, %v6487_v52  ;;  %v6488_v0 = vpack.c.bf16 %v5718_v18, %v5718_v18 }
 0x2b3   : > { %5881 = vst.msk [vmem:[%s9295_s30 + $0x7c] sm:$0xf] %vm5849_vm0, %v6490_v38 }
 0x2b4   : > { %5879 = vst.msk [vmem:[%s9295_s30 + $0x74] sm:$0xf] %vm5849_vm0, %v6488_v0 }
 0x2b5 PF: > { %s16_s23 = sadd.s32 1, %s7358_s23   ;;  %s9522_s21 = smov %s7354_s22 }
 0x2b6   : > { %p13_p5 = scmp.ge.s32.totalorder %s16_s23, 4   ;;  %s9523_s22 = smov %s9525_s24 }
 0x2b8   :  { %15 = sbr.rel (!%p13_p5) target bundleno = 2 (0x2), region = 93 }

</bundles_post_ra>
